<compile_context>
chip_gen: v7x
topology: tpu7x:2x2x1
jax: 0.10.0
libtpu: 0.0.40
codegen_flags: <defaults>
</compile_context>

<pallas_src>
import math

import jax
import jax.numpy as jnp
from jax import lax
from jax.experimental import pallas as pl
from jax.experimental.pallas import tpu as pltpu


PROJ_DIM = 256
LN_EPS = 1e-5


def _round_up(x, m):
    return ((x + m - 1) // m) * m


# ----------------------------------------------------------------------------
# Exact (erf) GELU built from Mosaic-supported primitives only.
# Abramowitz & Stegun 7.1.26 rational approximation, |erf err| <= 1.5e-7.
# ----------------------------------------------------------------------------
def _erf(x):
    p = 0.3275911
    a1, a2, a3, a4, a5 = (0.254829592, -0.284496736, 1.421413741,
                          -1.453152027, 1.061405429)
    ax = jnp.abs(x)
    t = 1.0 / (1.0 + p * ax)
    poly = ((((a5 * t + a4) * t + a3) * t + a2) * t + a1) * t
    y = 1.0 - poly * jnp.exp(-ax * ax)
    return jnp.where(x < 0.0, -y, y)


def _gelu_exact(x):
    return 0.5 * x * (1.0 + _erf(x * 0.7071067811865476))


# ----------------------------------------------------------------------------
# Fused kernel: image ProjectionHead + spot ProjectionHead + CLIP loss.
#   vecs_ref rows: [b1_img, b2_img, gamma_img, beta_img,
#                   b1_spot, b2_spot, gamma_spot, beta_spot]   (8, P) f32
# Inputs img_feat/labels arrive pre-padded and already bf16.
# ----------------------------------------------------------------------------
def _bleep_kernel(img_feat_ref, labels_ref,
                  w1i_ref, w2i_ref, w1s_ref, w2s_ref, vecs_ref,
                  o_ref):

    def head(x_bf16, w1_ref, w2_ref, row0):
        b1 = vecs_ref[row0 + 0:row0 + 1, :]
        b2 = vecs_ref[row0 + 1:row0 + 2, :]
        gamma = vecs_ref[row0 + 2:row0 + 3, :]
        beta = vecs_ref[row0 + 3:row0 + 4, :]
        # bf16 MXU inputs, f32 accumulation; all elementwise math in f32.
        projected = jnp.dot(x_bf16, w1_ref[...],
                            preferred_element_type=jnp.float32) + b1
        h = _gelu_exact(projected)                         # exact GELU (erf)
        y = jnp.dot(h.astype(jnp.bfloat16), w2_ref[...],
                    preferred_element_type=jnp.float32) + b2
        r = y + projected                                  # dropout == identity
        mean = jnp.mean(r, axis=-1, keepdims=True)
        var = jnp.mean((r - mean) ** 2, axis=-1, keepdims=True)
        return (r - mean) * lax.rsqrt(var + LN_EPS) * gamma + beta

    img_emb = head(img_feat_ref[...], w1i_ref, w2i_ref, 0)    # (B, P) f32
    spot_emb = head(labels_ref[...], w1s_ref, w2s_ref, 4)     # (B, P) f32

    # Three tiny similarity matmuls directly from registers (contract feature
    # dim on both sides -> no transposes, no VMEM scratch round-trip).
    img_b = img_emb.astype(jnp.bfloat16)
    spot_b = spot_emb.astype(jnp.bfloat16)
    dn = (((1,), (1,)), ((), ()))
    logits = lax.dot_general(spot_b, img_b, dn,
                             preferred_element_type=jnp.float32)   # spot @ img.T
    i_sim = lax.dot_general(img_b, img_b, dn,
                            preferred_element_type=jnp.float32)    # img  @ img.T
    s_sim = lax.dot_general(spot_b, spot_b, dn,
                            preferred_element_type=jnp.float32)    # spot @ spot.T

    sim = (i_sim + s_sim) * 0.5
    sim_s = sim - jnp.max(sim, axis=-1, keepdims=True)
    e = jnp.exp(sim_s)
    targets = e / jnp.sum(e, axis=-1, keepdims=True)       # softmax(sim, -1)

    def lse(z, axis):
        m = jnp.max(z, axis=axis, keepdims=True)
        return m + jnp.log(jnp.sum(jnp.exp(z - m), axis=axis, keepdims=True))

    lse_row = lse(logits, -1)    # (B, 1): row logsumexp  -> spots_loss
    lse_col = lse(logits, 0)     # (1, B): col logsumexp  -> images_loss (no .T)

    # spots_loss[i]  = sum_j -targets[i,j] * (logits[i,j] - lse_row[i])
    # images_loss[j] = sum_i -targets[i,j] * (logits[i,j] - lse_col[j])
    # loss = mean((spots_loss + images_loss) / 2)
    def sum_all(z):   # keepdims (1,1), pure vector-side reductions
        return jnp.sum(jnp.sum(z, axis=1, keepdims=True), axis=0, keepdims=True)

    spots_sum = sum_all(-targets * (logits - lse_row))
    images_sum = sum_all(-targets * (logits - lse_col))
    B = logits.shape[0]
    o_ref[...] = (0.5 / B) * (spots_sum + images_sum)


# ----------------------------------------------------------------------------
# Wrapper.  Expects pre-padded, pre-cast bf16 activations (see prepare_inputs).
# ----------------------------------------------------------------------------
def bleep_forward_pallas(params, image_features, labels):
    B, Ei_pad = image_features.shape
    _, Es_pad = labels.shape
    P = PROJ_DIM
    assert params["w1_img"].shape[0] == Ei_pad
    assert params["w1_spot"].shape[0] == Es_pad
    assert image_features.dtype == jnp.bfloat16 and labels.dtype == jnp.bfloat16

    full = lambda shape: pl.BlockSpec(shape, lambda i: (0,) * len(shape))
    out = pl.pallas_call(
        _bleep_kernel,
        out_shape=jax.ShapeDtypeStruct((1, 1), jnp.float32),
        grid=(1,),
        in_specs=[
            full((B, Ei_pad)),       # image features (bf16)
            full((B, Es_pad)),       # labels / spot features (bf16)
            full((Ei_pad, P)),       # w1 image head (bf16)
            full((P, P)),            # w2 image head (bf16)
            full((Es_pad, P)),       # w1 spot head  (bf16)
            full((P, P)),            # w2 spot head  (bf16)
            full((8, P)),            # packed biases / LN params (f32)
        ],
        out_specs=pl.BlockSpec((1, 1), lambda i: (0, 0)),
        compiler_params=pltpu.CompilerParams(
            dimension_semantics=("arbitrary",)),
        cost_estimate=pl.CostEstimate(flops=20_000_000,
                                      transcendentals=4_100,
                                      bytes_accessed=2_600_000),
    )(image_features, labels,
      params["w1_img"], params["w2_img"],
      params["w1_spot"], params["w2_spot"],
      params["vecs"])
    return out[0, 0]


bleep_forward = jax.jit(bleep_forward_pallas)


def prepare_inputs(params, image_features, labels):
    """Pad feature dims to the pre-padded weight contraction dims and cast to
    bf16 ONCE (pipeline-side), so no pad/cast fusion runs per forward call.
    Padding with zeros is exact because the padded W1 rows are zero."""
    Ei_pad = params["w1_img"].shape[0]
    Es_pad = params["w1_spot"].shape[0]
    if image_features.shape[1] != Ei_pad:
        image_features = jnp.pad(
            image_features, ((0, 0), (0, Ei_pad - image_features.shape[1])))
    if labels.shape[1] != Es_pad:
        labels = jnp.pad(labels, ((0, 0), (0, Es_pad - labels.shape[1])))
    return image_features.astype(jnp.bfloat16), labels.astype(jnp.bfloat16)


# ----------------------------------------------------------------------------
# Parameter construction (deterministic, torch-Linear-style uniform init).
# Weights are stored pre-transposed as (in_features, out_features), padded to
# a 128-multiple contraction dim ONCE here, and cast to bf16 ONCE here.
# ----------------------------------------------------------------------------
def init_bleep_params(key, in_features=768, out_features=3467,
                      projection_dim=PROJ_DIM):
    def head_params(k, e):
        k1, k2, k3, k4 = jax.random.split(k, 4)
        lim1 = 1.0 / math.sqrt(e)
        lim2 = 1.0 / math.sqrt(projection_dim)
        w1 = jax.random.uniform(k1, (e, projection_dim), jnp.float32, -lim1, lim1)
        b1 = jax.random.uniform(k2, (projection_dim,), jnp.float32, -lim1, lim1)
        w2 = jax.random.uniform(k3, (projection_dim, projection_dim),
                                jnp.float32, -lim2, lim2)
        b2 = jax.random.uniform(k4, (projection_dim,), jnp.float32, -lim2, lim2)
        gamma = jnp.ones((projection_dim,), jnp.float32)
        beta = jnp.zeros((projection_dim,), jnp.float32)
        return w1, b1, w2, b2, gamma, beta

    def pad_rows(w):
        e = w.shape[0]
        ep = _round_up(e, 128)
        if ep != e:
            w = jnp.pad(w, ((0, ep - e), (0, 0)))
        return w

    ki, ks = jax.random.split(key)
    w1i, b1i, w2i, b2i, gi, bti = head_params(ki, in_features)
    w1s, b1s, w2s, b2s, gs, bts = head_params(ks, out_features)

    vecs = jnp.stack([b1i, b2i, gi, bti, b1s, b2s, gs, bts], axis=0)  # (8, P)
    return dict(
        w1_img=pad_rows(w1i).astype(jnp.bfloat16),
        w2_img=w2i.astype(jnp.bfloat16),
        w1_spot=pad_rows(w1s).astype(jnp.bfloat16),
        w2_spot=w2s.astype(jnp.bfloat16),
        vecs=vecs,
    )


# ----------------------------------------------------------------------------
# Pure-JAX reference (verification).  Mirrors the kernel's precision choices
# (bf16 MXU inputs, f32 accumulation / elementwise) so the check is tight.
# Uses true erf GELU; the in-kernel polynomial differs by <= 1.5e-7.
# ----------------------------------------------------------------------------
def _ref_head(x_bf, w1_bf, w2_bf, b1, b2, gamma, beta):
    projected = jnp.dot(x_bf, w1_bf, preferred_element_type=jnp.float32) + b1
    h = jax.nn.gelu(projected, approximate=False)
    y = jnp.dot(h.astype(jnp.bfloat16), w2_bf,
                preferred_element_type=jnp.float32) + b2
    r = y + projected
    mean = jnp.mean(r, axis=-1, keepdims=True)
    var = jnp.mean((r - mean) ** 2, axis=-1, keepdims=True)
    return (r - mean) * lax.rsqrt(var + LN_EPS) * gamma + beta


def _ref_forward(params, image_features_p, labels_p):
    v = params["vecs"]
    ie = _ref_head(image_features_p, params["w1_img"], params["w2_img"],
                   v[0], v[1], v[2], v[3])
    se = _ref_head(labels_p, params["w1_spot"], params["w2_spot"],
                   v[4], v[5], v[6], v[7])
    ie_b = ie.astype(jnp.bfloat16)
    se_b = se.astype(jnp.bfloat16)
    logits = jnp.dot(se_b, ie_b.T, preferred_element_type=jnp.float32)
    i_sim = jnp.dot(ie_b, ie_b.T, preferred_element_type=jnp.float32)
    s_sim = jnp.dot(se_b, se_b.T, preferred_element_type=jnp.float32)
    targets = jax.nn.softmax((i_sim + s_sim) / 2.0, axis=-1)
    ce = lambda preds, t: jnp.sum(-t * jax.nn.log_softmax(preds, axis=-1), axis=1)
    spots_loss = ce(logits, targets)
    images_loss = ce(logits.T, targets.T)
    return jnp.mean((images_loss + spots_loss) / 2.0)


if __name__ == "__main__":
    B = 8                 # batch (number of spots / image patches)
    IN_FEATURES = 768     # swin_v2_s head output dim
    OUT_FEATURES = 3467   # spot expression dim (module default)

    key = jax.random.PRNGKey(0)
    k_img_feat, k_labels, k_params = jax.random.split(key, 3)

    # Pre-encoded image features (stand-in for image_encoder(imgs)) and labels.
    image_features = jax.random.normal(k_img_feat, (B, IN_FEATURES), jnp.float32)
    labels = jax.random.normal(k_labels, (B, OUT_FEATURES), jnp.float32)

    params = init_bleep_params(k_params, IN_FEATURES, OUT_FEATURES)

    # Pad + cast once, outside the per-step jitted forward.
    img_p, lab_p = prepare_inputs(params, image_features, labels)
    img_p, lab_p = jax.block_until_ready((img_p, lab_p))

    loss = bleep_forward(params, img_p, lab_p)
    loss = jax.block_until_ready(loss)

    ref = _ref_forward(params, img_p, lab_p)
    assert jnp.isfinite(loss), "non-finite loss"
    assert abs(float(loss) - float(ref)) < 2e-3 + 2e-3 * abs(float(ref)), (
        float(loss), float(ref))

    print("KERNEL_OK")
</pallas_src>

<mosaic_0001>
module attributes {stable_mosaic.version = 11 : i64} {
  func.func @_bleep_kernel(%arg0: i32, %arg1: memref<8x768xbf16, #tpu.memory_space<vmem>>, %arg2: memref<8x3584xbf16, #tpu.memory_space<vmem>>, %arg3: memref<768x256xbf16, #tpu.memory_space<vmem>>, %arg4: memref<256x256xbf16, #tpu.memory_space<vmem>>, %arg5: memref<3584x256xbf16, #tpu.memory_space<vmem>>, %arg6: memref<256x256xbf16, #tpu.memory_space<vmem>>, %arg7: memref<8x256xf32, #tpu.memory_space<vmem>>, %arg8: memref<1x1xf32, #tpu.memory_space<vmem>>) attributes {dimension_semantics = [#tpu.dimension_semantics<arbitrary>], iteration_bounds = array<i64: 1>, scalar_prefetch = 0 : i64, scratch_operands = 0 : i64, tpu.core_type = #tpu.core_type<tc>, window_params = [{pipeline_mode = #tpu.pipeline_mode<synchronous>, transform_indices = @transform_0, window_bounds = array<i64: 8, 768>}, {pipeline_mode = #tpu.pipeline_mode<synchronous>, transform_indices = @transform_1, window_bounds = array<i64: 8, 3584>}, {pipeline_mode = #tpu.pipeline_mode<synchronous>, transform_indices = @transform_2, window_bounds = array<i64: 768, 256>}, {pipeline_mode = #tpu.pipeline_mode<synchronous>, transform_indices = @transform_3, window_bounds = array<i64: 256, 256>}, {pipeline_mode = #tpu.pipeline_mode<synchronous>, transform_indices = @transform_4, window_bounds = array<i64: 3584, 256>}, {pipeline_mode = #tpu.pipeline_mode<synchronous>, transform_indices = @transform_5, window_bounds = array<i64: 256, 256>}, {pipeline_mode = #tpu.pipeline_mode<synchronous>, transform_indices = @transform_6, window_bounds = array<i64: 8, 256>}, {pipeline_mode = #tpu.pipeline_mode<synchronous>, transform_indices = @transform_7, window_bounds = array<i64: 1, 1>}]} {
    %c0 = arith.constant 0 : index
    %c0_0 = arith.constant 0 : index
    %0 = vector.load %arg1[%c0, %c0_0] : memref<8x768xbf16, #tpu.memory_space<vmem>>, vector<8x768xbf16>
    %c0_1 = arith.constant 0 : index
    %c0_2 = arith.constant 0 : index
    %1 = vector.load %arg7[%c0_1, %c0_2] : memref<8x256xf32, #tpu.memory_space<vmem>>, vector<1x256xf32>
    %c1 = arith.constant 1 : index
    %c0_3 = arith.constant 0 : index
    %2 = vector.load %arg7[%c1, %c0_3] : memref<8x256xf32, #tpu.memory_space<vmem>>, vector<1x256xf32>
    %c2 = arith.constant 2 : index
    %c0_4 = arith.constant 0 : index
    %3 = vector.load %arg7[%c2, %c0_4] : memref<8x256xf32, #tpu.memory_space<vmem>>, vector<1x256xf32>
    %c3 = arith.constant 3 : index
    %c0_5 = arith.constant 0 : index
    %4 = vector.load %arg7[%c3, %c0_5] : memref<8x256xf32, #tpu.memory_space<vmem>>, vector<1x256xf32>
    %c0_6 = arith.constant 0 : index
    %c0_7 = arith.constant 0 : index
    %5 = vector.load %arg3[%c0_6, %c0_7] : memref<768x256xbf16, #tpu.memory_space<vmem>>, vector<768x256xbf16>
    %cst = arith.constant dense<0.000000e+00> : vector<8x256xf32>
    %6 = tpu.matmul %0, %5, %cst {dimension_numbers = #tpu.dot_dimension_numbers<[1], [0], [0], [1], [0, 0, 1, 1], [], []>} : vector<8x768xbf16>, vector<768x256xbf16>, vector<8x256xf32> -> vector<8x256xf32>
    %7 = vector.broadcast %1 : vector<1x256xf32> to vector<8x256xf32>
    %8 = arith.addf %6, %7 : vector<8x256xf32>
    %cst_8 = arith.constant 5.000000e-01 : f32
    %9 = vector.broadcast %cst_8 : f32 to vector<8x256xf32>
    %10 = arith.mulf %9, %8 : vector<8x256xf32>
    %cst_9 = arith.constant 0.707106769 : f32
    %11 = vector.broadcast %cst_9 : f32 to vector<8x256xf32>
    %12 = arith.mulf %8, %11 : vector<8x256xf32>
    %13 = math.absf %12 : vector<8x256xf32>
    %cst_10 = arith.constant 0.327591091 : f32
    %14 = vector.broadcast %cst_10 : f32 to vector<8x256xf32>
    %15 = arith.mulf %14, %13 : vector<8x256xf32>
    %cst_11 = arith.constant 1.000000e+00 : f32
    %16 = vector.broadcast %cst_11 : f32 to vector<8x256xf32>
    %17 = arith.addf %16, %15 : vector<8x256xf32>
    %cst_12 = arith.constant 1.000000e+00 : f32
    %18 = vector.broadcast %cst_12 : f32 to vector<8x256xf32>
    %19 = arith.divf %18, %17 : vector<8x256xf32>
    %cst_13 = arith.constant 1.06140542 : f32
    %20 = vector.broadcast %cst_13 : f32 to vector<8x256xf32>
    %21 = arith.mulf %20, %19 : vector<8x256xf32>
    %cst_14 = arith.constant -1.45315206 : f32
    %22 = vector.broadcast %cst_14 : f32 to vector<8x256xf32>
    %23 = arith.addf %21, %22 : vector<8x256xf32>
    %24 = arith.mulf %23, %19 : vector<8x256xf32>
    %cst_15 = arith.constant 1.42141378 : f32
    %25 = vector.broadcast %cst_15 : f32 to vector<8x256xf32>
    %26 = arith.addf %24, %25 : vector<8x256xf32>
    %27 = arith.mulf %26, %19 : vector<8x256xf32>
    %cst_16 = arith.constant -0.284496725 : f32
    %28 = vector.broadcast %cst_16 : f32 to vector<8x256xf32>
    %29 = arith.addf %27, %28 : vector<8x256xf32>
    %30 = arith.mulf %29, %19 : vector<8x256xf32>
    %cst_17 = arith.constant 0.254829586 : f32
    %31 = vector.broadcast %cst_17 : f32 to vector<8x256xf32>
    %32 = arith.addf %30, %31 : vector<8x256xf32>
    %33 = arith.mulf %32, %19 : vector<8x256xf32>
    %cst_18 = arith.constant 0.000000e+00 : f32
    %34 = vector.broadcast %cst_18 : f32 to vector<8x256xf32>
    %35 = arith.subf %34, %13 : vector<8x256xf32>
    %36 = arith.mulf %35, %13 : vector<8x256xf32>
    %37 = math.exp %36 : vector<8x256xf32>
    %38 = arith.mulf %33, %37 : vector<8x256xf32>
    %cst_19 = arith.constant 1.000000e+00 : f32
    %39 = vector.broadcast %cst_19 : f32 to vector<8x256xf32>
    %40 = arith.subf %39, %38 : vector<8x256xf32>
    %cst_20 = arith.constant 0.000000e+00 : f32
    %41 = vector.broadcast %cst_20 : f32 to vector<8x256xf32>
    %42 = arith.cmpf olt, %12, %41 : vector<8x256xf32>
    %cst_21 = arith.constant 0.000000e+00 : f32
    %43 = vector.broadcast %cst_21 : f32 to vector<8x256xf32>
    %44 = arith.subf %43, %40 : vector<8x256xf32>
    %45 = arith.select %42, %44, %40 : vector<8x256xi1>, vector<8x256xf32>
    %cst_22 = arith.constant 1.000000e+00 : f32
    %46 = vector.broadcast %cst_22 : f32 to vector<8x256xf32>
    %47 = arith.addf %46, %45 : vector<8x256xf32>
    %48 = arith.mulf %10, %47 : vector<8x256xf32>
    %49 = arith.truncf %48 : vector<8x256xf32> to vector<8x256xbf16>
    %c0_23 = arith.constant 0 : index
    %c0_24 = arith.constant 0 : index
    %50 = vector.load %arg4[%c0_23, %c0_24] : memref<256x256xbf16, #tpu.memory_space<vmem>>, vector<256x256xbf16>
    %cst_25 = arith.constant dense<0.000000e+00> : vector<8x256xf32>
    %51 = tpu.matmul %49, %50, %cst_25 {dimension_numbers = #tpu.dot_dimension_numbers<[1], [0], [0], [1], [0, 0, 1, 1], [], []>} : vector<8x256xbf16>, vector<256x256xbf16>, vector<8x256xf32> -> vector<8x256xf32>
    %52 = vector.broadcast %2 : vector<1x256xf32> to vector<8x256xf32>
    %53 = arith.addf %51, %52 : vector<8x256xf32>
    %54 = arith.addf %53, %8 : vector<8x256xf32>
    %cst_26 = arith.constant dense<0.000000e+00> : vector<8xf32>
    %55 = vector.multi_reduction <add>, %54, %cst_26 [1] : vector<8x256xf32> to vector<8xf32>
    %56 = vector.shape_cast %55 : vector<8xf32> to vector<8x1xf32>
    %cst_27 = arith.constant 2.560000e+02 : f32
    %57 = vector.broadcast %cst_27 : f32 to vector<8x1xf32>
    %58 = arith.divf %56, %57 : vector<8x1xf32>
    %59 = vector.broadcast %58 : vector<8x1xf32> to vector<8x256xf32>
    %60 = arith.subf %54, %59 : vector<8x256xf32>
    %61 = arith.mulf %60, %60 : vector<8x256xf32>
    %cst_28 = arith.constant dense<0.000000e+00> : vector<8xf32>
    %62 = vector.multi_reduction <add>, %61, %cst_28 [1] : vector<8x256xf32> to vector<8xf32>
    %63 = vector.shape_cast %62 : vector<8xf32> to vector<8x1xf32>
    %cst_29 = arith.constant 2.560000e+02 : f32
    %64 = vector.broadcast %cst_29 : f32 to vector<8x1xf32>
    %65 = arith.divf %63, %64 : vector<8x1xf32>
    %66 = vector.broadcast %58 : vector<8x1xf32> to vector<8x256xf32>
    %67 = arith.subf %54, %66 : vector<8x256xf32>
    %cst_30 = arith.constant 9.99999974E-6 : f32
    %68 = vector.broadcast %cst_30 : f32 to vector<8x1xf32>
    %69 = arith.addf %65, %68 : vector<8x1xf32>
    %70 = math.rsqrt %69 : vector<8x1xf32>
    %71 = vector.broadcast %70 : vector<8x1xf32> to vector<8x256xf32>
    %72 = arith.mulf %67, %71 : vector<8x256xf32>
    %73 = vector.broadcast %3 : vector<1x256xf32> to vector<8x256xf32>
    %74 = arith.mulf %72, %73 : vector<8x256xf32>
    %75 = vector.broadcast %4 : vector<1x256xf32> to vector<8x256xf32>
    %76 = arith.addf %74, %75 : vector<8x256xf32>
    %c0_31 = arith.constant 0 : index
    %c0_32 = arith.constant 0 : index
    %77 = vector.load %arg2[%c0_31, %c0_32] : memref<8x3584xbf16, #tpu.memory_space<vmem>>, vector<8x3584xbf16>
    %c4 = arith.constant 4 : index
    %c0_33 = arith.constant 0 : index
    %78 = vector.load %arg7[%c4, %c0_33] : memref<8x256xf32, #tpu.memory_space<vmem>>, vector<1x256xf32>
    %c5 = arith.constant 5 : index
    %c0_34 = arith.constant 0 : index
    %79 = vector.load %arg7[%c5, %c0_34] : memref<8x256xf32, #tpu.memory_space<vmem>>, vector<1x256xf32>
    %c6 = arith.constant 6 : index
    %c0_35 = arith.constant 0 : index
    %80 = vector.load %arg7[%c6, %c0_35] : memref<8x256xf32, #tpu.memory_space<vmem>>, vector<1x256xf32>
    %c7 = arith.constant 7 : index
    %c0_36 = arith.constant 0 : index
    %81 = vector.load %arg7[%c7, %c0_36] : memref<8x256xf32, #tpu.memory_space<vmem>>, vector<1x256xf32>
    %c0_37 = arith.constant 0 : index
    %c0_38 = arith.constant 0 : index
    %82 = vector.load %arg5[%c0_37, %c0_38] : memref<3584x256xbf16, #tpu.memory_space<vmem>>, vector<3584x256xbf16>
    %cst_39 = arith.constant dense<0.000000e+00> : vector<8x256xf32>
    %83 = tpu.matmul %77, %82, %cst_39 {dimension_numbers = #tpu.dot_dimension_numbers<[1], [0], [0], [1], [0, 0, 1, 1], [], []>} : vector<8x3584xbf16>, vector<3584x256xbf16>, vector<8x256xf32> -> vector<8x256xf32>
    %84 = vector.broadcast %78 : vector<1x256xf32> to vector<8x256xf32>
    %85 = arith.addf %83, %84 : vector<8x256xf32>
    %cst_40 = arith.constant 5.000000e-01 : f32
    %86 = vector.broadcast %cst_40 : f32 to vector<8x256xf32>
    %87 = arith.mulf %86, %85 : vector<8x256xf32>
    %cst_41 = arith.constant 0.707106769 : f32
    %88 = vector.broadcast %cst_41 : f32 to vector<8x256xf32>
    %89 = arith.mulf %85, %88 : vector<8x256xf32>
    %90 = math.absf %89 : vector<8x256xf32>
    %cst_42 = arith.constant 0.327591091 : f32
    %91 = vector.broadcast %cst_42 : f32 to vector<8x256xf32>
    %92 = arith.mulf %91, %90 : vector<8x256xf32>
    %cst_43 = arith.constant 1.000000e+00 : f32
    %93 = vector.broadcast %cst_43 : f32 to vector<8x256xf32>
    %94 = arith.addf %93, %92 : vector<8x256xf32>
    %cst_44 = arith.constant 1.000000e+00 : f32
    %95 = vector.broadcast %cst_44 : f32 to vector<8x256xf32>
    %96 = arith.divf %95, %94 : vector<8x256xf32>
    %cst_45 = arith.constant 1.06140542 : f32
    %97 = vector.broadcast %cst_45 : f32 to vector<8x256xf32>
    %98 = arith.mulf %97, %96 : vector<8x256xf32>
    %cst_46 = arith.constant -1.45315206 : f32
    %99 = vector.broadcast %cst_46 : f32 to vector<8x256xf32>
    %100 = arith.addf %98, %99 : vector<8x256xf32>
    %101 = arith.mulf %100, %96 : vector<8x256xf32>
    %cst_47 = arith.constant 1.42141378 : f32
    %102 = vector.broadcast %cst_47 : f32 to vector<8x256xf32>
    %103 = arith.addf %101, %102 : vector<8x256xf32>
    %104 = arith.mulf %103, %96 : vector<8x256xf32>
    %cst_48 = arith.constant -0.284496725 : f32
    %105 = vector.broadcast %cst_48 : f32 to vector<8x256xf32>
    %106 = arith.addf %104, %105 : vector<8x256xf32>
    %107 = arith.mulf %106, %96 : vector<8x256xf32>
    %cst_49 = arith.constant 0.254829586 : f32
    %108 = vector.broadcast %cst_49 : f32 to vector<8x256xf32>
    %109 = arith.addf %107, %108 : vector<8x256xf32>
    %110 = arith.mulf %109, %96 : vector<8x256xf32>
    %cst_50 = arith.constant 0.000000e+00 : f32
    %111 = vector.broadcast %cst_50 : f32 to vector<8x256xf32>
    %112 = arith.subf %111, %90 : vector<8x256xf32>
    %113 = arith.mulf %112, %90 : vector<8x256xf32>
    %114 = math.exp %113 : vector<8x256xf32>
    %115 = arith.mulf %110, %114 : vector<8x256xf32>
    %cst_51 = arith.constant 1.000000e+00 : f32
    %116 = vector.broadcast %cst_51 : f32 to vector<8x256xf32>
    %117 = arith.subf %116, %115 : vector<8x256xf32>
    %cst_52 = arith.constant 0.000000e+00 : f32
    %118 = vector.broadcast %cst_52 : f32 to vector<8x256xf32>
    %119 = arith.cmpf olt, %89, %118 : vector<8x256xf32>
    %cst_53 = arith.constant 0.000000e+00 : f32
    %120 = vector.broadcast %cst_53 : f32 to vector<8x256xf32>
    %121 = arith.subf %120, %117 : vector<8x256xf32>
    %122 = arith.select %119, %121, %117 : vector<8x256xi1>, vector<8x256xf32>
    %cst_54 = arith.constant 1.000000e+00 : f32
    %123 = vector.broadcast %cst_54 : f32 to vector<8x256xf32>
    %124 = arith.addf %123, %122 : vector<8x256xf32>
    %125 = arith.mulf %87, %124 : vector<8x256xf32>
    %126 = arith.truncf %125 : vector<8x256xf32> to vector<8x256xbf16>
    %c0_55 = arith.constant 0 : index
    %c0_56 = arith.constant 0 : index
    %127 = vector.load %arg6[%c0_55, %c0_56] : memref<256x256xbf16, #tpu.memory_space<vmem>>, vector<256x256xbf16>
    %cst_57 = arith.constant dense<0.000000e+00> : vector<8x256xf32>
    %128 = tpu.matmul %126, %127, %cst_57 {dimension_numbers = #tpu.dot_dimension_numbers<[1], [0], [0], [1], [0, 0, 1, 1], [], []>} : vector<8x256xbf16>, vector<256x256xbf16>, vector<8x256xf32> -> vector<8x256xf32>
    %129 = vector.broadcast %79 : vector<1x256xf32> to vector<8x256xf32>
    %130 = arith.addf %128, %129 : vector<8x256xf32>
    %131 = arith.addf %130, %85 : vector<8x256xf32>
    %cst_58 = arith.constant dense<0.000000e+00> : vector<8xf32>
    %132 = vector.multi_reduction <add>, %131, %cst_58 [1] : vector<8x256xf32> to vector<8xf32>
    %133 = vector.shape_cast %132 : vector<8xf32> to vector<8x1xf32>
    %cst_59 = arith.constant 2.560000e+02 : f32
    %134 = vector.broadcast %cst_59 : f32 to vector<8x1xf32>
    %135 = arith.divf %133, %134 : vector<8x1xf32>
    %136 = vector.broadcast %135 : vector<8x1xf32> to vector<8x256xf32>
    %137 = arith.subf %131, %136 : vector<8x256xf32>
    %138 = arith.mulf %137, %137 : vector<8x256xf32>
    %cst_60 = arith.constant dense<0.000000e+00> : vector<8xf32>
    %139 = vector.multi_reduction <add>, %138, %cst_60 [1] : vector<8x256xf32> to vector<8xf32>
    %140 = vector.shape_cast %139 : vector<8xf32> to vector<8x1xf32>
    %cst_61 = arith.constant 2.560000e+02 : f32
    %141 = vector.broadcast %cst_61 : f32 to vector<8x1xf32>
    %142 = arith.divf %140, %141 : vector<8x1xf32>
    %143 = vector.broadcast %135 : vector<8x1xf32> to vector<8x256xf32>
    %144 = arith.subf %131, %143 : vector<8x256xf32>
    %cst_62 = arith.constant 9.99999974E-6 : f32
    %145 = vector.broadcast %cst_62 : f32 to vector<8x1xf32>
    %146 = arith.addf %142, %145 : vector<8x1xf32>
    %147 = math.rsqrt %146 : vector<8x1xf32>
    %148 = vector.broadcast %147 : vector<8x1xf32> to vector<8x256xf32>
    %149 = arith.mulf %144, %148 : vector<8x256xf32>
    %150 = vector.broadcast %80 : vector<1x256xf32> to vector<8x256xf32>
    %151 = arith.mulf %149, %150 : vector<8x256xf32>
    %152 = vector.broadcast %81 : vector<1x256xf32> to vector<8x256xf32>
    %153 = arith.addf %151, %152 : vector<8x256xf32>
    %154 = arith.truncf %76 : vector<8x256xf32> to vector<8x256xbf16>
    %155 = arith.truncf %153 : vector<8x256xf32> to vector<8x256xbf16>
    %cst_63 = arith.constant dense<0.000000e+00> : vector<8x8xf32>
    %156 = tpu.matmul %155, %154, %cst_63 {dimension_numbers = #tpu.dot_dimension_numbers<[1], [1], [0], [0], [0, 0, 1, 0], [], []>} : vector<8x256xbf16>, vector<8x256xbf16>, vector<8x8xf32> -> vector<8x8xf32>
    %cst_64 = arith.constant dense<0.000000e+00> : vector<8x8xf32>
    %157 = tpu.matmul %154, %154, %cst_64 {dimension_numbers = #tpu.dot_dimension_numbers<[1], [1], [0], [0], [0, 0, 1, 0], [], []>} : vector<8x256xbf16>, vector<8x256xbf16>, vector<8x8xf32> -> vector<8x8xf32>
    %cst_65 = arith.constant dense<0.000000e+00> : vector<8x8xf32>
    %158 = tpu.matmul %155, %155, %cst_65 {dimension_numbers = #tpu.dot_dimension_numbers<[1], [1], [0], [0], [0, 0, 1, 0], [], []>} : vector<8x256xbf16>, vector<8x256xbf16>, vector<8x8xf32> -> vector<8x8xf32>
    %159 = arith.addf %157, %158 : vector<8x8xf32>
    %cst_66 = arith.constant 5.000000e-01 : f32
    %160 = vector.broadcast %cst_66 : f32 to vector<8x8xf32>
    %161 = arith.mulf %159, %160 : vector<8x8xf32>
    %cst_67 = arith.constant dense<0xFF800000> : vector<8xf32>
    %162 = vector.multi_reduction <maximumf>, %161, %cst_67 [1] : vector<8x8xf32> to vector<8xf32>
    %163 = vector.shape_cast %162 : vector<8xf32> to vector<8x1xf32>
    %164 = vector.broadcast %163 : vector<8x1xf32> to vector<8x8xf32>
    %165 = arith.subf %161, %164 : vector<8x8xf32>
    %166 = math.exp %165 : vector<8x8xf32>
    %cst_68 = arith.constant dense<0.000000e+00> : vector<8xf32>
    %167 = vector.multi_reduction <add>, %166, %cst_68 [1] : vector<8x8xf32> to vector<8xf32>
    %168 = vector.shape_cast %167 : vector<8xf32> to vector<8x1xf32>
    %169 = vector.broadcast %168 : vector<8x1xf32> to vector<8x8xf32>
    %170 = arith.divf %166, %169 : vector<8x8xf32>
    %cst_69 = arith.constant dense<0xFF800000> : vector<8xf32>
    %171 = vector.multi_reduction <maximumf>, %156, %cst_69 [1] : vector<8x8xf32> to vector<8xf32>
    %172 = vector.shape_cast %171 : vector<8xf32> to vector<8x1xf32>
    %173 = vector.broadcast %172 : vector<8x1xf32> to vector<8x8xf32>
    %174 = arith.subf %156, %173 : vector<8x8xf32>
    %175 = math.exp %174 : vector<8x8xf32>
    %cst_70 = arith.constant dense<0.000000e+00> : vector<8xf32>
    %176 = vector.multi_reduction <add>, %175, %cst_70 [1] : vector<8x8xf32> to vector<8xf32>
    %177 = vector.shape_cast %176 : vector<8xf32> to vector<8x1xf32>
    %178 = math.log %177 : vector<8x1xf32>
    %179 = arith.addf %172, %178 : vector<8x1xf32>
    %cst_71 = arith.constant dense<0xFF800000> : vector<8xf32>
    %180 = vector.multi_reduction <maximumf>, %156, %cst_71 [0] : vector<8x8xf32> to vector<8xf32>
    %181 = vector.shape_cast %180 : vector<8xf32> to vector<1x8xf32>
    %182 = vector.broadcast %181 : vector<1x8xf32> to vector<8x8xf32>
    %183 = arith.subf %156, %182 : vector<8x8xf32>
    %184 = math.exp %183 : vector<8x8xf32>
    %cst_72 = arith.constant dense<0.000000e+00> : vector<8xf32>
    %185 = vector.multi_reduction <add>, %184, %cst_72 [0] : vector<8x8xf32> to vector<8xf32>
    %186 = vector.shape_cast %185 : vector<8xf32> to vector<1x8xf32>
    %187 = math.log %186 : vector<1x8xf32>
    %188 = arith.addf %181, %187 : vector<1x8xf32>
    %cst_73 = arith.constant 0.000000e+00 : f32
    %189 = vector.broadcast %cst_73 : f32 to vector<8x8xf32>
    %190 = arith.subf %189, %170 : vector<8x8xf32>
    %191 = vector.broadcast %179 : vector<8x1xf32> to vector<8x8xf32>
    %192 = arith.subf %156, %191 : vector<8x8xf32>
    %193 = arith.mulf %190, %192 : vector<8x8xf32>
    %cst_74 = arith.constant dense<0.000000e+00> : vector<8xf32>
    %194 = vector.multi_reduction <add>, %193, %cst_74 [1] : vector<8x8xf32> to vector<8xf32>
    %195 = vector.shape_cast %194 : vector<8xf32> to vector<8x1xf32>
    %cst_75 = arith.constant dense<0.000000e+00> : vector<1xf32>
    %196 = vector.multi_reduction <add>, %195, %cst_75 [0] : vector<8x1xf32> to vector<1xf32>
    %197 = vector.shape_cast %196 : vector<1xf32> to vector<1x1xf32>
    %cst_76 = arith.constant 0.000000e+00 : f32
    %198 = vector.broadcast %cst_76 : f32 to vector<8x8xf32>
    %199 = arith.subf %198, %170 : vector<8x8xf32>
    %200 = vector.broadcast %188 : vector<1x8xf32> to vector<8x8xf32>
    %201 = arith.subf %156, %200 : vector<8x8xf32>
    %202 = arith.mulf %199, %201 : vector<8x8xf32>
    %cst_77 = arith.constant dense<0.000000e+00> : vector<8xf32>
    %203 = vector.multi_reduction <add>, %202, %cst_77 [1] : vector<8x8xf32> to vector<8xf32>
    %204 = vector.shape_cast %203 : vector<8xf32> to vector<8x1xf32>
    %cst_78 = arith.constant dense<0.000000e+00> : vector<1xf32>
    %205 = vector.multi_reduction <add>, %204, %cst_78 [0] : vector<8x1xf32> to vector<1xf32>
    %206 = vector.shape_cast %205 : vector<1xf32> to vector<1x1xf32>
    %207 = arith.addf %197, %206 : vector<1x1xf32>
    %cst_79 = arith.constant 6.250000e-02 : f32
    %208 = vector.broadcast %cst_79 : f32 to vector<1x1xf32>
    %209 = arith.mulf %208, %207 : vector<1x1xf32>
    %c0_80 = arith.constant 0 : index
    %c0_81 = arith.constant 0 : index
    %210 = vector.load %arg8[%c0_80, %c0_81] : memref<1x1xf32, #tpu.memory_space<vmem>>, vector<1x1xf32>
    tpu.vector_store %arg8[%c0_80, %c0_81], %209 {strides = array<i32>} : memref<1x1xf32, #tpu.memory_space<vmem>>, vector<1x1xf32>,
    return
  }
  func.func @transform_0(%arg0: i32) -> (i32, i32) {
    %c0_i32 = arith.constant 0 : i32
    %c0_i32_0 = arith.constant 0 : i32
    %c0_i32_1 = arith.constant 0 : i32
    return %c0_i32, %c0_i32_0 : i32, i32
  }
  func.func @transform_1(%arg0: i32) -> (i32, i32) {
    %c0_i32 = arith.constant 0 : i32
    %c0_i32_0 = arith.constant 0 : i32
    %c0_i32_1 = arith.constant 0 : i32
    return %c0_i32, %c0_i32_0 : i32, i32
  }
  func.func @transform_2(%arg0: i32) -> (i32, i32) {
    %c0_i32 = arith.constant 0 : i32
    %c0_i32_0 = arith.constant 0 : i32
    %c0_i32_1 = arith.constant 0 : i32
    return %c0_i32, %c0_i32_0 : i32, i32
  }
  func.func @transform_3(%arg0: i32) -> (i32, i32) {
    %c0_i32 = arith.constant 0 : i32
    %c0_i32_0 = arith.constant 0 : i32
    %c0_i32_1 = arith.constant 0 : i32
    return %c0_i32, %c0_i32_0 : i32, i32
  }
  func.func @transform_4(%arg0: i32) -> (i32, i32) {
    %c0_i32 = arith.constant 0 : i32
    %c0_i32_0 = arith.constant 0 : i32
    %c0_i32_1 = arith.constant 0 : i32
    return %c0_i32, %c0_i32_0 : i32, i32
  }
  func.func @transform_5(%arg0: i32) -> (i32, i32) {
    %c0_i32 = arith.constant 0 : i32
    %c0_i32_0 = arith.constant 0 : i32
    %c0_i32_1 = arith.constant 0 : i32
    return %c0_i32, %c0_i32_0 : i32, i32
  }
  func.func @transform_6(%arg0: i32) -> (i32, i32) {
    %c0_i32 = arith.constant 0 : i32
    %c0_i32_0 = arith.constant 0 : i32
    %c0_i32_1 = arith.constant 0 : i32
    return %c0_i32, %c0_i32_0 : i32, i32
  }
  func.func @transform_7(%arg0: i32) -> (i32, i32) {
    %c0_i32 = arith.constant 0 : i32
    %c0_i32_0 = arith.constant 0 : i32
    %c0_i32_1 = arith.constant 0 : i32
    return %c0_i32, %c0_i32_0 : i32, i32
  }
}

</mosaic_0001>

<bundles_post_ra>
// kernel: bleep_forward_pallas.1
= control target key start
LH: loop header
LB: loop body
LE: loop exit
PB: predicated region body
PF: predicated region fallthrough
CT: control target
= control target key end

     0   :  { %12 = vsyncpa [#allocation3], 0  ;;  %s7356_s0 = inlined_call_operand.hbm [shape: bf16[8,768], index: 0, kind: input, shape index: {}]   ;;  %s7357_s1 = inlined_call_operand.hbm [shape: bf16[8,3584], index: 1, kind: input, shape index: {}]   ;;  %s7358_s2 = inlined_call_operand.hbm [shape: bf16[768,256], index: 2, kind: input, shape index: {}]   ;;  %s7359_s3 = inlined_call_operand.hbm [shape: bf16[256,256], index: 3, kind: input, shape index: {}]   ;;  %s7360_s4 = inlined_call_operand.hbm [shape: bf16[3584,256], index: 4, kind: input, shape index: {}]   ;;  %s7361_s5 = inlined_call_operand.hbm [shape: bf16[256,256], index: 5, kind: input, shape index: {}]   ;;  %s7362_s6 = inlined_call_operand.hbm [shape: f32[8,256], index: 6, kind: input, shape index: {}]   ;;  %s7363_s7 = inlined_call_operand.hbm [shape: f32[1,1], index: 7, kind: output, shape index: {}]  }
   0x1   :  { %13 = vsyncpa [#allocation6], 0 }
   0x2   :  { %14 = vsyncpa [#allocation9], 0 }
   0x3   :  { %15 = vsyncpa [#allocation12], 0 }
   0x4   :  { %16 = vsyncpa [#allocation4], 0  ;;  %s7035_s24 = smov [#allocation5]   ;;  %s6849_s28 = scalar_lea.hbm %s7357_s1, 1792 }
   0x5   :  { %s33_s25 = sshll.u32 %s7035_s24, 4  ;;  %p6850_p0 = scmp.ne.s32.totalorder %s7357_s1, %s6849_s28  ;;  %s34_s25 = int_to_ptr.vmem [resolvable:$true] %s33_s25 }
   0x6   :  { %p6853_p1 = scmp.lt.u32.totalorder %s6849_s28, %s7357_s1 }
   0x8   :  { %p6855_p2 = pnand %p6853_p1, %p6850_p0 }
   0xa   :  { %6858 = shalt.err (!%p6855_p2)
}
   0xb   :  { %s6859_s10 = scalar_lea.vmem %s34_s25, 1792  ;;  %p6864_p4 = scmp.lt.s32.totalorder %s34_s25, %s34_s25 }
   0xc   :  { %p6860_p3 = scmp.ne.s32.totalorder %s34_s25, %s6859_s10  ;;  %p6865_p5 = scmp.lt.s32.totalorder %s6859_s10, %s6859_s10 }
   0xe   :  { %p6866_p6 = por %p6865_p5, %p6864_p4 }
  0x10   :  { %p6867_p7 = pnand %p6866_p6, %p6860_p3 }
  0x12   :  { %6870 = shalt.err (!%p6867_p7)
}
  0x13   :  { %36 = dma.hbm_to_vmem [thread:$0]  %s7357_s1, 1792, %s34_s25, [#allocation6]  }
  0x14   :  { %s7036_s13 = smov [#allocation8]   ;;  %s7037_s15 = smov [#allocation11]  }
  0x15   :  { %s54_s14 = sshll.u32 %s7036_s13, 4  ;;  %s78_s16 = sshll.u32 %s7037_s15, 4  ;;  %s55_s14 = int_to_ptr.vmem [resolvable:$true] %s54_s14  ;;  %s79_s16 = int_to_ptr.vmem [resolvable:$true] %s78_s16 }
  0x16   :  { %s6871_s19 = scalar_lea.hbm %s7359_s3, 4096 }
  0x17   :  { %p6872_p8 = scmp.ne.s32.totalorder %s7359_s3, %s6871_s19  ;;  %p6875_p9 = scmp.lt.u32.totalorder %s6871_s19, %s7359_s3 }
  0x19   :  { %p6877_p10 = pnand %p6875_p9, %p6872_p8 }
  0x1b   :  { %6880 = shalt.err (!%p6877_p10)
}
  0x1c   :  { %s6881_s1 = scalar_lea.vmem %s55_s14, 4096  ;;  %p6886_p12 = scmp.lt.s32.totalorder %s55_s14, %s55_s14 }
  0x1d   :  { %p6882_p11 = scmp.ne.s32.totalorder %s55_s14, %s6881_s1  ;;  %p6887_p13 = scmp.lt.s32.totalorder %s6881_s1, %s6881_s1 }
  0x1f   :  { %p6888_p0 = por %p6887_p13, %p6886_p12 }
  0x21   :  { %p6889_p1 = pnand %p6888_p0, %p6882_p11 }
  0x23   :  { %6892 = shalt.err (!%p6889_p1)
}
  0x24   :  { %s7038_s24 = smov 128   ;;  %s7039_s25 = smov 8  }
  0x25   :  { %60 = dma.hbm_to_vmem [thread:$0]  %s7359_s3, 4096, %s55_s14, [#allocation9], %s7038_s24, %s7038_s24, %s7039_s25  }
  0x26   :  { %s6893_s30 = scalar_lea.hbm %s7361_s5, 4096 }
  0x27   :  { %p6894_p2 = scmp.ne.s32.totalorder %s7361_s5, %s6893_s30  ;;  %p6897_p3 = scmp.lt.u32.totalorder %s6893_s30, %s7361_s5 }
  0x29   :  { %p6899_p4 = pnand %p6897_p3, %p6894_p2 }
  0x2b   :  { %6902 = shalt.err (!%p6899_p4)
}
  0x2c   :  { %s6903_s12 = scalar_lea.vmem %s79_s16, 4096  ;;  %p6908_p6 = scmp.lt.s32.totalorder %s79_s16, %s79_s16 }
  0x2d   :  { %p6904_p5 = scmp.ne.s32.totalorder %s79_s16, %s6903_s12  ;;  %p6909_p7 = scmp.lt.s32.totalorder %s6903_s12, %s6903_s12 }
  0x2f   :  { %p6910_p8 = por %p6909_p7, %p6908_p6 }
  0x31   :  { %p6911_p9 = pnand %p6910_p8, %p6904_p5 }
  0x33   :  { %6914 = shalt.err (!%p6911_p9)
}
  0x34   :  { %84 = dma.hbm_to_vmem [thread:$0]  %s7361_s5, 4096, %s79_s16, [#allocation12], %s7038_s24, %s7038_s24, %s7039_s25  }
  0x35   :  { %s7040_s14 = smov [#allocation2]   ;;  %s7041_s17 = smov [#allocation7]  }
  0x36   :  { %s23_s15 = sshll.u32 %s7040_s14, 4  ;;  %s42_s18 = sshll.u32 %s7041_s17, 4  ;;  %s24_s15 = int_to_ptr.vmem [resolvable:$true] %s23_s15  ;;  %s43_s18 = int_to_ptr.vmem [resolvable:$true] %s42_s18 }
  0x37   :  { %s6915_s21 = scalar_lea.hbm %s7356_s0, 384 }
  0x38   :  { %p6916_p10 = scmp.ne.s32.totalorder %s7356_s0, %s6915_s21  ;;  %p6919_p11 = scmp.lt.u32.totalorder %s6915_s21, %s7356_s0 }
  0x3a   :  { %p6921_p12 = pnand %p6919_p11, %p6916_p10 }
  0x3c   :  { %6924 = shalt.err (!%p6921_p12)
}
  0x3d   :  { %s6925_s5 = scalar_lea.vmem %s24_s15, 384  ;;  %p6930_p0 = scmp.lt.s32.totalorder %s24_s15, %s24_s15 }
  0x3e   :  { %p6926_p13 = scmp.ne.s32.totalorder %s24_s15, %s6925_s5  ;;  %p6931_p1 = scmp.lt.s32.totalorder %s6925_s5, %s6925_s5 }
  0x40   :  { %p6932_p2 = por %p6931_p1, %p6930_p0 }
  0x42   :  { %p6933_p3 = pnand %p6932_p2, %p6926_p13 }
  0x44   :  { %6936 = shalt.err (!%p6933_p3)
}
  0x45   :  { %26 = dma.hbm_to_vmem [thread:$0]  %s7356_s0, 384, %s24_s15, [#allocation3]  }
  0x46   :  { %s6937_s30 = scalar_lea.hbm %s7358_s2, 12288 }
  0x47   :  { %p6938_p4 = scmp.ne.s32.totalorder %s7358_s2, %s6937_s30  ;;  %p6941_p5 = scmp.lt.u32.totalorder %s6937_s30, %s7358_s2 }
  0x49   :  { %p6943_p6 = pnand %p6941_p5, %p6938_p4 }
  0x4b   :  { %6946 = shalt.err (!%p6943_p6)
}
  0x4c   :  { %s6947_s12 = scalar_lea.vmem %s43_s18, 12288  ;;  %p6952_p8 = scmp.lt.s32.totalorder %s43_s18, %s43_s18 }
  0x4d   :  { %p6948_p7 = scmp.ne.s32.totalorder %s43_s18, %s6947_s12  ;;  %p6953_p9 = scmp.lt.s32.totalorder %s6947_s12, %s6947_s12 }
  0x4f   :  { %p6954_p10 = por %p6953_p9, %p6952_p8 }
  0x51   :  { %p6955_p11 = pnand %p6954_p10, %p6948_p7 }
  0x53   :  { %6958 = shalt.err (!%p6955_p11)
}
  0x54   :  { %48 = dma.hbm_to_vmem [thread:$0]  %s7358_s2, 12288, %s43_s18, [#allocation6], %s7038_s24, %s7038_s24, %s7039_s25  }
  0x55   :  { %s7042_s13 = smov [#allocation10]   ;;  %s7043_s15 = smov [#allocation13]  }
  0x56   :  { %s66_s14 = sshll.u32 %s7042_s13, 4  ;;  %s91_s17 = sshll.u32 %s7043_s15, 4  ;;  %s67_s14 = int_to_ptr.vmem [resolvable:$true] %s66_s14  ;;  %s92_s17 = int_to_ptr.vmem [resolvable:$true] %s91_s17 }
  0x57   :  { %s6959_s21 = scalar_lea.hbm %s7360_s4, 57344 }
  0x58   :  { %p6960_p12 = scmp.ne.s32.totalorder %s7360_s4, %s6959_s21  ;;  %p6963_p13 = scmp.lt.u32.totalorder %s6959_s21, %s7360_s4 }
  0x5a   :  { %p6965_p0 = pnand %p6963_p13, %p6960_p12 }
  0x5c   :  { %6968 = shalt.err (!%p6965_p0)
}
  0x5d   :  { %s6969_s2 = scalar_lea.vmem %s67_s14, 57344  ;;  %p6974_p2 = scmp.lt.s32.totalorder %s67_s14, %s67_s14 }
  0x5e   :  { %p6970_p1 = scmp.ne.s32.totalorder %s67_s14, %s6969_s2  ;;  %p6975_p3 = scmp.lt.s32.totalorder %s6969_s2, %s6969_s2 }
  0x60   :  { %p6976_p4 = por %p6975_p3, %p6974_p2 }
  0x62   :  { %p6977_p5 = pnand %p6976_p4, %p6970_p1 }
  0x64   :  { %6980 = shalt.err (!%p6977_p5)
}
  0x65   :  { %72 = dma.hbm_to_vmem [thread:$0]  %s7360_s4, 57344, %s67_s14, [#allocation9], %s7038_s24, %s7038_s24, %s7039_s25  }
  0x66   :  { %s6981_s28 = scalar_lea.hbm %s7362_s6, 256 }
  0x67   :  { %p6982_p6 = scmp.ne.s32.totalorder %s7362_s6, %s6981_s28  ;;  %p6985_p7 = scmp.lt.u32.totalorder %s6981_s28, %s7362_s6 }
  0x69   :  { %p6987_p8 = pnand %p6985_p7, %p6982_p6 }
  0x6b   :  { %6990 = shalt.err (!%p6987_p8)
}
  0x6c   :  { %s6991_s10 = scalar_lea.vmem %s92_s17, 256  ;;  %p6996_p10 = scmp.lt.s32.totalorder %s92_s17, %s92_s17 }
  0x6d   :  { %p6992_p9 = scmp.ne.s32.totalorder %s92_s17, %s6991_s10  ;;  %p6997_p11 = scmp.lt.s32.totalorder %s6991_s10, %s6991_s10 }
  0x6f   :  { %p6998_p12 = por %p6997_p11, %p6996_p10 }
  0x71   :  { %p6999_p13 = pnand %p6998_p12, %p6992_p9 }
  0x73   :  { %7002 = shalt.err (!%p6999_p13)
}
  0x74   :  { %94 = dma.hbm_to_vmem [thread:$0]  %s7362_s6, 256, %s92_s17, [#allocation12]  }
  0x75   :  { %7025 = dma.done.wait [#allocation3], 384  }
  0x76   :  { %7026 = vsyncadd [#allocation3], 4294966912 }
  0x77   :  { %7027 = dma.done.wait [#allocation6], 14080  }
  0x78   :  { %7028 = vsyncadd [#allocation6], 4294953216 }
  0x79   :  { %7029 = dma.done.wait [#allocation9], 61440  }
  0x7a   :  { %7030 = vsyncadd [#allocation9], 4294905856 }
  0x7b   :  { %7031 = dma.done.wait [#allocation12], 4352  }
  0x7c   :  { %7032 = vsyncadd [#allocation12], 4294962944  ;;  %v5871_v0 = vld [vmem:[#allocation7 + $0x4] ss:$8 sps:$4 sm:$0xff]   ;;  %v5875_v2 = vld [vmem:[#allocation7] ss:$8 sps:$4 sm:$0xff]  }
  0x7d   :  { %v5873_v1 = vld [vmem:[#allocation10 + $0x404] ss:$8 sps:$4 sm:$0xff]   ;;  %735 = vmatprep.subr.bf16.mxu0 %v5871_v0  ;;  %v5876_v3 = vld [vmem:[#allocation10 + $0x400] ss:$8 sps:$4 sm:$0xff]   ;;  %v5877_v4 = vld [vmem:[#allocation7 + $0x14] ss:$8 sps:$4 sm:$0xff]  }
  0x7e   :  { %4186 = vmatprep.subr.bf16.mxu1 %v5873_v1  ;;  %736 = vmatpush1.bf16.msra.mxu0 %v5875_v2  ;;  %v5879_v5 = vld [vmem:[#allocation10 + $0x414] ss:$8 sps:$4 sm:$0xff]   ;;  %v5881_v6 = vld [vmem:[#allocation7 + $0x10] ss:$8 sps:$4 sm:$0xff]   ;;  %v5883_v8 = vld [vmem:[#allocation7 + $0x24] ss:$8 sps:$4 sm:$0xff]  }
  0x7f   :  { %4187 = vmatpush1.bf16.msra.mxu1 %v5876_v3  ;;  %737 = vmatprep.subr.bf16.mxu0 %v5877_v4  ;;  %v5882_v7 = vld [vmem:[#allocation10 + $0x410] ss:$8 sps:$4 sm:$0xff]   ;;  %v5885_v9 = vld [vmem:[#allocation10 + $0x424] ss:$8 sps:$4 sm:$0xff]   ;;  %v5887_v10 = vld [vmem:[#allocation7 + $0x20] ss:$8 sps:$4 sm:$0xff]  }
  0x80   :  { %4188 = vmatprep.subr.bf16.mxu1 %v5879_v5  ;;  %v5888_v11 = vld [vmem:[#allocation10 + $0x420] ss:$8 sps:$4 sm:$0xff]   ;;  %v5889_v12 = vld [vmem:[#allocation7 + $0x34] ss:$8 sps:$4 sm:$0xff]   ;;  %v5893_v14 = vld [vmem:[#allocation7 + $0x30] ss:$8 sps:$4 sm:$0xff]  }
  0x81   :  { %v5891_v13 = vld [vmem:[#allocation10 + $0x434] ss:$8 sps:$4 sm:$0xff]   ;;  %v5894_v15 = vld [vmem:[#allocation10 + $0x430] ss:$8 sps:$4 sm:$0xff]   ;;  %v5895_v16 = vld [vmem:[#allocation7 + $0x44] ss:$8 sps:$4 sm:$0xff]  }
  0x82   :  { %738 = vmatpush1.bf16.msra.mxu0 %v5881_v6  ;;  %v5897_v17 = vld [vmem:[#allocation10 + $0x444] ss:$8 sps:$4 sm:$0xff]   ;;  %v5899_v18 = vld [vmem:[#allocation7 + $0x40] ss:$8 sps:$4 sm:$0xff]   ;;  %v5901_v20 = vld [vmem:[#allocation7 + $0x54] ss:$8 sps:$4 sm:$0xff]  }
  0x83   :  { %4189 = vmatpush1.bf16.msra.mxu1 %v5882_v7  ;;  %739 = vmatprep.subr.bf16.mxu0 %v5883_v8  ;;  %v5900_v19 = vld [vmem:[#allocation10 + $0x440] ss:$8 sps:$4 sm:$0xff]   ;;  %v5903_v21 = vld [vmem:[#allocation10 + $0x454] ss:$8 sps:$4 sm:$0xff]   ;;  %v5905_v22 = vld [vmem:[#allocation7 + $0x50] ss:$8 sps:$4 sm:$0xff]  }
  0x84   :  { %4190 = vmatprep.subr.bf16.mxu1 %v5885_v9  ;;  %v5906_v23 = vld [vmem:[#allocation10 + $0x450] ss:$8 sps:$4 sm:$0xff]   ;;  %v5907_v24 = vld [vmem:[#allocation7 + $0x64] ss:$8 sps:$4 sm:$0xff]   ;;  %v5911_v26 = vld [vmem:[#allocation7 + $0x60] ss:$8 sps:$4 sm:$0xff]  }
  0x85   :  { %v5909_v25 = vld [vmem:[#allocation10 + $0x464] ss:$8 sps:$4 sm:$0xff]   ;;  %v5912_v27 = vld [vmem:[#allocation10 + $0x460] ss:$8 sps:$4 sm:$0xff]   ;;  %v5913_v28 = vld [vmem:[#allocation7 + $0x74] ss:$8 sps:$4 sm:$0xff]  }
  0x86   :  { %740 = vmatpush1.bf16.msra.mxu0 %v5887_v10  ;;  %v5915_v29 = vld [vmem:[#allocation10 + $0x474] ss:$8 sps:$4 sm:$0xff]   ;;  %v5917_v30 = vld [vmem:[#allocation7 + $0x70] ss:$8 sps:$4 sm:$0xff]   ;;  %v5919_v32 = vld [vmem:[#allocation7 + $0x84] ss:$8 sps:$4 sm:$0xff]  }
  0x87   :  { %4191 = vmatpush1.bf16.msra.mxu1 %v5888_v11  ;;  %741 = vmatprep.subr.bf16.mxu0 %v5889_v12  ;;  %v5918_v31 = vld [vmem:[#allocation10 + $0x470] ss:$8 sps:$4 sm:$0xff]   ;;  %v5921_v33 = vld [vmem:[#allocation10 + $0x484] ss:$8 sps:$4 sm:$0xff]   ;;  %v5923_v34 = vld [vmem:[#allocation7 + $0x80] ss:$8 sps:$4 sm:$0xff]  }
  0x88   :  { %4192 = vmatprep.subr.bf16.mxu1 %v5891_v13  ;;  %v5924_v35 = vld [vmem:[#allocation10 + $0x480] ss:$8 sps:$4 sm:$0xff]   ;;  %v5925_v36 = vld [vmem:[#allocation7 + $0x94] ss:$8 sps:$4 sm:$0xff]   ;;  %v5929_v38 = vld [vmem:[#allocation7 + $0x90] ss:$8 sps:$4 sm:$0xff]  }
  0x89   :  { %v5927_v37 = vld [vmem:[#allocation10 + $0x494] ss:$8 sps:$4 sm:$0xff]   ;;  %v5930_v39 = vld [vmem:[#allocation10 + $0x490] ss:$8 sps:$4 sm:$0xff]   ;;  %v5931_v40 = vld [vmem:[#allocation7 + $0xa4] ss:$8 sps:$4 sm:$0xff]  }
  0x8a   :  { %742 = vmatpush1.bf16.msra.mxu0 %v5893_v14  ;;  %v5933_v41 = vld [vmem:[#allocation10 + $0x4a4] ss:$8 sps:$4 sm:$0xff]   ;;  %v5935_v42 = vld [vmem:[#allocation7 + $0xa0] ss:$8 sps:$4 sm:$0xff]   ;;  %v5937_v44 = vld [vmem:[#allocation7 + $0xb4] ss:$8 sps:$4 sm:$0xff]  }
  0x8b   :  { %4193 = vmatpush1.bf16.msra.mxu1 %v5894_v15  ;;  %743 = vmatprep.subr.bf16.mxu0 %v5895_v16  ;;  %v5936_v43 = vld [vmem:[#allocation10 + $0x4a0] ss:$8 sps:$4 sm:$0xff]   ;;  %v5939_v45 = vld [vmem:[#allocation10 + $0x4b4] ss:$8 sps:$4 sm:$0xff]   ;;  %v5941_v47 = vld [vmem:[#allocation7 + $0xb0] ss:$8 sps:$4 sm:$0xff]  }
  0x8c   :  { %4194 = vmatprep.subr.bf16.mxu1 %v5897_v17  ;;  %v117_v46 = vld [vmem:[#allocation2] sm:$0xff]  ;;  %v1207_v50 = vld [vmem:[#allocation5 + $0x20] sm:$0xff]  ;;  %v5943_v51 = vld [vmem:[#allocation7 + $0xc4] ss:$8 sps:$4 sm:$0xff]   ;;  %vm5065_vm4 = vcmask 64512   ;;  %s7044_s6 = smov [#allocation14]  }
  0x8d   :  { %v5154_v48 = vcombine.high %v117_v46, %v117_v46  ;;  %v5942_v49 = vld [vmem:[#allocation10 + $0x4b0] ss:$8 sps:$4 sm:$0xff]   ;;  %v5945_v52 = vld [vmem:[#allocation10 + $0x4c4] ss:$8 sps:$4 sm:$0xff]   ;;  %v5296_v53 = vcombine.high %v1207_v50, %v1207_v50  ;;  %v5947_v54 = vld [vmem:[#allocation7 + $0xc0] ss:$8 sps:$4 sm:$0xff]   ;;  %v5153_v6 = vcombine.low %v117_v46, %v117_v46  ;;  %v5295_v7 = vcombine.low %v1207_v50, %v1207_v50 }
  0x8e   :  { %744 = vmatpush1.bf16.msra.mxu0 %v5899_v18  ;;  %v5948_v55 = vld [vmem:[#allocation10 + $0x4c0] ss:$8 sps:$4 sm:$0xff]   ;;  %v5949_v56 = vld [vmem:[#allocation7 + $0xd4] ss:$8 sps:$4 sm:$0xff]   ;;  %v5953_v58 = vld [vmem:[#allocation7 + $0xd0] ss:$8 sps:$4 sm:$0xff]  }
  0x8f   :  { %4195 = vmatpush1.bf16.msra.mxu1 %v5900_v19  ;;  %745 = vmatprep.subr.bf16.mxu0 %v5901_v20  ;;  %v5951_v57 = vld [vmem:[#allocation10 + $0x4d4] ss:$8 sps:$4 sm:$0xff]   ;;  %v5954_v59 = vld [vmem:[#allocation10 + $0x4d0] ss:$8 sps:$4 sm:$0xff]   ;;  %v5955_v60 = vld [vmem:[#allocation7 + $0xe4] ss:$8 sps:$4 sm:$0xff]  }
  0x90   :  { %4196 = vmatprep.subr.bf16.mxu1 %v5903_v21  ;;  %767 = vmatprep.mubr.bf16.mxu0 %v5154_v48  ;;  %v5957_v61 = vld [vmem:[#allocation10 + $0x4e4] ss:$8 sps:$4 sm:$0xff]   ;;  %v5959_v62 = vld [vmem:[#allocation7 + $0xe0] ss:$8 sps:$4 sm:$0xff]   ;;  %v5961_v0 = vld [vmem:[#allocation7 + $0xf4] ss:$8 sps:$4 sm:$0xff]  }
  0x91   :  { %4218 = vmatprep.mubr.bf16.mxu1 %v5296_v53  ;;  %v5960_v63 = vld [vmem:[#allocation10 + $0x4e0] ss:$8 sps:$4 sm:$0xff]   ;;  %v5963_v1 = vld [vmem:[#allocation10 + $0x4f4] ss:$8 sps:$4 sm:$0xff]   ;;  %v5965_v2 = vld [vmem:[#allocation7 + $0xf0] ss:$8 sps:$4 sm:$0xff]  }
  0x92   :  { %746 = vmatpush1.bf16.msra.mxu0 %v5905_v22  ;;  %v5966_v3 = vld [vmem:[#allocation10 + $0x4f0] ss:$8 sps:$4 sm:$0xff]   ;;  %v5971_v4 = vld [vmem:[#allocation7 + $0x104] ss:$8 sps:$4 sm:$0xff]   ;;  %v5969_v8 = vld [vmem:[#allocation7 + $0x100] ss:$8 sps:$4 sm:$0xff]  }
  0x93   :  { %4197 = vmatpush1.bf16.msra.mxu1 %v5906_v23  ;;  %747 = vmatprep.subr.bf16.mxu0 %v5907_v24  ;;  %v5976_v5 = vld [vmem:[#allocation10 + $0x504] ss:$8 sps:$4 sm:$0xff]   ;;  %v5974_v9 = vld [vmem:[#allocation10 + $0x500] ss:$8 sps:$4 sm:$0xff]   ;;  %v5979_v10 = vld [vmem:[#allocation7 + $0x114] ss:$8 sps:$4 sm:$0xff]  }
  0x94   :  { %4198 = vmatprep.subr.bf16.mxu1 %v5909_v25  ;;  %v5982_v11 = vld [vmem:[#allocation10 + $0x514] ss:$8 sps:$4 sm:$0xff]   ;;  %v5977_v12 = vld [vmem:[#allocation7 + $0x110] ss:$8 sps:$4 sm:$0xff]   ;;  %v5985_v14 = vld [vmem:[#allocation7 + $0x124] ss:$8 sps:$4 sm:$0xff]  }
  0x95   :  { %v5980_v13 = vld [vmem:[#allocation10 + $0x510] ss:$8 sps:$4 sm:$0xff]   ;;  %v5988_v15 = vld [vmem:[#allocation10 + $0x524] ss:$8 sps:$4 sm:$0xff]   ;;  %v5983_v16 = vld [vmem:[#allocation7 + $0x120] ss:$8 sps:$4 sm:$0xff]  }
  0x96   :  { %748 = vmatpush1.bf16.msra.mxu0 %v5911_v26  ;;  %v5986_v17 = vld [vmem:[#allocation10 + $0x520] ss:$8 sps:$4 sm:$0xff]   ;;  %v5991_v18 = vld [vmem:[#allocation7 + $0x134] ss:$8 sps:$4 sm:$0xff]   ;;  %v5989_v20 = vld [vmem:[#allocation7 + $0x130] ss:$8 sps:$4 sm:$0xff]  }
  0x97   :  { %4199 = vmatpush1.bf16.msra.mxu1 %v5912_v27  ;;  %749 = vmatprep.subr.bf16.mxu0 %v5913_v28  ;;  %v5994_v19 = vld [vmem:[#allocation10 + $0x534] ss:$8 sps:$4 sm:$0xff]   ;;  %v5992_v21 = vld [vmem:[#allocation10 + $0x530] ss:$8 sps:$4 sm:$0xff]   ;;  %v5997_v22 = vld [vmem:[#allocation7 + $0x144] ss:$8 sps:$4 sm:$0xff]  }
  0x98   :  { %4200 = vmatprep.subr.bf16.mxu1 %v5915_v29  ;;  %v6000_v23 = vld [vmem:[#allocation10 + $0x544] ss:$8 sps:$4 sm:$0xff]   ;;  %v5995_v24 = vld [vmem:[#allocation7 + $0x140] ss:$8 sps:$4 sm:$0xff]   ;;  %v6003_v26 = vld [vmem:[#allocation7 + $0x154] ss:$8 sps:$4 sm:$0xff]  }
  0x99   :  { %v5998_v25 = vld [vmem:[#allocation10 + $0x540] ss:$8 sps:$4 sm:$0xff]   ;;  %v6006_v27 = vld [vmem:[#allocation10 + $0x554] ss:$8 sps:$4 sm:$0xff]   ;;  %v6001_v28 = vld [vmem:[#allocation7 + $0x150] ss:$8 sps:$4 sm:$0xff]  }
  0x9a   :  { %750 = vmatpush1.bf16.msra.mxu0 %v5917_v30  ;;  %v6004_v29 = vld [vmem:[#allocation10 + $0x550] ss:$8 sps:$4 sm:$0xff]   ;;  %v6009_v30 = vld [vmem:[#allocation7 + $0x164] ss:$8 sps:$4 sm:$0xff]   ;;  %v6027_v46 = vld [vmem:[#allocation7 + $0x194] ss:$8 sps:$4 sm:$0xff]  }
  0x9b   :  { %4201 = vmatpush1.bf16.msra.mxu1 %v5918_v31  ;;  %751 = vmatprep.subr.bf16.mxu0 %v5919_v32  ;;  %v6012_v31 = vld [vmem:[#allocation10 + $0x564] ss:$8 sps:$4 sm:$0xff]   ;;  %v6025_v48 = vld [vmem:[#allocation7 + $0x190] ss:$8 sps:$4 sm:$0xff]   ;;  %v6034_v53 = vld [vmem:[#allocation10 + $0x5a0] ss:$8 sps:$4 sm:$0xff]  }
  0x9c   :  { %4202 = vmatprep.subr.bf16.mxu1 %v5921_v33  ;;  %v7181_v32 = vld [vmem:[#allocation2 + $0x8] sm:$0xff]  ;;  %s5141_s25 = sshll.u32 %s7044_s6, 4  ;;  %vm5133_vm5 = vcmask 0   ;;  %s5142_s25 = int_to_ptr.vmem [resolvable:$true] %s5141_s25 }
  0x9d   :  { %v6007_v33 = vld [vmem:[#allocation7 + $0x160] ss:$8 sps:$4 sm:$0xff]   ;;  %v6033_v50 = vld [vmem:[#allocation7 + $0x1a4] ss:$8 sps:$4 sm:$0xff]   ;;  %s7003_s11 = scalar_lea.vmem %s5142_s25, 16  ;;  %s7007_s12 = scalar_lea.vmem %s5142_s25, 32 }
  0x9e   :  { %752 = vmatpush1.bf16.msra.mxu0 %v5923_v34  ;;  %v6010_v34 = vld [vmem:[#allocation10 + $0x560] ss:$8 sps:$4 sm:$0xff]   ;;  %p7004_p0 = scmp.ne.s32.totalorder %s5142_s25, %s7003_s11  ;;  %p7008_p1 = scmp.lt.s32.totalorder %s5142_s25, %s5142_s25 }
  0x9f   :  { %4203 = vmatpush1.bf16.msra.mxu1 %v5924_v35  ;;  %753 = vmatprep.subr.bf16.mxu0 %v5925_v36  ;;  %v5156_v35 = vcombine.high %v7181_v32, %v7181_v32  ;;  %v7185_v36 = vld [vmem:[#allocation5 + $0x28] sm:$0xff]  ;;  %p7009_p2 = scmp.lt.s32.totalorder %s7007_s12, %s7003_s11 }
  0xa0   :  { %4204 = vmatprep.subr.bf16.mxu1 %v5927_v37  ;;  %v6015_v37 = vld [vmem:[#allocation7 + $0x174] ss:$8 sps:$4 sm:$0xff]  }
  0xa1   :  { %p7010_p3 = por %p7009_p2, %p7008_p1 }
  0xa2   :  { %754 = vmatpush1.bf16.msra.mxu0 %v5929_v38  ;;  %v5298_v38 = vcombine.high %v7185_v36, %v7185_v36 }
  0xa3   :  { %4205 = vmatpush1.bf16.msra.mxu1 %v5930_v39  ;;  %755 = vmatprep.subr.bf16.mxu0 %v5931_v40  ;;  %v6018_v39 = vld [vmem:[#allocation10 + $0x574] ss:$8 sps:$4 sm:$0xff]   ;;  %v6013_v40 = vld [vmem:[#allocation7 + $0x170] ss:$8 sps:$4 sm:$0xff]   ;;  %p7011_p4 = pnand %p7010_p3, %p7004_p0 }
  0xa4   :  { %4206 = vmatprep.subr.bf16.mxu1 %v5933_v41  ;;  %v6016_v41 = vld [vmem:[#allocation10 + $0x570] ss:$8 sps:$4 sm:$0xff]  }
  0xa6   :  { %756 = vmatpush1.bf16.msra.mxu0 %v5935_v42  ;;  %v6021_v42 = vld [vmem:[#allocation7 + $0x184] ss:$8 sps:$4 sm:$0xff]  }
  0xa7   :  { %4207 = vmatpush1.bf16.msra.mxu1 %v5936_v43  ;;  %757 = vmatprep.subr.bf16.mxu0 %v5937_v44  ;;  %v6024_v43 = vld [vmem:[#allocation10 + $0x584] ss:$8 sps:$4 sm:$0xff]   ;;  %v6019_v44 = vld [vmem:[#allocation7 + $0x180] ss:$8 sps:$4 sm:$0xff]  }
  0xa8   :  { %4208 = vmatprep.subr.bf16.mxu1 %v5939_v45  ;;  %v6022_v45 = vld [vmem:[#allocation10 + $0x580] ss:$8 sps:$4 sm:$0xff]  }
  0xaa   :  { %758 = vmatpush1.bf16.msra.mxu0 %v5941_v47  ;;  %v6030_v47 = vld [vmem:[#allocation10 + $0x594] ss:$8 sps:$4 sm:$0xff]  }
  0xab   :  { %4209 = vmatpush1.bf16.msra.mxu1 %v5942_v49  ;;  %759 = vmatprep.subr.bf16.mxu0 %v5943_v51  ;;  %v6028_v49 = vld [vmem:[#allocation10 + $0x590] ss:$8 sps:$4 sm:$0xff]   ;;  %v6036_v51 = vld [vmem:[#allocation10 + $0x5a4] ss:$8 sps:$4 sm:$0xff]  }
  0xac   :  { %4210 = vmatprep.subr.bf16.mxu1 %v5945_v52  ;;  %v6031_v52 = vld [vmem:[#allocation7 + $0x1a0] ss:$8 sps:$4 sm:$0xff]  }
  0xae   :  { %760 = vmatpush1.bf16.msra.mxu0 %v5947_v54  ;;  %v6039_v54 = vld [vmem:[#allocation7 + $0x1b4] ss:$8 sps:$4 sm:$0xff]  }
  0xaf   :  { %4211 = vmatpush1.bf16.msra.mxu1 %v5948_v55  ;;  %761 = vmatprep.subr.bf16.mxu0 %v5949_v56  ;;  %v6042_v55 = vld [vmem:[#allocation10 + $0x5b4] ss:$8 sps:$4 sm:$0xff]   ;;  %v6037_v56 = vld [vmem:[#allocation7 + $0x1b0] ss:$8 sps:$4 sm:$0xff]  }
  0xb0   :  { %4212 = vmatprep.subr.bf16.mxu1 %v5951_v57  ;;  %v6040_v57 = vld [vmem:[#allocation10 + $0x5b0] ss:$8 sps:$4 sm:$0xff]  }
  0xb2   :  { %762 = vmatpush1.bf16.msra.mxu0 %v5953_v58  ;;  %v6045_v58 = vld [vmem:[#allocation7 + $0x1c4] ss:$8 sps:$4 sm:$0xff]  }
  0xb3   :  { %4213 = vmatpush1.bf16.msra.mxu1 %v5954_v59  ;;  %763 = vmatprep.subr.bf16.mxu0 %v5955_v60  ;;  %v6048_v59 = vld [vmem:[#allocation10 + $0x5c4] ss:$8 sps:$4 sm:$0xff]   ;;  %v6043_v60 = vld [vmem:[#allocation7 + $0x1c0] ss:$8 sps:$4 sm:$0xff]  }
  0xb4   :  { %4214 = vmatprep.subr.bf16.mxu1 %v5957_v61  ;;  %v6046_v61 = vld [vmem:[#allocation10 + $0x5c0] ss:$8 sps:$4 sm:$0xff]  }
  0xb6   :  { %764 = vmatpush1.bf16.msra.mxu0 %v5959_v62  ;;  %v6051_v62 = vld [vmem:[#allocation7 + $0x1d4] ss:$8 sps:$4 sm:$0xff]  }
  0xb7   :  { %4215 = vmatpush1.bf16.msra.mxu1 %v5960_v63  ;;  %765 = vmatprep.subr.bf16.mxu0 %v5961_v0  ;;  %v6054_v63 = vld [vmem:[#allocation10 + $0x5d4] ss:$8 sps:$4 sm:$0xff]   ;;  %v6049_v0 = vld [vmem:[#allocation7 + $0x1d0] ss:$8 sps:$4 sm:$0xff]  }
  0xb8   :  { %4216 = vmatprep.subr.bf16.mxu1 %v5963_v1  ;;  %v6052_v1 = vld [vmem:[#allocation10 + $0x5d0] ss:$8 sps:$4 sm:$0xff]  }
  0xba   :  { %766 = vmatpush1.bf16.msra.mxu0 %v5965_v2  ;;  %v6057_v2 = vld [vmem:[#allocation7 + $0x1e4] ss:$8 sps:$4 sm:$0xff]  }
  0xbb   :  { %4217 = vmatpush1.bf16.msra.mxu1 %v5966_v3  ;;  %776 = vmatprep.subr.bf16.mxu0 %v5971_v4  ;;  %v6060_v3 = vld [vmem:[#allocation10 + $0x5e4] ss:$8 sps:$4 sm:$0xff]   ;;  %v6055_v4 = vld [vmem:[#allocation7 + $0x1e0] ss:$8 sps:$4 sm:$0xff]  }
  0xbc   :  { %4227 = vmatprep.subr.bf16.mxu1 %v5976_v5  ;;  %v6058_v5 = vld [vmem:[#allocation10 + $0x5e0] ss:$8 sps:$4 sm:$0xff]  }
  0xbd   :  { %768 = vmatmul.mubr.bf16.vlgmr.msra.gmra.mrb[0].mxu0 %v5153_v6  ;;  %v6063_v6 = vld [vmem:[#allocation7 + $0x1f4] ss:$8 sps:$4 sm:$0xff]  }
  0xbe   :  { %4219 = vmatmul.mubr.bf16.vlgmr.msra.gmra.mrb[0].mxu1 %v5295_v7  ;;  %777 = vmatpush1.bf16.msra.mxu0 %v5969_v8  ;;  %v6066_v7 = vld [vmem:[#allocation10 + $0x5f4] ss:$8 sps:$4 sm:$0xff]   ;;  %v6061_v8 = vld [vmem:[#allocation7 + $0x1f0] ss:$8 sps:$4 sm:$0xff]  }
  0xbf   :  { %4228 = vmatpush1.bf16.msra.mxu1 %v5974_v9  ;;  %778 = vmatprep.subr.bf16.mxu0 %v5979_v10  ;;  %v6064_v9 = vld [vmem:[#allocation10 + $0x5f0] ss:$8 sps:$4 sm:$0xff]   ;;  %v6071_v10 = vld [vmem:[#allocation7 + $0x204] ss:$8 sps:$4 sm:$0xff]  }
  0xc0   :  { %4229 = vmatprep.subr.bf16.mxu1 %v5982_v11  ;;  %808 = vmatprep.mubr.bf16.mxu0 %v5156_v35  ;;  %v6076_v11 = vld [vmem:[#allocation10 + $0x604] ss:$8 sps:$4 sm:$0xff]   ;;  %v6098_v35 = vld [vmem:[#allocation10 + $0x640] ss:$8 sps:$4 sm:$0xff]  }
  0xc1   :  { %4259 = vmatprep.mubr.bf16.mxu1 %v5298_v38  ;;  %v6101_v38 = vld [vmem:[#allocation7 + $0x250] ss:$8 sps:$4 sm:$0xff]  }
  0xc2   :  { %779 = vmatpush1.bf16.msra.mxu0 %v5977_v12  ;;  %v5155_v12 = vcombine.low %v7181_v32, %v7181_v32  ;;  %v6097_v32 = vld [vmem:[#allocation7 + $0x244] ss:$8 sps:$4 sm:$0xff]  }
  0xc3   :  { %4230 = vmatpush1.bf16.msra.mxu1 %v5980_v13  ;;  %780 = vmatprep.subr.bf16.mxu0 %v5985_v14  ;;  %v6069_v13 = vld [vmem:[#allocation7 + $0x200] ss:$8 sps:$4 sm:$0xff]   ;;  %v5297_v14 = vcombine.low %v7185_v36, %v7185_v36  ;;  %v6103_v36 = vld [vmem:[#allocation7 + $0x254] ss:$8 sps:$4 sm:$0xff]  }
  0xc4   :  { %4231 = vmatprep.subr.bf16.mxu1 %v5988_v15  ;;  %v6074_v15 = vld [vmem:[#allocation10 + $0x600] ss:$8 sps:$4 sm:$0xff]  }
  0xc6   :  { %781 = vmatpush1.bf16.msra.mxu0 %v5983_v16  ;;  %v6079_v16 = vld [vmem:[#allocation7 + $0x214] ss:$8 sps:$4 sm:$0xff]  }
  0xc7   :  { %4232 = vmatpush1.bf16.msra.mxu1 %v5986_v17  ;;  %782 = vmatprep.subr.bf16.mxu0 %v5991_v18  ;;  %v6082_v17 = vld [vmem:[#allocation10 + $0x614] ss:$8 sps:$4 sm:$0xff]   ;;  %v7193_v18 = vld [vmem:[#allocation2 + $0x10] sm:$0xff] }
  0xc8   :  { %4233 = vmatprep.subr.bf16.mxu1 %v5994_v19  ;;  %v7195_v19 = vld [vmem:[#allocation5 + $0x30] sm:$0xff] }
  0xca   :  { %783 = vmatpush1.bf16.msra.mxu0 %v5989_v20  ;;  %v5158_v20 = vcombine.high %v7193_v18, %v7193_v18 }
  0xcb   :  { %4234 = vmatpush1.bf16.msra.mxu1 %v5992_v21  ;;  %784 = vmatprep.subr.bf16.mxu0 %v5997_v22  ;;  %v5300_v21 = vcombine.high %v7195_v19, %v7195_v19  ;;  %v6077_v22 = vld [vmem:[#allocation7 + $0x210] ss:$8 sps:$4 sm:$0xff]  }
  0xcc   :  { %4235 = vmatprep.subr.bf16.mxu1 %v6000_v23  ;;  %v6080_v23 = vld [vmem:[#allocation10 + $0x610] ss:$8 sps:$4 sm:$0xff]  }
  0xce   :  { %785 = vmatpush1.bf16.msra.mxu0 %v5995_v24  ;;  %v6085_v24 = vld [vmem:[#allocation7 + $0x224] ss:$8 sps:$4 sm:$0xff]  }
  0xcf   :  { %4236 = vmatpush1.bf16.msra.mxu1 %v5998_v25  ;;  %786 = vmatprep.subr.bf16.mxu0 %v6003_v26  ;;  %v6088_v25 = vld [vmem:[#allocation10 + $0x624] ss:$8 sps:$4 sm:$0xff]   ;;  %v6083_v26 = vld [vmem:[#allocation7 + $0x220] ss:$8 sps:$4 sm:$0xff]  }
  0xd0   :  { %4237 = vmatprep.subr.bf16.mxu1 %v6006_v27  ;;  %v6086_v27 = vld [vmem:[#allocation10 + $0x620] ss:$8 sps:$4 sm:$0xff]  }
  0xd2   :  { %787 = vmatpush1.bf16.msra.mxu0 %v6001_v28  ;;  %v6091_v28 = vld [vmem:[#allocation7 + $0x234] ss:$8 sps:$4 sm:$0xff]  }
  0xd3   :  { %4238 = vmatpush1.bf16.msra.mxu1 %v6004_v29  ;;  %788 = vmatprep.subr.bf16.mxu0 %v6009_v30  ;;  %v6094_v29 = vld [vmem:[#allocation10 + $0x634] ss:$8 sps:$4 sm:$0xff]   ;;  %v6089_v30 = vld [vmem:[#allocation7 + $0x230] ss:$8 sps:$4 sm:$0xff]  }
  0xd4   :  { %4239 = vmatprep.subr.bf16.mxu1 %v6012_v31  ;;  %v6092_v31 = vld [vmem:[#allocation10 + $0x630] ss:$8 sps:$4 sm:$0xff]  }
  0xd6   :  { %789 = vmatpush1.bf16.msra.mxu0 %v6007_v33  ;;  %v6100_v33 = vld [vmem:[#allocation10 + $0x644] ss:$8 sps:$4 sm:$0xff]  }
  0xd7   :  { %4240 = vmatpush1.bf16.msra.mxu1 %v6010_v34  ;;  %790 = vmatprep.subr.bf16.mxu0 %v6015_v37  ;;  %v6095_v34 = vld [vmem:[#allocation7 + $0x240] ss:$8 sps:$4 sm:$0xff]   ;;  %v6106_v37 = vld [vmem:[#allocation10 + $0x654] ss:$8 sps:$4 sm:$0xff]  }
  0xd8   :  { %4241 = vmatprep.subr.bf16.mxu1 %v6018_v39  ;;  %v6104_v39 = vld [vmem:[#allocation10 + $0x650] ss:$8 sps:$4 sm:$0xff]  }
  0xda   :  { %791 = vmatpush1.bf16.msra.mxu0 %v6013_v40  ;;  %v6109_v40 = vld [vmem:[#allocation7 + $0x264] ss:$8 sps:$4 sm:$0xff]  }
  0xdb   :  { %4242 = vmatpush1.bf16.msra.mxu1 %v6016_v41  ;;  %792 = vmatprep.subr.bf16.mxu0 %v6021_v42  ;;  %v6112_v41 = vld [vmem:[#allocation10 + $0x664] ss:$8 sps:$4 sm:$0xff]   ;;  %v6107_v42 = vld [vmem:[#allocation7 + $0x260] ss:$8 sps:$4 sm:$0xff]  }
  0xdc   :  { %4243 = vmatprep.subr.bf16.mxu1 %v6024_v43  ;;  %v6110_v43 = vld [vmem:[#allocation10 + $0x660] ss:$8 sps:$4 sm:$0xff]  }
  0xde   :  { %793 = vmatpush1.bf16.msra.mxu0 %v6019_v44  ;;  %v6115_v44 = vld [vmem:[#allocation7 + $0x274] ss:$8 sps:$4 sm:$0xff]  }
  0xdf   :  { %4244 = vmatpush1.bf16.msra.mxu1 %v6022_v45  ;;  %794 = vmatprep.subr.bf16.mxu0 %v6027_v46  ;;  %v6118_v45 = vld [vmem:[#allocation10 + $0x674] ss:$8 sps:$4 sm:$0xff]   ;;  %v6113_v46 = vld [vmem:[#allocation7 + $0x270] ss:$8 sps:$4 sm:$0xff]  }
  0xe0   :  { %4245 = vmatprep.subr.bf16.mxu1 %v6030_v47  ;;  %v6116_v47 = vld [vmem:[#allocation10 + $0x670] ss:$8 sps:$4 sm:$0xff]  }
  0xe2   :  { %795 = vmatpush1.bf16.msra.mxu0 %v6025_v48  ;;  %v6121_v48 = vld [vmem:[#allocation7 + $0x284] ss:$8 sps:$4 sm:$0xff]  }
  0xe3   :  { %4246 = vmatpush1.bf16.msra.mxu1 %v6028_v49  ;;  %796 = vmatprep.subr.bf16.mxu0 %v6033_v50  ;;  %v6124_v49 = vld [vmem:[#allocation10 + $0x684] ss:$8 sps:$4 sm:$0xff]   ;;  %v6119_v50 = vld [vmem:[#allocation7 + $0x280] ss:$8 sps:$4 sm:$0xff]  }
  0xe4   :  { %4247 = vmatprep.subr.bf16.mxu1 %v6036_v51  ;;  %v6122_v51 = vld [vmem:[#allocation10 + $0x680] ss:$8 sps:$4 sm:$0xff]  }
  0xe6   :  { %797 = vmatpush1.bf16.msra.mxu0 %v6031_v52  ;;  %v6127_v52 = vld [vmem:[#allocation7 + $0x294] ss:$8 sps:$4 sm:$0xff]  }
  0xe7   :  { %4248 = vmatpush1.bf16.msra.mxu1 %v6034_v53  ;;  %798 = vmatprep.subr.bf16.mxu0 %v6039_v54  ;;  %v6130_v53 = vld [vmem:[#allocation10 + $0x694] ss:$8 sps:$4 sm:$0xff]   ;;  %v6125_v54 = vld [vmem:[#allocation7 + $0x290] ss:$8 sps:$4 sm:$0xff]  }
  0xe8   :  { %4249 = vmatprep.subr.bf16.mxu1 %v6042_v55  ;;  %v6128_v55 = vld [vmem:[#allocation10 + $0x690] ss:$8 sps:$4 sm:$0xff]  }
  0xea   :  { %799 = vmatpush1.bf16.msra.mxu0 %v6037_v56  ;;  %v6133_v56 = vld [vmem:[#allocation7 + $0x2a4] ss:$8 sps:$4 sm:$0xff]  }
  0xeb   :  { %4250 = vmatpush1.bf16.msra.mxu1 %v6040_v57  ;;  %800 = vmatprep.subr.bf16.mxu0 %v6045_v58  ;;  %v6136_v57 = vld [vmem:[#allocation10 + $0x6a4] ss:$8 sps:$4 sm:$0xff]   ;;  %v6131_v58 = vld [vmem:[#allocation7 + $0x2a0] ss:$8 sps:$4 sm:$0xff]  }
  0xec   :  { %4251 = vmatprep.subr.bf16.mxu1 %v6048_v59  ;;  %v6134_v59 = vld [vmem:[#allocation10 + $0x6a0] ss:$8 sps:$4 sm:$0xff]  }
  0xee   :  { %801 = vmatpush1.bf16.msra.mxu0 %v6043_v60  ;;  %v6139_v60 = vld [vmem:[#allocation7 + $0x2b4] ss:$8 sps:$4 sm:$0xff]  }
  0xef   :  { %4252 = vmatpush1.bf16.msra.mxu1 %v6046_v61  ;;  %802 = vmatprep.subr.bf16.mxu0 %v6051_v62  ;;  %v6142_v61 = vld [vmem:[#allocation10 + $0x6b4] ss:$8 sps:$4 sm:$0xff]   ;;  %v6137_v62 = vld [vmem:[#allocation7 + $0x2b0] ss:$8 sps:$4 sm:$0xff]  }
  0xf0   :  { %4253 = vmatprep.subr.bf16.mxu1 %v6054_v63  ;;  %v6140_v63 = vld [vmem:[#allocation10 + $0x6b0] ss:$8 sps:$4 sm:$0xff]  }
  0xf2   :  { %803 = vmatpush1.bf16.msra.mxu0 %v6049_v0  ;;  %v6145_v0 = vld [vmem:[#allocation7 + $0x2c4] ss:$8 sps:$4 sm:$0xff]  }
  0xf3   :  { %4254 = vmatpush1.bf16.msra.mxu1 %v6052_v1  ;;  %804 = vmatprep.subr.bf16.mxu0 %v6057_v2  ;;  %v6148_v1 = vld [vmem:[#allocation10 + $0x6c4] ss:$8 sps:$4 sm:$0xff]   ;;  %v6143_v2 = vld [vmem:[#allocation7 + $0x2c0] ss:$8 sps:$4 sm:$0xff]  }
  0xf4   :  { %4255 = vmatprep.subr.bf16.mxu1 %v6060_v3  ;;  %v6146_v3 = vld [vmem:[#allocation10 + $0x6c0] ss:$8 sps:$4 sm:$0xff]  }
  0xf6   :  { %805 = vmatpush1.bf16.msra.mxu0 %v6055_v4  ;;  %v6151_v4 = vld [vmem:[#allocation7 + $0x2d4] ss:$8 sps:$4 sm:$0xff]  }
  0xf7   :  { %4256 = vmatpush1.bf16.msra.mxu1 %v6058_v5  ;;  %806 = vmatprep.subr.bf16.mxu0 %v6063_v6  ;;  %v6154_v5 = vld [vmem:[#allocation10 + $0x6d4] ss:$8 sps:$4 sm:$0xff]   ;;  %v6149_v6 = vld [vmem:[#allocation7 + $0x2d0] ss:$8 sps:$4 sm:$0xff]  }
  0xf8   :  { %4257 = vmatprep.subr.bf16.mxu1 %v6066_v7  ;;  %v6152_v7 = vld [vmem:[#allocation10 + $0x6d0] ss:$8 sps:$4 sm:$0xff]  }
  0xfa   :  { %807 = vmatpush1.bf16.msra.mxu0 %v6061_v8  ;;  %v6157_v8 = vld [vmem:[#allocation7 + $0x2e4] ss:$8 sps:$4 sm:$0xff]  }
  0xfb   :  { %4258 = vmatpush1.bf16.msra.mxu1 %v6064_v9  ;;  %817 = vmatprep.subr.bf16.mxu0 %v6071_v10  ;;  %v6160_v9 = vld [vmem:[#allocation10 + $0x6e4] ss:$8 sps:$4 sm:$0xff]   ;;  %v6155_v10 = vld [vmem:[#allocation7 + $0x2e0] ss:$8 sps:$4 sm:$0xff]  }
  0xfc   :  { %4268 = vmatprep.subr.bf16.mxu1 %v6076_v11  ;;  %v6158_v11 = vld [vmem:[#allocation10 + $0x6e0] ss:$8 sps:$4 sm:$0xff]  }
  0xfd   :  { %809 = vmatmul.mubr.bf16.vlgmr.msra.gmra.mrb[0].mxu0 %v5155_v12  ;;  %v6163_v12 = vld [vmem:[#allocation7 + $0x2f4] ss:$8 sps:$4 sm:$0xff]  }
  0xfe   :  { %4260 = vmatmul.mubr.bf16.vlgmr.msra.gmra.mrb[0].mxu1 %v5297_v14  ;;  %818 = vmatpush1.bf16.msra.mxu0 %v6069_v13  ;;  %v6166_v13 = vld [vmem:[#allocation10 + $0x6f4] ss:$8 sps:$4 sm:$0xff]   ;;  %v6161_v14 = vld [vmem:[#allocation7 + $0x2f0] ss:$8 sps:$4 sm:$0xff]  }
  0xff   :  { %4269 = vmatpush1.bf16.msra.mxu1 %v6074_v15  ;;  %819 = vmatprep.subr.bf16.mxu0 %v6079_v16  ;;  %v6164_v15 = vld [vmem:[#allocation10 + $0x6f0] ss:$8 sps:$4 sm:$0xff]   ;;  %v6173_v16 = vld [vmem:[#allocation10 + $0x704] ss:$8 sps:$4 sm:$0xff]  }
 0x100   :  { %4270 = vmatprep.subr.bf16.mxu1 %v6082_v17  ;;  %849 = vmatprep.mubr.bf16.mxu0 %v5158_v20  ;;  %v7201_v17 = vld [vmem:[#allocation5 + $0x38] sm:$0xff]  ;;  %v5157_v20 = vcombine.low %v7193_v18, %v7193_v18 }
 0x101   :  { %4300 = vmatprep.mubr.bf16.mxu1 %v5300_v21  ;;  %v5299_v21 = vcombine.low %v7195_v19, %v7195_v19  ;;  %v6177_v18 = vld [vmem:[#allocation10 + $0x720] ss:$8 sps:$4 sm:$0xff]   ;;  %v6180_v19 = vld [vmem:[#allocation10 + $0x730] ss:$8 sps:$4 sm:$0xff]  }
 0x102   :  { %820 = vmatpush1.bf16.msra.mxu0 %v6077_v22  ;;  %v6171_v22 = vld [vmem:[#allocation10 + $0x700] ss:$8 sps:$4 sm:$0xff]  }
 0x103   :  { %4271 = vmatpush1.bf16.msra.mxu1 %v6080_v23  ;;  %821 = vmatprep.subr.bf16.mxu0 %v6085_v24  ;;  %v6176_v23 = vld [vmem:[#allocation10 + $0x714] ss:$8 sps:$4 sm:$0xff]   ;;  %v5302_v24 = vcombine.high %v7201_v17, %v7201_v17 }
 0x104   :  { %4272 = vmatprep.subr.bf16.mxu1 %v6088_v25  ;;  %v6174_v25 = vld [vmem:[#allocation10 + $0x710] ss:$8 sps:$4 sm:$0xff]  }
 0x106   :  { %822 = vmatpush1.bf16.msra.mxu0 %v6083_v26  ;;  %v6179_v26 = vld [vmem:[#allocation10 + $0x724] ss:$8 sps:$4 sm:$0xff]  }
 0x107   :  { %4273 = vmatpush1.bf16.msra.mxu1 %v6086_v27  ;;  %823 = vmatprep.subr.bf16.mxu0 %v6091_v28  ;;  %v6182_v27 = vld [vmem:[#allocation10 + $0x734] ss:$8 sps:$4 sm:$0xff]   ;;  %v6185_v28 = vld [vmem:[#allocation10 + $0x744] ss:$8 sps:$4 sm:$0xff]  }
 0x108   :  { %4274 = vmatprep.subr.bf16.mxu1 %v6094_v29  ;;  %v6183_v29 = vld [vmem:[#allocation10 + $0x740] ss:$8 sps:$4 sm:$0xff]  }
 0x10a   :  { %824 = vmatpush1.bf16.msra.mxu0 %v6089_v30  ;;  %v6188_v30 = vld [vmem:[#allocation10 + $0x754] ss:$8 sps:$4 sm:$0xff]  }
 0x10b   :  { %4275 = vmatpush1.bf16.msra.mxu1 %v6092_v31  ;;  %825 = vmatprep.subr.bf16.mxu0 %v6097_v32  ;;  %v6186_v31 = vld [vmem:[#allocation10 + $0x750] ss:$8 sps:$4 sm:$0xff]   ;;  %v6191_v32 = vld [vmem:[#allocation10 + $0x764] ss:$8 sps:$4 sm:$0xff]  }
 0x10c   :  { %4276 = vmatprep.subr.bf16.mxu1 %v6100_v33  ;;  %v6189_v33 = vld [vmem:[#allocation10 + $0x760] ss:$8 sps:$4 sm:$0xff]  }
 0x10e   :  { %826 = vmatpush1.bf16.msra.mxu0 %v6095_v34  ;;  %v6194_v34 = vld [vmem:[#allocation10 + $0x774] ss:$8 sps:$4 sm:$0xff]  }
 0x10f   :  { %4277 = vmatpush1.bf16.msra.mxu1 %v6098_v35  ;;  %827 = vmatprep.subr.bf16.mxu0 %v6103_v36  ;;  %v6192_v35 = vld [vmem:[#allocation10 + $0x770] ss:$8 sps:$4 sm:$0xff]   ;;  %v6197_v36 = vld [vmem:[#allocation10 + $0x784] ss:$8 sps:$4 sm:$0xff]  }
 0x110   :  { %4278 = vmatprep.subr.bf16.mxu1 %v6106_v37  ;;  %v6195_v37 = vld [vmem:[#allocation10 + $0x780] ss:$8 sps:$4 sm:$0xff]  }
 0x112   :  { %828 = vmatpush1.bf16.msra.mxu0 %v6101_v38  ;;  %v6200_v38 = vld [vmem:[#allocation10 + $0x794] ss:$8 sps:$4 sm:$0xff]  }
 0x113   :  { %4279 = vmatpush1.bf16.msra.mxu1 %v6104_v39  ;;  %829 = vmatprep.subr.bf16.mxu0 %v6109_v40  ;;  %v6198_v39 = vld [vmem:[#allocation10 + $0x790] ss:$8 sps:$4 sm:$0xff]   ;;  %v6203_v40 = vld [vmem:[#allocation10 + $0x7a4] ss:$8 sps:$4 sm:$0xff]  }
 0x114   :  { %4280 = vmatprep.subr.bf16.mxu1 %v6112_v41  ;;  %v6201_v41 = vld [vmem:[#allocation10 + $0x7a0] ss:$8 sps:$4 sm:$0xff]  }
 0x116   :  { %830 = vmatpush1.bf16.msra.mxu0 %v6107_v42  ;;  %v6206_v42 = vld [vmem:[#allocation10 + $0x7b4] ss:$8 sps:$4 sm:$0xff]  }
 0x117   :  { %4281 = vmatpush1.bf16.msra.mxu1 %v6110_v43  ;;  %831 = vmatprep.subr.bf16.mxu0 %v6115_v44  ;;  %v6204_v43 = vld [vmem:[#allocation10 + $0x7b0] ss:$8 sps:$4 sm:$0xff]   ;;  %v6209_v44 = vld [vmem:[#allocation10 + $0x7c4] ss:$8 sps:$4 sm:$0xff]  }
 0x118   :  { %4282 = vmatprep.subr.bf16.mxu1 %v6118_v45  ;;  %v6207_v45 = vld [vmem:[#allocation10 + $0x7c0] ss:$8 sps:$4 sm:$0xff]  }
 0x11a   :  { %832 = vmatpush1.bf16.msra.mxu0 %v6113_v46  ;;  %v6212_v46 = vld [vmem:[#allocation10 + $0x7d4] ss:$8 sps:$4 sm:$0xff]  }
 0x11b   :  { %4283 = vmatpush1.bf16.msra.mxu1 %v6116_v47  ;;  %833 = vmatprep.subr.bf16.mxu0 %v6121_v48  ;;  %v6210_v47 = vld [vmem:[#allocation10 + $0x7d0] ss:$8 sps:$4 sm:$0xff]   ;;  %v6215_v48 = vld [vmem:[#allocation10 + $0x7e4] ss:$8 sps:$4 sm:$0xff]  }
 0x11c   :  { %4284 = vmatprep.subr.bf16.mxu1 %v6124_v49  ;;  %v6213_v49 = vld [vmem:[#allocation10 + $0x7e0] ss:$8 sps:$4 sm:$0xff]  }
 0x11e   :  { %834 = vmatpush1.bf16.msra.mxu0 %v6119_v50  ;;  %v6218_v50 = vld [vmem:[#allocation10 + $0x7f4] ss:$8 sps:$4 sm:$0xff]  }
 0x11f   :  { %4285 = vmatpush1.bf16.msra.mxu1 %v6122_v51  ;;  %835 = vmatprep.subr.bf16.mxu0 %v6127_v52  ;;  %v6216_v51 = vld [vmem:[#allocation10 + $0x7f0] ss:$8 sps:$4 sm:$0xff]   ;;  %v6223_v52 = vld [vmem:[#allocation10 + $0x804] ss:$8 sps:$4 sm:$0xff]  }
 0x120   :  { %4286 = vmatprep.subr.bf16.mxu1 %v6130_v53  ;;  %v7209_v53 = vld [vmem:[#allocation5 + $0x40] sm:$0xff] }
 0x122   :  { %836 = vmatpush1.bf16.msra.mxu0 %v6125_v54  ;;  %v5301_v54 = vcombine.low %v7201_v17, %v7201_v17  ;;  %v6247_v17 = vld [vmem:[#allocation10 + $0x884] ss:$8 sps:$4 sm:$0xff]  }
 0x123   :  { %4287 = vmatpush1.bf16.msra.mxu1 %v6128_v55  ;;  %837 = vmatprep.subr.bf16.mxu0 %v6133_v56  ;;  %v6221_v55 = vld [vmem:[#allocation10 + $0x800] ss:$8 sps:$4 sm:$0xff]   ;;  %v6226_v56 = vld [vmem:[#allocation10 + $0x814] ss:$8 sps:$4 sm:$0xff]  }
 0x124   :  { %4288 = vmatprep.subr.bf16.mxu1 %v6136_v57  ;;  %v5304_v57 = vcombine.high %v7209_v53, %v7209_v53 }
 0x126   :  { %838 = vmatpush1.bf16.msra.mxu0 %v6131_v58  ;;  %v6224_v58 = vld [vmem:[#allocation10 + $0x810] ss:$8 sps:$4 sm:$0xff]  }
 0x127   :  { %4289 = vmatpush1.bf16.msra.mxu1 %v6134_v59  ;;  %839 = vmatprep.subr.bf16.mxu0 %v6139_v60  ;;  %v6229_v59 = vld [vmem:[#allocation10 + $0x824] ss:$8 sps:$4 sm:$0xff]   ;;  %v6227_v60 = vld [vmem:[#allocation10 + $0x820] ss:$8 sps:$4 sm:$0xff]  }
 0x128   :  { %4290 = vmatprep.subr.bf16.mxu1 %v6142_v61  ;;  %v6232_v61 = vld [vmem:[#allocation10 + $0x834] ss:$8 sps:$4 sm:$0xff]  }
 0x12a   :  { %840 = vmatpush1.bf16.msra.mxu0 %v6137_v62  ;;  %v6330_v62 = vld [vmem:[#allocation8] ss:$8 sps:$4 sm:$0xff]  }
 0x12b   :  { %4291 = vmatpush1.bf16.msra.mxu1 %v6140_v63  ;;  %841 = vmatprep.subr.bf16.mxu0 %v6145_v0  ;;  %v6332_v63 = vld [vmem:[#allocation8 + $0x4] ss:$8 sps:$4 sm:$0xff]   ;;  %v6230_v0 = vld [vmem:[#allocation10 + $0x830] ss:$8 sps:$4 sm:$0xff]  }
 0x12c   :  { %4292 = vmatprep.subr.bf16.mxu1 %v6148_v1  ;;  %v6235_v1 = vld [vmem:[#allocation10 + $0x844] ss:$8 sps:$4 sm:$0xff]  }
 0x12e   :  { %842 = vmatpush1.bf16.msra.mxu0 %v6143_v2  ;;  %v6336_v2 = vld [vmem:[#allocation8 + $0x10] ss:$8 sps:$4 sm:$0xff]  }
 0x12f   :  { %4293 = vmatpush1.bf16.msra.mxu1 %v6146_v3  ;;  %843 = vmatprep.subr.bf16.mxu0 %v6151_v4  ;;  %v6338_v3 = vld [vmem:[#allocation8 + $0x14] ss:$8 sps:$4 sm:$0xff]   ;;  %v6233_v4 = vld [vmem:[#allocation10 + $0x840] ss:$8 sps:$4 sm:$0xff]  }
 0x130   :  { %4294 = vmatprep.subr.bf16.mxu1 %v6154_v5  ;;  %v6238_v5 = vld [vmem:[#allocation10 + $0x854] ss:$8 sps:$4 sm:$0xff]  }
 0x132   :  { %844 = vmatpush1.bf16.msra.mxu0 %v6149_v6  ;;  %v6342_v6 = vld [vmem:[#allocation8 + $0x20] ss:$8 sps:$4 sm:$0xff]  }
 0x133   :  { %4295 = vmatpush1.bf16.msra.mxu1 %v6152_v7  ;;  %845 = vmatprep.subr.bf16.mxu0 %v6157_v8  ;;  %v6344_v7 = vld [vmem:[#allocation8 + $0x24] ss:$8 sps:$4 sm:$0xff]   ;;  %v6236_v8 = vld [vmem:[#allocation10 + $0x850] ss:$8 sps:$4 sm:$0xff]  }
 0x134   :  { %4296 = vmatprep.subr.bf16.mxu1 %v6160_v9  ;;  %v6241_v9 = vld [vmem:[#allocation10 + $0x864] ss:$8 sps:$4 sm:$0xff]  }
 0x136   :  { %846 = vmatpush1.bf16.msra.mxu0 %v6155_v10  ;;  %v6239_v10 = vld [vmem:[#allocation10 + $0x860] ss:$8 sps:$4 sm:$0xff]  }
 0x137   :  { %4297 = vmatpush1.bf16.msra.mxu1 %v6158_v11  ;;  %847 = vmatprep.subr.bf16.mxu0 %v6163_v12  ;;  %v6350_v11 = vld [vmem:[#allocation8 + $0x34] ss:$8 sps:$4 sm:$0xff]   ;;  %v6348_v12 = vld [vmem:[#allocation8 + $0x30] ss:$8 sps:$4 sm:$0xff]  }
 0x138   :  { %4298 = vmatprep.subr.bf16.mxu1 %v6166_v13  ;;  %v6244_v13 = vld [vmem:[#allocation10 + $0x874] ss:$8 sps:$4 sm:$0xff]  }
 0x13a   :  { %848 = vmatpush1.bf16.msra.mxu0 %v6161_v14  ;;  %v6242_v14 = vld [vmem:[#allocation10 + $0x870] ss:$8 sps:$4 sm:$0xff]  }
 0x13b   :  { %4299 = vmatpush1.bf16.msra.mxu1 %v6164_v15  ;;  %1117 = vmatprep.subr.bf16.mxu0 %v6332_v63  ;;  %v6356_v15 = vld [vmem:[#allocation8 + $0x44] ss:$8 sps:$4 sm:$0xff]   ;;  %v6277_v63 = vld [vmem:[#allocation10 + $0x920] ss:$8 sps:$4 sm:$0xff]  }
 0x13c   :  { %4309 = vmatprep.subr.bf16.mxu1 %v6173_v16  ;;  %v6354_v16 = vld [vmem:[#allocation8 + $0x40] ss:$8 sps:$4 sm:$0xff]  }
 0x13d   :  { %850 = vmatmul.mubr.bf16.vlgmr.msra.gmra.mrb[0].mxu0 %v5157_v20  ;;  %v6245_v20 = vld [vmem:[#allocation10 + $0x880] ss:$8 sps:$4 sm:$0xff]  }
 0x13e   :  { %4301 = vmatmul.mubr.bf16.vlgmr.msra.gmra.mrb[0].mxu1 %v5299_v21  ;;  %1118 = vmatpush1.bf16.msra.mxu0 %v6330_v62  ;;  %v6362_v21 = vld [vmem:[#allocation8 + $0x54] ss:$8 sps:$4 sm:$0xff]   ;;  %v6422_v62 = vld [vmem:[#allocation8 + $0xf0] ss:$8 sps:$4 sm:$0xff]  }
 0x13f   :  { %4310 = vmatpush1.bf16.msra.mxu1 %v6171_v22  ;;  %4341 = vmatprep.mubr.bf16.mxu1 %v5302_v24  ;;  %v6360_v22 = vld [vmem:[#allocation8 + $0x50] ss:$8 sps:$4 sm:$0xff]  }
 0x140   :  { %4311 = vmatprep.subr.bf16.mxu1 %v6176_v23  ;;  %1119 = vmatprep.subr.bf16.mxu0 %v6338_v3  ;;  %v6250_v23 = vld [vmem:[#allocation10 + $0x894] ss:$8 sps:$4 sm:$0xff]   ;;  %v6248_v24 = vld [vmem:[#allocation10 + $0x890] ss:$8 sps:$4 sm:$0xff]   ;;  %v6285_v3 = vld [vmem:[#allocation10 + $0x944] ss:$8 sps:$4 sm:$0xff]  }
 0x142   :  { %1120 = vmatpush1.bf16.msra.mxu0 %v6336_v2  ;;  %v6280_v2 = vld [vmem:[#allocation10 + $0x930] ss:$8 sps:$4 sm:$0xff]  }
 0x143   :  { %4312 = vmatpush1.bf16.msra.mxu1 %v6174_v25  ;;  %1121 = vmatprep.subr.bf16.mxu0 %v6344_v7  ;;  %v6368_v25 = vld [vmem:[#allocation8 + $0x64] ss:$8 sps:$4 sm:$0xff]  }
 0x144   :  { %4313 = vmatprep.subr.bf16.mxu1 %v6179_v26  ;;  %v6366_v26 = vld [vmem:[#allocation8 + $0x60] ss:$8 sps:$4 sm:$0xff]   ;;  %v6291_v7 = vld [vmem:[#allocation10 + $0x964] ss:$8 sps:$4 sm:$0xff]  }
 0x146   :  { %1122 = vmatpush1.bf16.msra.mxu0 %v6342_v6  ;;  %v6286_v6 = vld [vmem:[#allocation10 + $0x950] ss:$8 sps:$4 sm:$0xff]  }
 0x147   :  { %4314 = vmatpush1.bf16.msra.mxu1 %v6177_v18  ;;  %1123 = vmatprep.subr.bf16.mxu0 %v6350_v11  ;;  %v6253_v18 = vld [vmem:[#allocation10 + $0x8a4] ss:$8 sps:$4 sm:$0xff]  }
 0x148   :  { %4315 = vmatprep.subr.bf16.mxu1 %v6182_v27  ;;  %v6251_v27 = vld [vmem:[#allocation10 + $0x8a0] ss:$8 sps:$4 sm:$0xff]   ;;  %v6297_v11 = vld [vmem:[#allocation10 + $0x984] ss:$8 sps:$4 sm:$0xff]  }
 0x14a   :  { %1124 = vmatpush1.bf16.msra.mxu0 %v6348_v12  ;;  %v6295_v12 = vld [vmem:[#allocation10 + $0x980] ss:$8 sps:$4 sm:$0xff]  }
 0x14b   :  { %4316 = vmatpush1.bf16.msra.mxu1 %v6180_v19  ;;  %1125 = vmatprep.subr.bf16.mxu0 %v6356_v15  ;;  %v6374_v19 = vld [vmem:[#allocation8 + $0x74] ss:$8 sps:$4 sm:$0xff]   ;;  %v6303_v15 = vld [vmem:[#allocation10 + $0x9a4] ss:$8 sps:$4 sm:$0xff]  }
 0x14c   :  { %4317 = vmatprep.subr.bf16.mxu1 %v6185_v28  ;;  %v6372_v28 = vld [vmem:[#allocation8 + $0x70] ss:$8 sps:$4 sm:$0xff]  }
 0x14e   :  { %1126 = vmatpush1.bf16.msra.mxu0 %v6354_v16  ;;  %v6301_v16 = vld [vmem:[#allocation10 + $0x9a0] ss:$8 sps:$4 sm:$0xff]  }
 0x14f   :  { %4318 = vmatpush1.bf16.msra.mxu1 %v6183_v29  ;;  %1127 = vmatprep.subr.bf16.mxu0 %v6362_v21  ;;  %v6256_v29 = vld [vmem:[#allocation10 + $0x8b4] ss:$8 sps:$4 sm:$0xff]   ;;  %v6309_v21 = vld [vmem:[#allocation10 + $0x9c4] ss:$8 sps:$4 sm:$0xff]  }
 0x150   :  { %4319 = vmatprep.subr.bf16.mxu1 %v6188_v30  ;;  %v6254_v30 = vld [vmem:[#allocation10 + $0x8b0] ss:$8 sps:$4 sm:$0xff]  }
 0x152   :  { %1128 = vmatpush1.bf16.msra.mxu0 %v6360_v22  ;;  %v6307_v22 = vld [vmem:[#allocation10 + $0x9c0] ss:$8 sps:$4 sm:$0xff]  }
 0x153   :  { %4320 = vmatpush1.bf16.msra.mxu1 %v6186_v31  ;;  %1129 = vmatprep.subr.bf16.mxu0 %v6368_v25  ;;  %v6380_v31 = vld [vmem:[#allocation8 + $0x84] ss:$8 sps:$4 sm:$0xff]  }
 0x154   :  { %4321 = vmatprep.subr.bf16.mxu1 %v6191_v32  ;;  %v6378_v32 = vld [vmem:[#allocation8 + $0x80] ss:$8 sps:$4 sm:$0xff]   ;;  %v6315_v25 = vld [vmem:[#allocation10 + $0x9e4] ss:$8 sps:$4 sm:$0xff]  }
 0x156   :  { %1130 = vmatpush1.bf16.msra.mxu0 %v6366_v26  ;;  %v6313_v26 = vld [vmem:[#allocation10 + $0x9e0] ss:$8 sps:$4 sm:$0xff]  }
 0x157   :  { %4322 = vmatpush1.bf16.msra.mxu1 %v6189_v33  ;;  %1131 = vmatprep.subr.bf16.mxu0 %v6374_v19  ;;  %v6259_v33 = vld [vmem:[#allocation10 + $0x8c4] ss:$8 sps:$4 sm:$0xff]  }
 0x158   :  { %4323 = vmatprep.subr.bf16.mxu1 %v6194_v34  ;;  %v6257_v34 = vld [vmem:[#allocation10 + $0x8c0] ss:$8 sps:$4 sm:$0xff]   ;;  %v6323_v19 = vld [vmem:[#allocation10 + $0xa04] ss:$8 sps:$4 sm:$0xff]  }
 0x15a   :  { %1132 = vmatpush1.bf16.msra.mxu0 %v6372_v28  ;;  %v7221_v28 = vld [vmem:[#allocation5 + $0x50] sm:$0xff] }
 0x15b   :  { %4324 = vmatpush1.bf16.msra.mxu1 %v6192_v35  ;;  %1133 = vmatprep.subr.bf16.mxu0 %v6380_v31  ;;  %v6386_v35 = vld [vmem:[#allocation8 + $0x94] ss:$8 sps:$4 sm:$0xff]   ;;  %v5308_v31 = vcombine.high %v7221_v28, %v7221_v28 }
 0x15c   :  { %4325 = vmatprep.subr.bf16.mxu1 %v6197_v36  ;;  %v6384_v36 = vld [vmem:[#allocation8 + $0x90] ss:$8 sps:$4 sm:$0xff]  }
 0x15e   :  { %1134 = vmatpush1.bf16.msra.mxu0 %v6378_v32  ;;  %v6326_v32 = vld [vmem:[#allocation10 + $0xa14] ss:$8 sps:$4 sm:$0xff]  }
 0x15f   :  { %4326 = vmatpush1.bf16.msra.mxu1 %v6195_v37  ;;  %1135 = vmatprep.subr.bf16.mxu0 %v6386_v35  ;;  %v6262_v37 = vld [vmem:[#allocation10 + $0x8d4] ss:$8 sps:$4 sm:$0xff]   ;;  %v224_v35 = vlaneseq }
 0x160   :  { %4327 = vmatprep.subr.bf16.mxu1 %v6200_v38  ;;  %v6260_v38 = vld [vmem:[#allocation10 + $0x8d0] ss:$8 sps:$4 sm:$0xff]  }
 0x162   :  { %1136 = vmatpush1.bf16.msra.mxu0 %v6384_v36  ;;  %v6327_v36 = vld [vmem:[#allocation10 + $0xa20] ss:$8 sps:$4 sm:$0xff]  }
 0x163   :  { %4328 = vmatpush1.bf16.msra.mxu1 %v6198_v39  ;;  %v6392_v39 = vld [vmem:[#allocation8 + $0xa4] ss:$8 sps:$4 sm:$0xff]  }
 0x164   :  { %4329 = vmatprep.subr.bf16.mxu1 %v6203_v40  ;;  %v6390_v40 = vld [vmem:[#allocation8 + $0xa0] ss:$8 sps:$4 sm:$0xff]   ;;  %1137 = vmatprep.subr.bf16.mxu0 %v6392_v39  ;;  %v6333_v39 = vld [vmem:[#allocation10 + $0xa30] ss:$8 sps:$4 sm:$0xff]  }
 0x166   :  { %1138 = vmatpush1.bf16.msra.mxu0 %v6390_v40  ;;  %v6341_v40 = vld [vmem:[#allocation10 + $0xa44] ss:$8 sps:$4 sm:$0xff]  }
 0x167   :  { %4330 = vmatpush1.bf16.msra.mxu1 %v6201_v41  ;;  %v6265_v41 = vld [vmem:[#allocation10 + $0x8e4] ss:$8 sps:$4 sm:$0xff]  }
 0x168   :  { %4331 = vmatprep.subr.bf16.mxu1 %v6206_v42  ;;  %v6263_v42 = vld [vmem:[#allocation10 + $0x8e0] ss:$8 sps:$4 sm:$0xff]  }
 0x16b   :  { %4332 = vmatpush1.bf16.msra.mxu1 %v6204_v43  ;;  %v6398_v43 = vld [vmem:[#allocation8 + $0xb4] ss:$8 sps:$4 sm:$0xff]  }
 0x16c   :  { %4333 = vmatprep.subr.bf16.mxu1 %v6209_v44  ;;  %v6396_v44 = vld [vmem:[#allocation8 + $0xb0] ss:$8 sps:$4 sm:$0xff]   ;;  %1139 = vmatprep.subr.bf16.mxu0 %v6398_v43  ;;  %v120_v43 = vld [vmem:[#allocation13] ss:$8 sm:$0x3] }
 0x16d   :  { %1140 = vmatpush1.bf16.msra.mxu0 %v6396_v44 }
 0x16f   :  { %4334 = vmatpush1.bf16.msra.mxu1 %v6207_v45  ;;  %v6268_v45 = vld [vmem:[#allocation10 + $0x8f4] ss:$8 sps:$4 sm:$0xff]  }
 0x170   :  { %4335 = vmatprep.subr.bf16.mxu1 %v6212_v46  ;;  %v6266_v46 = vld [vmem:[#allocation10 + $0x8f0] ss:$8 sps:$4 sm:$0xff]  }
 0x173   :  { %4336 = vmatpush1.bf16.msra.mxu1 %v6210_v47  ;;  %v6404_v47 = vld [vmem:[#allocation8 + $0xc4] ss:$8 sps:$4 sm:$0xff]  }
 0x174   :  { %4337 = vmatprep.subr.bf16.mxu1 %v6215_v48  ;;  %v6273_v48 = vld [vmem:[#allocation10 + $0x904] ss:$8 sps:$4 sm:$0xff]   ;;  %1141 = vmatprep.subr.bf16.mxu0 %v6404_v47 }
 0x177   :  { %4338 = vmatpush1.bf16.msra.mxu1 %v6213_v49  ;;  %v6402_v49 = vld [vmem:[#allocation8 + $0xc0] ss:$8 sps:$4 sm:$0xff]  }
 0x178   :  { %4339 = vmatprep.subr.bf16.mxu1 %v6218_v50  ;;  %v7215_v50 = vld [vmem:[#allocation5 + $0x48] sm:$0xff]  ;;  %1142 = vmatpush1.bf16.msra.mxu0 %v6402_v49  ;;  %v6353_v49 = vld [vmem:[#allocation10 + $0xa64] ss:$8 sps:$4 sm:$0xff]  }
 0x17b   :  { %4340 = vmatpush1.bf16.msra.mxu1 %v6216_v51  ;;  %v6410_v51 = vld [vmem:[#allocation8 + $0xd4] ss:$8 sps:$4 sm:$0xff]  }
 0x17c   :  { %4350 = vmatprep.subr.bf16.mxu1 %v6223_v52  ;;  %v5303_v52 = vcombine.low %v7209_v53, %v7209_v53  ;;  %1143 = vmatprep.subr.bf16.mxu0 %v6410_v51  ;;  %v6424_v53 = vld [vmem:[#allocation8 + $0xf4] ss:$8 sps:$4 sm:$0xff]  }
 0x17e   :  { %4342 = vmatmul.mubr.bf16.vlgmr.msra.gmra.mrb[0].mxu1 %v5301_v54  ;;  %v6408_v54 = vld [vmem:[#allocation8 + $0xd0] ss:$8 sps:$4 sm:$0xff]  }
 0x17f   :  { %4351 = vmatpush1.bf16.msra.mxu1 %v6221_v55  ;;  %4382 = vmatprep.mubr.bf16.mxu1 %v5304_v57  ;;  %v6271_v55 = vld [vmem:[#allocation10 + $0x900] ss:$8 sps:$4 sm:$0xff]   ;;  %v6276_v57 = vld [vmem:[#allocation10 + $0x914] ss:$8 sps:$4 sm:$0xff]  }
 0x180   :  { %4352 = vmatprep.subr.bf16.mxu1 %v6226_v56  ;;  %v5306_v56 = vcombine.high %v7215_v50, %v7215_v50  ;;  %1144 = vmatpush1.bf16.msra.mxu0 %v6408_v54 }
 0x183   :  { %4353 = vmatpush1.bf16.msra.mxu1 %v6224_v58  ;;  %v6418_v58 = vld [vmem:[#allocation8 + $0xe4] ss:$8 sps:$4 sm:$0xff]  }
 0x184   :  { %4354 = vmatprep.subr.bf16.mxu1 %v6229_v59  ;;  %v6416_v59 = vld [vmem:[#allocation8 + $0xe0] ss:$8 sps:$4 sm:$0xff]   ;;  %1145 = vmatprep.subr.bf16.mxu0 %v6418_v58 }
 0x185   :  { %1146 = vmatpush1.bf16.msra.mxu0 %v6416_v59  ;;  %v6359_v59 = vld [vmem:[#allocation10 + $0xa74] ss:$8 sps:$4 sm:$0xff]  }
 0x186   :  { %1147 = vmatprep.subr.bf16.mxu0 %v6424_v53 }
 0x187   :  { %4355 = vmatpush1.bf16.msra.mxu1 %v6227_v60  ;;  %v6274_v60 = vld [vmem:[#allocation10 + $0x910] ss:$8 sps:$4 sm:$0xff]  }
 0x188   :  { %4356 = vmatprep.subr.bf16.mxu1 %v6232_v61  ;;  %v6279_v61 = vld [vmem:[#allocation10 + $0x924] ss:$8 sps:$4 sm:$0xff]  }
 0x189   :  { %1148 = vmatpush1.bf16.msra.mxu0 %v6422_v62  ;;  %v6357_v62 = vld [vmem:[#allocation10 + $0xa70] ss:$8 sps:$4 sm:$0xff]  }
 0x18b   :  { %4357 = vmatpush1.bf16.msra.mxu1 %v6230_v0  ;;  %v6282_v0 = vld [vmem:[#allocation10 + $0x934] ss:$8 sps:$4 sm:$0xff]  }
 0x18c   :  { %4358 = vmatprep.subr.bf16.mxu1 %v6235_v1  ;;  %v6430_v1 = vld [vmem:[#allocation10 + $0x4] ss:$8 sps:$4 sm:$0xff]  }
 0x18d   :  { %4022 = vmatprep.subr.bf16.mxu0 %v6430_v1 }
 0x18f   :  { %4359 = vmatpush1.bf16.msra.mxu1 %v6233_v4  ;;  %v6283_v4 = vld [vmem:[#allocation10 + $0x940] ss:$8 sps:$4 sm:$0xff]  }
 0x190   :  { %4360 = vmatprep.subr.bf16.mxu1 %v6238_v5  ;;  %v6288_v5 = vld [vmem:[#allocation10 + $0x954] ss:$8 sps:$4 sm:$0xff]  }
 0x193   :  { %4361 = vmatpush1.bf16.msra.mxu1 %v6236_v8  ;;  %v6289_v8 = vld [vmem:[#allocation10 + $0x960] ss:$8 sps:$4 sm:$0xff]  }
 0x194   :  { %4362 = vmatprep.subr.bf16.mxu1 %v6241_v9  ;;  %v6294_v9 = vld [vmem:[#allocation10 + $0x974] ss:$8 sps:$4 sm:$0xff]  }
 0x197   :  { %4363 = vmatpush1.bf16.msra.mxu1 %v6239_v10  ;;  %v6292_v10 = vld [vmem:[#allocation10 + $0x970] ss:$8 sps:$4 sm:$0xff]  }
 0x198   :  { %4364 = vmatprep.subr.bf16.mxu1 %v6244_v13  ;;  %v6300_v13 = vld [vmem:[#allocation10 + $0x994] ss:$8 sps:$4 sm:$0xff]  }
 0x19b   :  { %4365 = vmatpush1.bf16.msra.mxu1 %v6242_v14  ;;  %v6298_v14 = vld [vmem:[#allocation10 + $0x990] ss:$8 sps:$4 sm:$0xff]  }
 0x19c   :  { %4366 = vmatprep.subr.bf16.mxu1 %v6247_v17  ;;  %v6306_v17 = vld [vmem:[#allocation10 + $0x9b4] ss:$8 sps:$4 sm:$0xff]  }
 0x19f   :  { %4367 = vmatpush1.bf16.msra.mxu1 %v6245_v20  ;;  %v6304_v20 = vld [vmem:[#allocation10 + $0x9b0] ss:$8 sps:$4 sm:$0xff]  }
 0x1a0   :  { %4368 = vmatprep.subr.bf16.mxu1 %v6250_v23  ;;  %v6312_v23 = vld [vmem:[#allocation10 + $0x9d4] ss:$8 sps:$4 sm:$0xff]  }
 0x1a3   :  { %4369 = vmatpush1.bf16.msra.mxu1 %v6248_v24  ;;  %v6310_v24 = vld [vmem:[#allocation10 + $0x9d0] ss:$8 sps:$4 sm:$0xff]  }
 0x1a4   :  { %4370 = vmatprep.subr.bf16.mxu1 %v6253_v18  ;;  %v6318_v18 = vld [vmem:[#allocation10 + $0x9f4] ss:$8 sps:$4 sm:$0xff]  }
 0x1a7   :  { %4371 = vmatpush1.bf16.msra.mxu1 %v6251_v27  ;;  %v6316_v27 = vld [vmem:[#allocation10 + $0x9f0] ss:$8 sps:$4 sm:$0xff]  }
 0x1a8   :  { %4372 = vmatprep.subr.bf16.mxu1 %v6256_v29  ;;  %v5305_v29 = vcombine.low %v7215_v50, %v7215_v50 }
 0x1ab   :  { %4373 = vmatpush1.bf16.msra.mxu1 %v6254_v30  ;;  %v6321_v30 = vld [vmem:[#allocation10 + $0xa00] ss:$8 sps:$4 sm:$0xff]  }
 0x1ac   :  { %4374 = vmatprep.subr.bf16.mxu1 %v6259_v33  ;;  %v6324_v33 = vld [vmem:[#allocation10 + $0xa10] ss:$8 sps:$4 sm:$0xff]  }
 0x1af   :  { %4375 = vmatpush1.bf16.msra.mxu1 %v6257_v34  ;;  %v6329_v34 = vld [vmem:[#allocation10 + $0xa24] ss:$8 sps:$4 sm:$0xff]  }
 0x1b0   :  { %4376 = vmatprep.subr.bf16.mxu1 %v6262_v37  ;;  %v6335_v37 = vld [vmem:[#allocation10 + $0xa34] ss:$8 sps:$4 sm:$0xff]  }
 0x1b3   :  { %4377 = vmatpush1.bf16.msra.mxu1 %v6260_v38  ;;  %v225_v38 = vshrl.u32 %v224_v35, 7 }
 0x1b4   :  { %4378 = vmatprep.subr.bf16.mxu1 %v6265_v41 }
 0x1b5   :  { %v7227_v41 = vsub.s32 0, %v225_v38  ;;  %v7229_v44 = vsub.s32 1, %v225_v38  ;;  %v6399_v38 = vld [vmem:[#allocation10 + $0xae0] ss:$8 sps:$4 sm:$0xff]  }
 0x1b7   :  { %4379 = vmatpush1.bf16.msra.mxu1 %v6263_v42  ;;  %v6339_v42 = vld [vmem:[#allocation10 + $0xa40] ss:$8 sps:$4 sm:$0xff]   ;;  %v231_v47 = vrot.slane %v120_v43, %v7229_v44 }
 0x1b8   :  { %4380 = vmatprep.subr.bf16.mxu1 %v6268_v45  ;;  %v6347_v45 = vld [vmem:[#allocation10 + $0xa54] ss:$8 sps:$4 sm:$0xff]  }
 0x1bb   :  { %4381 = vmatpush1.bf16.msra.mxu1 %v6266_v46  ;;  %v227_v46 = vrot.slane %v120_v43, %v7227_v41 }
 0x1bc   :  { %4391 = vmatprep.subr.bf16.mxu1 %v6273_v48  ;;  %v6345_v48 = vld [vmem:[#allocation10 + $0xa50] ss:$8 sps:$4 sm:$0xff]  }
 0x1be   :  { %4383 = vmatmul.mubr.bf16.vlgmr.msra.gmra.mrb[0].mxu1 %v5303_v52 }
 0x1bf   :  { %4392 = vmatpush1.bf16.msra.mxu1 %v6271_v55  ;;  %4423 = vmatprep.mubr.bf16.mxu1 %v5306_v56  ;;  %v6351_v56 = vld [vmem:[#allocation10 + $0xa60] ss:$8 sps:$4 sm:$0xff]  }
 0x1c0   :  { %4393 = vmatprep.subr.bf16.mxu1 %v6276_v57 }
 0x1c3   :  { %4394 = vmatpush1.bf16.msra.mxu1 %v6274_v60 }
 0x1c4   :  { %4395 = vmatprep.subr.bf16.mxu1 %v6279_v61 }
 0x1c7   :  { %4396 = vmatpush1.bf16.msra.mxu1 %v6277_v63 }
 0x1c8   :  { %4397 = vmatprep.subr.bf16.mxu1 %v6282_v0  ;;  %v6365_v0 = vld [vmem:[#allocation10 + $0xa84] ss:$8 sps:$4 sm:$0xff]  }
 0x1cb   :  { %4398 = vmatpush1.bf16.msra.mxu1 %v6280_v2 }
 0x1cc   :  { %4399 = vmatprep.subr.bf16.mxu1 %v6285_v3 }
 0x1cf   :  { %4400 = vmatpush1.bf16.msra.mxu1 %v6283_v4  ;;  %v6363_v4 = vld [vmem:[#allocation10 + $0xa80] ss:$8 sps:$4 sm:$0xff]  }
 0x1d0   :  { %4401 = vmatprep.subr.bf16.mxu1 %v6288_v5  ;;  %v6371_v5 = vld [vmem:[#allocation10 + $0xa94] ss:$8 sps:$4 sm:$0xff]  }
 0x1d3   :  { %4402 = vmatpush1.bf16.msra.mxu1 %v6286_v6  ;;  %v6369_v6 = vld [vmem:[#allocation10 + $0xa90] ss:$8 sps:$4 sm:$0xff]  }
 0x1d4   :  { %4403 = vmatprep.subr.bf16.mxu1 %v6291_v7  ;;  %v6377_v7 = vld [vmem:[#allocation10 + $0xaa4] ss:$8 sps:$4 sm:$0xff]  }
 0x1d7   :  { %4404 = vmatpush1.bf16.msra.mxu1 %v6289_v8 }
 0x1d8   :  { %4405 = vmatprep.subr.bf16.mxu1 %v6294_v9 }
 0x1db   :  { %4406 = vmatpush1.bf16.msra.mxu1 %v6292_v10  ;;  %v6375_v10 = vld [vmem:[#allocation10 + $0xaa0] ss:$8 sps:$4 sm:$0xff]  }
 0x1dc   :  { %4407 = vmatprep.subr.bf16.mxu1 %v6297_v11  ;;  %v6383_v11 = vld [vmem:[#allocation10 + $0xab4] ss:$8 sps:$4 sm:$0xff]  }
 0x1df   :  { %4408 = vmatpush1.bf16.msra.mxu1 %v6295_v12 }
 0x1e0   :  { %4409 = vmatprep.subr.bf16.mxu1 %v6300_v13 }
 0x1e3   :  { %4410 = vmatpush1.bf16.msra.mxu1 %v6298_v14 }
 0x1e4   :  { %4411 = vmatprep.subr.bf16.mxu1 %v6303_v15 }
 0x1e7   :  { %4412 = vmatpush1.bf16.msra.mxu1 %v6301_v16 }
 0x1e8   :  { %4413 = vmatprep.subr.bf16.mxu1 %v6306_v17  ;;  %v6381_v17 = vld [vmem:[#allocation10 + $0xab0] ss:$8 sps:$4 sm:$0xff]  }
 0x1eb   :  { %4414 = vmatpush1.bf16.msra.mxu1 %v6304_v20  ;;  %v6389_v20 = vld [vmem:[#allocation10 + $0xac4] ss:$8 sps:$4 sm:$0xff]  }
 0x1ec   :  { %4415 = vmatprep.subr.bf16.mxu1 %v6309_v21 }
 0x1ef   :  { %4416 = vmatpush1.bf16.msra.mxu1 %v6307_v22 }
 0x1f0   :  { %4417 = vmatprep.subr.bf16.mxu1 %v6312_v23 }
 0x1f3   :  { %4418 = vmatpush1.bf16.msra.mxu1 %v6310_v24 }
 0x1f4   :  { %4419 = vmatprep.subr.bf16.mxu1 %v6315_v25 }
 0x1f7   :  { %4420 = vmatpush1.bf16.msra.mxu1 %v6313_v26 }
 0x1f8   :  { %4421 = vmatprep.subr.bf16.mxu1 %v6318_v18  ;;  %v6387_v18 = vld [vmem:[#allocation10 + $0xac0] ss:$8 sps:$4 sm:$0xff]  }
 0x1fb   :  { %4422 = vmatpush1.bf16.msra.mxu1 %v6316_v27  ;;  %v6395_v27 = vld [vmem:[#allocation10 + $0xad4] ss:$8 sps:$4 sm:$0xff]  }
 0x1fc   :  { %4432 = vmatprep.subr.bf16.mxu1 %v6323_v19 }
 0x1fe   :  { %4424 = vmatmul.mubr.bf16.vlgmr.msra.gmra.mrb[0].mxu1 %v5305_v29 }
 0x1ff   :  { %4433 = vmatpush1.bf16.msra.mxu1 %v6321_v30  ;;  %4464 = vmatprep.mubr.bf16.mxu1 %v5308_v31 }
 0x200   :  { %4434 = vmatprep.subr.bf16.mxu1 %v6326_v32  ;;  %v6393_v32 = vld [vmem:[#allocation10 + $0xad0] ss:$8 sps:$4 sm:$0xff]  }
 0x203   :  { %4435 = vmatpush1.bf16.msra.mxu1 %v6324_v33  ;;  %v6401_v33 = vld [vmem:[#allocation10 + $0xae4] ss:$8 sps:$4 sm:$0xff]  }
 0x204   :  { %4436 = vmatprep.subr.bf16.mxu1 %v6329_v34 }
 0x207   :  { %4437 = vmatpush1.bf16.msra.mxu1 %v6327_v36 }
 0x208   :  { %4438 = vmatprep.subr.bf16.mxu1 %v6335_v37 }
 0x20b   :  { %4439 = vmatpush1.bf16.msra.mxu1 %v6333_v39  ;;  %v6407_v39 = vld [vmem:[#allocation10 + $0xaf4] ss:$8 sps:$4 sm:$0xff]  }
 0x20c   :  { %4440 = vmatprep.subr.bf16.mxu1 %v6341_v40 }
 0x20f   :  { %4441 = vmatpush1.bf16.msra.mxu1 %v6339_v42 }
 0x210   :  { %4442 = vmatprep.subr.bf16.mxu1 %v6347_v45  ;;  %v851_v50 = vpop.f32.mrb[0].mxu0 }
 0x211   :  { %v7233_v51 = vadd.f32 %v851_v50, %v227_v46  ;;  %v853_v52 = vpop.f32.mrb[1].mxu0  ;;  %v6405_v46 = vld [vmem:[#allocation10 + $0xaf0] ss:$8 sps:$4 sm:$0xff]   ;;  %v7245_v50 = vld [vmem:[#allocation5 + $0x58] sm:$0xff] }
 0x212   :  { %v7235_v54 = vadd.f32 %v853_v52, %v231_v47  ;;  %v855_v55 = vpop.f32.mrb[2].mxu0 }
 0x213   :  { %4443 = vmatpush1.bf16.msra.mxu1 %v6345_v48  ;;  %v7238_v57 = vmul.f32 0.70710677, %v7233_v51  ;;  %v856_v58 = vpop.f32.mrb[3].mxu0  ;;  %v6415_v48 = vld [vmem:[#allocation10 + $0xb04] ss:$8 sps:$4 sm:$0xff]  }
 0x214   :  { %4444 = vmatprep.subr.bf16.mxu1 %v6353_v49  ;;  %v7241_v60 = vmul.f32 0.70710677, %v7235_v54 }
 0x215   :  { %v862_v61 = vand.u32 2147483647, %v7238_v57  ;;  %vm902_vm0 = vcmp.lt.f32.partialorder %v7238_v57, 0.0  ;;  %v6425_v57 = vld [vmem:[#allocation10 + $0xb20] ss:$8 sps:$4 sm:$0xff]  }
 0x216   :  { %v863_v53 = vand.u32 2147483647, %v7241_v60  ;;  %vm903_vm1 = vcmp.lt.f32.partialorder %v7241_v60, 0.0  ;;  %v6433_v60 = vld [vmem:[#allocation10 + $0xb34] ss:$8 sps:$4 sm:$0xff]  }
 0x217   :  { %4445 = vmatpush1.bf16.msra.mxu1 %v6351_v56  ;;  %v864_v63 = vmul.f32 0.3275911, %v862_v61  ;;  %v890_v8 = vsub.f32 0.0, %v862_v61  ;;  %v5307_v56 = vcombine.low %v7221_v28, %v7221_v28  ;;  %v6419_v28 = vld [vmem:[#allocation10 + $0xb10] ss:$8 sps:$4 sm:$0xff]  }
 0x218   :  { %4446 = vmatprep.subr.bf16.mxu1 %v6359_v59  ;;  %v865_v1 = vmul.f32 0.3275911, %v863_v53  ;;  %v891_v9 = vsub.f32 0.0, %v863_v53 }
 0x219   :  { %v866_v2 = vadd.f32 1.0, %v864_v63  ;;  %v892_v13 = vmul.f32 %v890_v8, %v862_v61  ;;  %v6413_v61 = vld [vmem:[#allocation10 + $0xb00] ss:$8 sps:$4 sm:$0xff]  }
 0x21a   :  { %v867_v3 = vadd.f32 1.0, %v865_v1  ;;  %v893_v16 = vmul.f32 %v891_v9, %v863_v53  ;;  %v5310_v53 = vcombine.high %v7245_v50, %v7245_v50 }
 0x21b   :  { %4447 = vmatpush1.bf16.msra.mxu1 %v6357_v62  ;;  %6817 = vrcp.f32 %v866_v2  ;;  %v894_v23 = vmul.f32 1.442695, %v892_v13  ;;  %v6421_v62 = vld [vmem:[#allocation10 + $0xb14] ss:$8 sps:$4 sm:$0xff]   ;;  %v6428_v13 = vld [vmem:[#allocation10] ss:$8 sps:$4 sm:$0xff]  }
 0x21c   :  { %4448 = vmatprep.subr.bf16.mxu1 %v6365_v0  ;;  %6819 = vrcp.f32 %v867_v3  ;;  %v896_v26 = vmul.f32 1.442695, %v893_v16  ;;  %v858_v3 = vmul.f32 0.5, %v7233_v51  ;;  %v6436_v16 = vld [vmem:[#allocation10 + $0x14] ss:$8 sps:$4 sm:$0xff]  }
 0x21d   :  { %6821 = vpow2.f32 %v894_v23  ;;  %v6437_v23 = vld [vmem:[#allocation10 + $0xb40] ss:$8 sps:$4 sm:$0xff]  }
 0x21e   :  { %6823 = vpow2.f32 %v896_v26  ;;  %v6448_v26 = vld [vmem:[#allocation10 + $0x34] ss:$8 sps:$4 sm:$0xff]  }
 0x21f   :  { %4449 = vmatpush1.bf16.msra.mxu1 %v6363_v4 }
 0x220   :  { %4450 = vmatprep.subr.bf16.mxu1 %v6371_v5  ;;  %v6427_v5 = vld [vmem:[#allocation10 + $0xb24] ss:$8 sps:$4 sm:$0xff]  }
 0x223   :  { %4451 = vmatpush1.bf16.msra.mxu1 %v6369_v6 }
 0x224   :  { %4452 = vmatprep.subr.bf16.mxu1 %v6377_v7  ;;  %v859_v7 = vmul.f32 0.5, %v7235_v54 }
 0x225   :  { %v6818_v12 = vpop.eup %6817 }
 0x226   :  { %v6820_v14 = vpop.eup %6819  ;;  %v872_v15 = vmul.f32 1.0614054, %v6818_v12 }
 0x227   :  { %4453 = vmatpush1.bf16.msra.mxu1 %v6375_v10  ;;  %v873_v21 = vmul.f32 1.0614054, %v6820_v14  ;;  %v6822_v47 = vpop.eup %6821  ;;  %v7255_v10 = vld [vmem:[#allocation5] sm:$0xff] }
 0x228   :  { %4454 = vmatprep.subr.bf16.mxu1 %v6383_v11  ;;  %v874_v22 = vadd.f32 -1.4531521, %v872_v15  ;;  %v6824_v52 = vpop.eup %6823 }
 0x229   :  { %v875_v24 = vadd.f32 -1.4531521, %v873_v21  ;;  %v6434_v21 = vld [vmem:[#allocation10 + $0x10] ss:$8 sps:$4 sm:$0xff]  }
 0x22a   :  { %v876_v25 = vmul.f32 %v6818_v12, %v874_v22  ;;  %v6442_v22 = vld [vmem:[#allocation10 + $0x24] ss:$8 sps:$4 sm:$0xff]  }
 0x22b   :  { %4455 = vmatpush1.bf16.msra.mxu1 %v6381_v17  ;;  %v877_v19 = vmul.f32 %v6820_v14, %v875_v24  ;;  %v6431_v17 = vld [vmem:[#allocation10 + $0xb30] ss:$8 sps:$4 sm:$0xff]   ;;  %v6445_v24 = vld [vmem:[#allocation10 + $0xb54] ss:$8 sps:$4 sm:$0xff]  }
 0x22c   :  { %4456 = vmatprep.subr.bf16.mxu1 %v6389_v20  ;;  %v878_v29 = vadd.f32 1.4214138, %v876_v25  ;;  %v6439_v20 = vld [vmem:[#allocation10 + $0xb44] ss:$8 sps:$4 sm:$0xff]   ;;  %v6440_v25 = vld [vmem:[#allocation10 + $0x20] ss:$8 sps:$4 sm:$0xff]  }
 0x22d   :  { %v879_v30 = vadd.f32 1.4214138, %v877_v19  ;;  %v6446_v19 = vld [vmem:[#allocation10 + $0x30] ss:$8 sps:$4 sm:$0xff]  }
 0x22e   :  { %v880_v31 = vmul.f32 %v6818_v12, %v878_v29  ;;  %v6454_v29 = vld [vmem:[#allocation10 + $0x44] ss:$8 sps:$4 sm:$0xff]  }
 0x22f   :  { %4457 = vmatpush1.bf16.msra.mxu1 %v6387_v18  ;;  %v881_v34 = vmul.f32 %v6820_v14, %v879_v30  ;;  %v6443_v18 = vld [vmem:[#allocation10 + $0xb50] ss:$8 sps:$4 sm:$0xff]   ;;  %v6449_v30 = vld [vmem:[#allocation10 + $0xb60] ss:$8 sps:$4 sm:$0xff]  }
 0x230   :  { %4458 = vmatprep.subr.bf16.mxu1 %v6395_v27  ;;  %v882_v35 = vadd.f32 -0.28449672, %v880_v31  ;;  %v6451_v27 = vld [vmem:[#allocation10 + $0xb64] ss:$8 sps:$4 sm:$0xff]   ;;  %v6457_v31 = vld [vmem:[#allocation10 + $0xb74] ss:$8 sps:$4 sm:$0xff]  }
 0x231   :  { %v883_v36 = vadd.f32 -0.28449672, %v881_v34  ;;  %v6455_v34 = vld [vmem:[#allocation10 + $0xb70] ss:$8 sps:$4 sm:$0xff]  }
 0x232   :  { %v884_v37 = vmul.f32 %v6818_v12, %v882_v35  ;;  %v6463_v35 = vld [vmem:[#allocation10 + $0xb84] ss:$8 sps:$4 sm:$0xff]  }
 0x233   :  { %4459 = vmatpush1.bf16.msra.mxu1 %v6393_v32  ;;  %v885_v40 = vmul.f32 %v6820_v14, %v883_v36  ;;  %v6452_v32 = vld [vmem:[#allocation10 + $0x40] ss:$8 sps:$4 sm:$0xff]   ;;  %v6458_v36 = vld [vmem:[#allocation10 + $0x50] ss:$8 sps:$4 sm:$0xff]  }
 0x234   :  { %4460 = vmatprep.subr.bf16.mxu1 %v6401_v33  ;;  %v886_v42 = vadd.f32 0.2548296, %v884_v37  ;;  %v6460_v33 = vld [vmem:[#allocation10 + $0x54] ss:$8 sps:$4 sm:$0xff]   ;;  %v6466_v37 = vld [vmem:[#allocation10 + $0x64] ss:$8 sps:$4 sm:$0xff]  }
 0x235   :  { %v887_v43 = vadd.f32 0.2548296, %v885_v40  ;;  %v6464_v40 = vld [vmem:[#allocation10 + $0x60] ss:$8 sps:$4 sm:$0xff]  }
 0x236   :  { %v888_v45 = vmul.f32 %v6818_v12, %v886_v42  ;;  %v6472_v42 = vld [vmem:[#allocation10 + $0x74] ss:$8 sps:$4 sm:$0xff]  }
 0x237   :  { %4461 = vmatpush1.bf16.msra.mxu1 %v6399_v38  ;;  %v889_v49 = vmul.f32 %v6820_v14, %v887_v43  ;;  %v5288_v14 = vcombine.high %v7255_v10, %v7255_v10  ;;  %v6461_v38 = vld [vmem:[#allocation10 + $0xb80] ss:$8 sps:$4 sm:$0xff]   ;;  %v6467_v43 = vld [vmem:[#allocation10 + $0xb90] ss:$8 sps:$4 sm:$0xff]  }
 0x238   :  { %4462 = vmatprep.subr.bf16.mxu1 %v6407_v39  ;;  %v898_v55 = vmul.f32 %v6822_v47, %v888_v45  ;;  %v6469_v39 = vld [vmem:[#allocation10 + $0xb94] ss:$8 sps:$4 sm:$0xff]   ;;  %v6475_v45 = vld [vmem:[#allocation10 + $0xba4] ss:$8 sps:$4 sm:$0xff]  }
 0x239   :  { %v899_v58 = vmul.f32 %v6824_v52, %v889_v49  ;;  %v6478_v47 = vld [vmem:[#allocation10 + $0x84] ss:$8 sps:$4 sm:$0xff]   ;;  %v6481_v49 = vld [vmem:[#allocation10 + $0xbb4] ss:$8 sps:$4 sm:$0xff]   ;;  %v6476_v52 = vld [vmem:[#allocation10 + $0x80] ss:$8 sps:$4 sm:$0xff]  }
 0x23a   :  { %v900_v59 = vsub.f32 1.0, %v898_v55  ;;  %v6484_v55 = vld [vmem:[#allocation10 + $0x94] ss:$8 sps:$4 sm:$0xff]  }
 0x23b   :  { %4463 = vmatpush1.bf16.msra.mxu1 %v6405_v46  ;;  %v901_v63 = vsub.f32 1.0, %v899_v58  ;;  %v6470_v46 = vld [vmem:[#allocation10 + $0x70] ss:$8 sps:$4 sm:$0xff]   ;;  %v6487_v58 = vld [vmem:[#allocation10 + $0xbc4] ss:$8 sps:$4 sm:$0xff]  }
 0x23c   :  { %4473 = vmatprep.subr.bf16.mxu1 %v6415_v48  ;;  %v904_v0 = vsub.f32 0.0, %v900_v59  ;;  %v6473_v48 = vld [vmem:[#allocation10 + $0xba0] ss:$8 sps:$4 sm:$0xff]  }
 0x23d   :  { %v905_v1 = vsub.f32 0.0, %v901_v63 }
 0x23e   :  { %4465 = vmatmul.mubr.bf16.vlgmr.msra.gmra.mrb[0].mxu1 %v5307_v56  ;;  %v906_v2 = vsel %vm902_vm0, %v904_v0, %v900_v59  ;;  %v6479_v56 = vld [vmem:[#allocation10 + $0xbb0] ss:$8 sps:$4 sm:$0xff]   ;;  %v6496_v0 = vld [vmem:[#allocation10 + $0xb4] ss:$8 sps:$4 sm:$0xff]  }
 0x23f   :  { %4474 = vmatpush1.bf16.msra.mxu1 %v6413_v61  ;;  %4505 = vmatprep.mubr.bf16.mxu1 %v5310_v53  ;;  %v908_v4 = vadd.f32 1.0, %v906_v2  ;;  %v907_v6 = vsel %vm903_vm1, %v905_v1, %v901_v63  ;;  %v6482_v59 = vld [vmem:[#allocation10 + $0x90] ss:$8 sps:$4 sm:$0xff]   ;;  %v6490_v61 = vld [vmem:[#allocation10 + $0xa4] ss:$8 sps:$4 sm:$0xff]  }
 0x240   :  { %4475 = vmatprep.subr.bf16.mxu1 %v6421_v62  ;;  %v909_v8 = vadd.f32 1.0, %v907_v6  ;;  %v6485_v53 = vld [vmem:[#allocation10 + $0xbc0] ss:$8 sps:$4 sm:$0xff]   ;;  %v6493_v62 = vld [vmem:[#allocation10 + $0xbd4] ss:$8 sps:$4 sm:$0xff]  }
 0x241   :  { %v910_v9 = vmul.f32 %v908_v4, %v858_v3  ;;  %v6488_v63 = vld [vmem:[#allocation10 + $0xa0] ss:$8 sps:$4 sm:$0xff]   ;;  %v6491_v1 = vld [vmem:[#allocation10 + $0xbd0] ss:$8 sps:$4 sm:$0xff]   ;;  %v6499_v2 = vld [vmem:[#allocation10 + $0xbe4] ss:$8 sps:$4 sm:$0xff]  }
 0x242   :  { %v911_v11 = vmul.f32 %v909_v8, %v859_v7  ;;  %v6502_v3 = vld [vmem:[#allocation10 + $0xc4] ss:$8 sps:$4 sm:$0xff]   ;;  %v6497_v4 = vld [vmem:[#allocation10 + $0xbe0] ss:$8 sps:$4 sm:$0xff]   ;;  %v6508_v7 = vld [vmem:[#allocation10 + $0xd4] ss:$8 sps:$4 sm:$0xff]  }
 0x243   :  { %4476 = vmatpush1.bf16.msra.mxu1 %v6419_v28  ;;  %v912_v15 = vpack.c.bf16 %v910_v9, %v910_v9  ;;  %v6494_v28 = vld [vmem:[#allocation10 + $0xb0] ss:$8 sps:$4 sm:$0xff]   ;;  %v6500_v6 = vld [vmem:[#allocation10 + $0xc0] ss:$8 sps:$4 sm:$0xff]   ;;  %v6513_v9 = vld [vmem:[#allocation10 + $0xc04] ss:$8 sps:$4 sm:$0xff]  }
 0x244   :  { %4477 = vmatprep.subr.bf16.mxu1 %v6427_v5  ;;  %v913_v12 = vpack.c.bf16 %v911_v11, %v911_v11  ;;  %v6505_v5 = vld [vmem:[#allocation10 + $0xbf4] ss:$8 sps:$4 sm:$0xff]   ;;  %v6503_v8 = vld [vmem:[#allocation10 + $0xbf0] ss:$8 sps:$4 sm:$0xff]  }
 0x245   :  { %v6506_v11 = vld [vmem:[#allocation10 + $0xd0] ss:$8 sps:$4 sm:$0xff]  }
 0x246   :  { %1149 = vmatprep.mubr.bf16.mxu0 %v913_v12  ;;  %v6516_v12 = vld [vmem:[#allocation10 + $0xe4] ss:$8 sps:$4 sm:$0xff]  }
 0x247   :  { %4478 = vmatpush1.bf16.msra.mxu1 %v6425_v57  ;;  %1150 = vmatmul.mubr.bf16.vlgmr.msra.gmra.mrb[4].mxu0 %v912_v15  ;;  %v7259_v57 = vld [vmem:[#allocation5 + $0x60] sm:$0xff] }
 0x248   :  { %4479 = vmatprep.subr.bf16.mxu1 %v6433_v60  ;;  %4023 = vmatpush1.bf16.msra.mxu0 %v6428_v13  ;;  %v5309_v60 = vcombine.low %v7245_v50, %v7245_v50  ;;  %v6511_v13 = vld [vmem:[#allocation10 + $0xc00] ss:$8 sps:$4 sm:$0xff]   ;;  %v6519_v15 = vld [vmem:[#allocation10 + $0xc14] ss:$8 sps:$4 sm:$0xff]   ;;  %v6520_v50 = vld [vmem:[#allocation10 + $0xf0] ss:$8 sps:$4 sm:$0xff]  }
 0x249   :  { %4054 = vmatprep.mubr.bf16.mxu0 %v5288_v14  ;;  %4024 = vmatprep.subr.bf16.mxu0 %v6436_v16  ;;  %v5312_v14 = vcombine.high %v7259_v57, %v7259_v57  ;;  %v6514_v16 = vld [vmem:[#allocation10 + $0xe0] ss:$8 sps:$4 sm:$0xff]  }
 0x24b   :  { %4480 = vmatpush1.bf16.msra.mxu1 %v6431_v17  ;;  %v6522_v17 = vld [vmem:[#allocation10 + $0xf4] ss:$8 sps:$4 sm:$0xff]  }
 0x24c   :  { %4481 = vmatprep.subr.bf16.mxu1 %v6439_v20  ;;  %4025 = vmatpush1.bf16.msra.mxu0 %v6434_v21  ;;  %v6517_v20 = vld [vmem:[#allocation10 + $0xc10] ss:$8 sps:$4 sm:$0xff]   ;;  %v6525_v21 = vld [vmem:[#allocation10 + $0xc24] ss:$8 sps:$4 sm:$0xff]  }
 0x24d   :  { %4026 = vmatprep.subr.bf16.mxu0 %v6442_v22  ;;  %v6530_v22 = vld [vmem:[#allocation10 + $0x104] ss:$8 sps:$4 sm:$0xff]  }
 0x24f   :  { %4482 = vmatpush1.bf16.msra.mxu1 %v6437_v23  ;;  %v7265_v23 = vld [vmem:[#allocation5 + $0x8] sm:$0xff] }
 0x250   :  { %4483 = vmatprep.subr.bf16.mxu1 %v6445_v24  ;;  %4027 = vmatpush1.bf16.msra.mxu0 %v6440_v25  ;;  %v6523_v24 = vld [vmem:[#allocation10 + $0xc20] ss:$8 sps:$4 sm:$0xff]   ;;  %v5287_v25 = vcombine.low %v7255_v10, %v7255_v10 }
 0x251   :  { %4028 = vmatprep.subr.bf16.mxu0 %v6448_v26  ;;  %v6533_v26 = vld [vmem:[#allocation10 + $0xc34] ss:$8 sps:$4 sm:$0xff]   ;;  %v6537_v10 = vld [vmem:[#allocation10 + $0xc40] ss:$8 sps:$4 sm:$0xff]  }
 0x253   :  { %4484 = vmatpush1.bf16.msra.mxu1 %v6443_v18  ;;  %v6528_v18 = vld [vmem:[#allocation10 + $0x100] ss:$8 sps:$4 sm:$0xff]  }
 0x254   :  { %4485 = vmatprep.subr.bf16.mxu1 %v6451_v27  ;;  %4029 = vmatpush1.bf16.msra.mxu0 %v6446_v19  ;;  %v5290_v27 = vcombine.high %v7265_v23, %v7265_v23  ;;  %v6536_v19 = vld [vmem:[#allocation10 + $0x114] ss:$8 sps:$4 sm:$0xff]  }
 0x255   :  { %4030 = vmatprep.subr.bf16.mxu0 %v6454_v29  ;;  %v6531_v29 = vld [vmem:[#allocation10 + $0xc30] ss:$8 sps:$4 sm:$0xff]  }
 0x257   :  { %4486 = vmatpush1.bf16.msra.mxu1 %v6449_v30  ;;  %v6539_v30 = vld [vmem:[#allocation10 + $0xc44] ss:$8 sps:$4 sm:$0xff]  }
 0x258   :  { %4487 = vmatprep.subr.bf16.mxu1 %v6457_v31  ;;  %4031 = vmatpush1.bf16.msra.mxu0 %v6452_v32  ;;  %v6534_v31 = vld [vmem:[#allocation10 + $0x110] ss:$8 sps:$4 sm:$0xff]   ;;  %v6542_v32 = vld [vmem:[#allocation10 + $0x124] ss:$8 sps:$4 sm:$0xff]  }
 0x259   :  { %4032 = vmatprep.subr.bf16.mxu0 %v6460_v33  ;;  %v6545_v33 = vld [vmem:[#allocation10 + $0xc54] ss:$8 sps:$4 sm:$0xff]  }
 0x25b   :  { %4488 = vmatpush1.bf16.msra.mxu1 %v6455_v34  ;;  %v6540_v34 = vld [vmem:[#allocation10 + $0x120] ss:$8 sps:$4 sm:$0xff]  }
 0x25c   :  { %4489 = vmatprep.subr.bf16.mxu1 %v6463_v35  ;;  %4033 = vmatpush1.bf16.msra.mxu0 %v6458_v36  ;;  %v6548_v35 = vld [vmem:[#allocation10 + $0x134] ss:$8 sps:$4 sm:$0xff]   ;;  %v6543_v36 = vld [vmem:[#allocation10 + $0xc50] ss:$8 sps:$4 sm:$0xff]  }
 0x25d   :  { %4034 = vmatprep.subr.bf16.mxu0 %v6466_v37  ;;  %v6551_v37 = vld [vmem:[#allocation10 + $0xc64] ss:$8 sps:$4 sm:$0xff]  }
 0x25f   :  { %4490 = vmatpush1.bf16.msra.mxu1 %v6461_v38  ;;  %v6546_v38 = vld [vmem:[#allocation10 + $0x130] ss:$8 sps:$4 sm:$0xff]  }
 0x260   :  { %4491 = vmatprep.subr.bf16.mxu1 %v6469_v39  ;;  %4035 = vmatpush1.bf16.msra.mxu0 %v6464_v40  ;;  %v6554_v39 = vld [vmem:[#allocation10 + $0x144] ss:$8 sps:$4 sm:$0xff]   ;;  %v6549_v40 = vld [vmem:[#allocation10 + $0xc60] ss:$8 sps:$4 sm:$0xff]  }
 0x261   :  { %4036 = vmatprep.subr.bf16.mxu0 %v6472_v42  ;;  %v6557_v42 = vld [vmem:[#allocation10 + $0xc74] ss:$8 sps:$4 sm:$0xff]  }
 0x263   :  { %4492 = vmatpush1.bf16.msra.mxu1 %v6467_v43  ;;  %v6552_v43 = vld [vmem:[#allocation10 + $0x140] ss:$8 sps:$4 sm:$0xff]  }
 0x264   :  { %4493 = vmatprep.subr.bf16.mxu1 %v6475_v45  ;;  %4037 = vmatpush1.bf16.msra.mxu0 %v6470_v46  ;;  %v6560_v45 = vld [vmem:[#allocation10 + $0x154] ss:$8 sps:$4 sm:$0xff]   ;;  %v6555_v46 = vld [vmem:[#allocation10 + $0xc70] ss:$8 sps:$4 sm:$0xff]  }
 0x265   :  { %4038 = vmatprep.subr.bf16.mxu0 %v6478_v47  ;;  %v6563_v47 = vld [vmem:[#allocation10 + $0xc84] ss:$8 sps:$4 sm:$0xff]  }
 0x267   :  { %4494 = vmatpush1.bf16.msra.mxu1 %v6473_v48  ;;  %v6558_v48 = vld [vmem:[#allocation10 + $0x150] ss:$8 sps:$4 sm:$0xff]  }
 0x268   :  { %4495 = vmatprep.subr.bf16.mxu1 %v6481_v49  ;;  %4039 = vmatpush1.bf16.msra.mxu0 %v6476_v52  ;;  %v6566_v49 = vld [vmem:[#allocation10 + $0x164] ss:$8 sps:$4 sm:$0xff]   ;;  %v6561_v52 = vld [vmem:[#allocation10 + $0xc80] ss:$8 sps:$4 sm:$0xff]  }
 0x269   :  { %4040 = vmatprep.subr.bf16.mxu0 %v6484_v55  ;;  %v6569_v55 = vld [vmem:[#allocation10 + $0xc94] ss:$8 sps:$4 sm:$0xff]  }
 0x26b   :  { %4496 = vmatpush1.bf16.msra.mxu1 %v6479_v56  ;;  %v6564_v56 = vld [vmem:[#allocation10 + $0x160] ss:$8 sps:$4 sm:$0xff]  }
 0x26c   :  { %4497 = vmatprep.subr.bf16.mxu1 %v6487_v58  ;;  %4041 = vmatpush1.bf16.msra.mxu0 %v6482_v59  ;;  %v6572_v58 = vld [vmem:[#allocation10 + $0x174] ss:$8 sps:$4 sm:$0xff]   ;;  %v6567_v59 = vld [vmem:[#allocation10 + $0xc90] ss:$8 sps:$4 sm:$0xff]  }
 0x26d   :  { %4042 = vmatprep.subr.bf16.mxu0 %v6490_v61  ;;  %v6575_v61 = vld [vmem:[#allocation10 + $0xca4] ss:$8 sps:$4 sm:$0xff]  }
 0x26f   :  { %4498 = vmatpush1.bf16.msra.mxu1 %v6485_v53  ;;  %v6570_v53 = vld [vmem:[#allocation10 + $0x170] ss:$8 sps:$4 sm:$0xff]  }
 0x270   :  { %4499 = vmatprep.subr.bf16.mxu1 %v6493_v62  ;;  %4043 = vmatpush1.bf16.msra.mxu0 %v6488_v63  ;;  %v6578_v62 = vld [vmem:[#allocation10 + $0x184] ss:$8 sps:$4 sm:$0xff]   ;;  %v6573_v63 = vld [vmem:[#allocation10 + $0xca0] ss:$8 sps:$4 sm:$0xff]  }
 0x271   :  { %4044 = vmatprep.subr.bf16.mxu0 %v6496_v0  ;;  %v6581_v0 = vld [vmem:[#allocation10 + $0xcb4] ss:$8 sps:$4 sm:$0xff]  }
 0x273   :  { %4500 = vmatpush1.bf16.msra.mxu1 %v6491_v1  ;;  %v6576_v1 = vld [vmem:[#allocation10 + $0x180] ss:$8 sps:$4 sm:$0xff]  }
 0x274   :  { %4501 = vmatprep.subr.bf16.mxu1 %v6499_v2  ;;  %4045 = vmatpush1.bf16.msra.mxu0 %v6494_v28  ;;  %v6584_v2 = vld [vmem:[#allocation10 + $0x194] ss:$8 sps:$4 sm:$0xff]   ;;  %v6579_v28 = vld [vmem:[#allocation10 + $0xcb0] ss:$8 sps:$4 sm:$0xff]  }
 0x275   :  { %4046 = vmatprep.subr.bf16.mxu0 %v6502_v3  ;;  %v6587_v3 = vld [vmem:[#allocation10 + $0xcc4] ss:$8 sps:$4 sm:$0xff]  }
 0x277   :  { %4502 = vmatpush1.bf16.msra.mxu1 %v6497_v4  ;;  %v6582_v4 = vld [vmem:[#allocation10 + $0x190] ss:$8 sps:$4 sm:$0xff]  }
 0x278   :  { %4503 = vmatprep.subr.bf16.mxu1 %v6505_v5  ;;  %4047 = vmatpush1.bf16.msra.mxu0 %v6500_v6  ;;  %v6590_v5 = vld [vmem:[#allocation10 + $0x1a4] ss:$8 sps:$4 sm:$0xff]   ;;  %v6585_v6 = vld [vmem:[#allocation10 + $0xcc0] ss:$8 sps:$4 sm:$0xff]  }
 0x279   :  { %4048 = vmatprep.subr.bf16.mxu0 %v6508_v7  ;;  %v6593_v7 = vld [vmem:[#allocation10 + $0xcd4] ss:$8 sps:$4 sm:$0xff]  }
 0x27b   :  { %4504 = vmatpush1.bf16.msra.mxu1 %v6503_v8  ;;  %v6588_v8 = vld [vmem:[#allocation10 + $0x1a0] ss:$8 sps:$4 sm:$0xff]  }
 0x27c   :  { %4514 = vmatprep.subr.bf16.mxu1 %v6513_v9  ;;  %4049 = vmatpush1.bf16.msra.mxu0 %v6506_v11  ;;  %v6596_v9 = vld [vmem:[#allocation10 + $0x1b4] ss:$8 sps:$4 sm:$0xff]   ;;  %v6591_v11 = vld [vmem:[#allocation10 + $0xcd0] ss:$8 sps:$4 sm:$0xff]  }
 0x27d   :  { %4050 = vmatprep.subr.bf16.mxu0 %v6516_v12  ;;  %v6594_v12 = vld [vmem:[#allocation10 + $0x1b0] ss:$8 sps:$4 sm:$0xff]  }
 0x27e   :  { %4506 = vmatmul.mubr.bf16.vlgmr.msra.gmra.mrb[0].mxu1 %v5309_v60  ;;  %v6599_v60 = vld [vmem:[#allocation10 + $0xce4] ss:$8 sps:$4 sm:$0xff]  }
 0x27f   :  { %4515 = vmatpush1.bf16.msra.mxu1 %v6511_v13  ;;  %4546 = vmatprep.mubr.bf16.mxu1 %v5312_v14  ;;  %v6602_v13 = vld [vmem:[#allocation10 + $0x1c4] ss:$8 sps:$4 sm:$0xff]   ;;  %v6597_v14 = vld [vmem:[#allocation10 + $0xce0] ss:$8 sps:$4 sm:$0xff]  }
 0x280   :  { %4516 = vmatprep.subr.bf16.mxu1 %v6519_v15  ;;  %4051 = vmatpush1.bf16.msra.mxu0 %v6514_v16  ;;  %v6605_v15 = vld [vmem:[#allocation10 + $0xcf4] ss:$8 sps:$4 sm:$0xff]   ;;  %v6600_v16 = vld [vmem:[#allocation10 + $0x1c0] ss:$8 sps:$4 sm:$0xff]  }
 0x281   :  { %4052 = vmatprep.subr.bf16.mxu0 %v6522_v17  ;;  %v6608_v17 = vld [vmem:[#allocation10 + $0x1d4] ss:$8 sps:$4 sm:$0xff]  }
 0x283   :  { %4517 = vmatpush1.bf16.msra.mxu1 %v6517_v20  ;;  %v6603_v20 = vld [vmem:[#allocation10 + $0xcf0] ss:$8 sps:$4 sm:$0xff]  }
 0x284   :  { %4518 = vmatprep.subr.bf16.mxu1 %v6525_v21  ;;  %4053 = vmatpush1.bf16.msra.mxu0 %v6520_v50  ;;  %v6613_v21 = vld [vmem:[#allocation10 + $0xd04] ss:$8 sps:$4 sm:$0xff]   ;;  %v7271_v50 = vld [vmem:[#allocation5 + $0x68] sm:$0xff] }
 0x285   :  { %4063 = vmatprep.subr.bf16.mxu0 %v6530_v22  ;;  %v6606_v22 = vld [vmem:[#allocation10 + $0x1d0] ss:$8 sps:$4 sm:$0xff]  }
 0x287   :  { %4519 = vmatpush1.bf16.msra.mxu1 %v6523_v24  ;;  %4055 = vmatmul.mubr.bf16.vlgmr.msra.gmra.mrb[8].mxu0 %v5287_v25  ;;  %v5311_v24 = vcombine.low %v7259_v57, %v7259_v57  ;;  %v6616_v25 = vld [vmem:[#allocation10 + $0x1e4] ss:$8 sps:$4 sm:$0xff]   ;;  %v6620_v57 = vld [vmem:[#allocation10 + $0x1f0] ss:$8 sps:$4 sm:$0xff]  }
 0x288   :  { %4520 = vmatprep.subr.bf16.mxu1 %v6533_v26  ;;  %4064 = vmatpush1.bf16.msra.mxu0 %v6528_v18  ;;  %v6611_v26 = vld [vmem:[#allocation10 + $0xd00] ss:$8 sps:$4 sm:$0xff]   ;;  %v5314_v18 = vcombine.high %v7271_v50, %v7271_v50 }
 0x289   :  { %4095 = vmatprep.mubr.bf16.mxu0 %v5290_v27  ;;  %4065 = vmatprep.subr.bf16.mxu0 %v6536_v19  ;;  %v6619_v27 = vld [vmem:[#allocation10 + $0xd14] ss:$8 sps:$4 sm:$0xff]   ;;  %v6614_v19 = vld [vmem:[#allocation10 + $0x1e0] ss:$8 sps:$4 sm:$0xff]  }
 0x28b   :  { %4521 = vmatpush1.bf16.msra.mxu1 %v6531_v29  ;;  %v6622_v29 = vld [vmem:[#allocation10 + $0x1f4] ss:$8 sps:$4 sm:$0xff]  }
 0x28c   :  { %4522 = vmatprep.subr.bf16.mxu1 %v6539_v30  ;;  %4066 = vmatpush1.bf16.msra.mxu0 %v6534_v31  ;;  %v6617_v30 = vld [vmem:[#allocation10 + $0xd10] ss:$8 sps:$4 sm:$0xff]   ;;  %v6625_v31 = vld [vmem:[#allocation10 + $0xd24] ss:$8 sps:$4 sm:$0xff]  }
 0x28d   :  { %4067 = vmatprep.subr.bf16.mxu0 %v6542_v32  ;;  %v6630_v32 = vld [vmem:[#allocation10 + $0x204] ss:$8 sps:$4 sm:$0xff]  }
 0x28f   :  { %4523 = vmatpush1.bf16.msra.mxu1 %v6537_v10  ;;  %v7277_v10 = vld [vmem:[#allocation5 + $0x10] sm:$0xff] }
 0x290   :  { %4524 = vmatprep.subr.bf16.mxu1 %v6545_v33  ;;  %4068 = vmatpush1.bf16.msra.mxu0 %v6540_v34  ;;  %v6623_v33 = vld [vmem:[#allocation10 + $0xd20] ss:$8 sps:$4 sm:$0xff]   ;;  %v5289_v34 = vcombine.low %v7265_v23, %v7265_v23 }
 0x291   :  { %4069 = vmatprep.subr.bf16.mxu0 %v6548_v35  ;;  %v6633_v35 = vld [vmem:[#allocation10 + $0xd34] ss:$8 sps:$4 sm:$0xff]   ;;  %v6637_v23 = vld [vmem:[#allocation10 + $0xd40] ss:$8 sps:$4 sm:$0xff]  }
 0x293   :  { %4525 = vmatpush1.bf16.msra.mxu1 %v6543_v36  ;;  %v6628_v36 = vld [vmem:[#allocation10 + $0x200] ss:$8 sps:$4 sm:$0xff]  }
 0x294   :  { %4526 = vmatprep.subr.bf16.mxu1 %v6551_v37  ;;  %4070 = vmatpush1.bf16.msra.mxu0 %v6546_v38  ;;  %v5292_v37 = vcombine.high %v7277_v10, %v7277_v10  ;;  %v6636_v38 = vld [vmem:[#allocation10 + $0x214] ss:$8 sps:$4 sm:$0xff]  }
 0x295   :  { %4071 = vmatprep.subr.bf16.mxu0 %v6554_v39  ;;  %v6631_v39 = vld [vmem:[#allocation10 + $0xd30] ss:$8 sps:$4 sm:$0xff]  }
 0x297   :  { %4527 = vmatpush1.bf16.msra.mxu1 %v6549_v40  ;;  %v6639_v40 = vld [vmem:[#allocation10 + $0xd44] ss:$8 sps:$4 sm:$0xff]  }
 0x298   :  { %4528 = vmatprep.subr.bf16.mxu1 %v6557_v42  ;;  %4072 = vmatpush1.bf16.msra.mxu0 %v6552_v43  ;;  %v6634_v42 = vld [vmem:[#allocation10 + $0x210] ss:$8 sps:$4 sm:$0xff]   ;;  %v6642_v43 = vld [vmem:[#allocation10 + $0x224] ss:$8 sps:$4 sm:$0xff]  }
 0x299   :  { %4073 = vmatprep.subr.bf16.mxu0 %v6560_v45  ;;  %v6645_v45 = vld [vmem:[#allocation10 + $0xd54] ss:$8 sps:$4 sm:$0xff]  }
 0x29b   :  { %4529 = vmatpush1.bf16.msra.mxu1 %v6555_v46  ;;  %v6640_v46 = vld [vmem:[#allocation10 + $0x220] ss:$8 sps:$4 sm:$0xff]  }
 0x29c   :  { %4530 = vmatprep.subr.bf16.mxu1 %v6563_v47  ;;  %4074 = vmatpush1.bf16.msra.mxu0 %v6558_v48  ;;  %v6648_v47 = vld [vmem:[#allocation10 + $0x234] ss:$8 sps:$4 sm:$0xff]   ;;  %v6643_v48 = vld [vmem:[#allocation10 + $0xd50] ss:$8 sps:$4 sm:$0xff]  }
 0x29d   :  { %4075 = vmatprep.subr.bf16.mxu0 %v6566_v49  ;;  %v6651_v49 = vld [vmem:[#allocation10 + $0xd64] ss:$8 sps:$4 sm:$0xff]  }
 0x29f   :  { %4531 = vmatpush1.bf16.msra.mxu1 %v6561_v52  ;;  %v6646_v52 = vld [vmem:[#allocation10 + $0x230] ss:$8 sps:$4 sm:$0xff]  }
 0x2a0   :  { %4532 = vmatprep.subr.bf16.mxu1 %v6569_v55  ;;  %4076 = vmatpush1.bf16.msra.mxu0 %v6564_v56  ;;  %v6654_v55 = vld [vmem:[#allocation10 + $0x244] ss:$8 sps:$4 sm:$0xff]   ;;  %v6649_v56 = vld [vmem:[#allocation10 + $0xd60] ss:$8 sps:$4 sm:$0xff]  }
 0x2a1   :  { %4077 = vmatprep.subr.bf16.mxu0 %v6572_v58  ;;  %v6657_v58 = vld [vmem:[#allocation10 + $0xd74] ss:$8 sps:$4 sm:$0xff]  }
 0x2a3   :  { %4533 = vmatpush1.bf16.msra.mxu1 %v6567_v59  ;;  %v6652_v59 = vld [vmem:[#allocation10 + $0x240] ss:$8 sps:$4 sm:$0xff]  }
 0x2a4   :  { %4534 = vmatprep.subr.bf16.mxu1 %v6575_v61  ;;  %4078 = vmatpush1.bf16.msra.mxu0 %v6570_v53  ;;  %v6660_v61 = vld [vmem:[#allocation10 + $0x254] ss:$8 sps:$4 sm:$0xff]   ;;  %v6655_v53 = vld [vmem:[#allocation10 + $0xd70] ss:$8 sps:$4 sm:$0xff]  }
 0x2a5   :  { %4079 = vmatprep.subr.bf16.mxu0 %v6578_v62  ;;  %v6663_v62 = vld [vmem:[#allocation10 + $0xd84] ss:$8 sps:$4 sm:$0xff]  }
 0x2a7   :  { %4535 = vmatpush1.bf16.msra.mxu1 %v6573_v63  ;;  %v6658_v63 = vld [vmem:[#allocation10 + $0x250] ss:$8 sps:$4 sm:$0xff]  }
 0x2a8   :  { %4536 = vmatprep.subr.bf16.mxu1 %v6581_v0  ;;  %4080 = vmatpush1.bf16.msra.mxu0 %v6576_v1  ;;  %v6666_v0 = vld [vmem:[#allocation10 + $0x264] ss:$8 sps:$4 sm:$0xff]   ;;  %v6661_v1 = vld [vmem:[#allocation10 + $0xd80] ss:$8 sps:$4 sm:$0xff]  }
 0x2a9   :  { %4081 = vmatprep.subr.bf16.mxu0 %v6584_v2  ;;  %v6669_v2 = vld [vmem:[#allocation10 + $0xd94] ss:$8 sps:$4 sm:$0xff]  }
 0x2ab   :  { %4537 = vmatpush1.bf16.msra.mxu1 %v6579_v28  ;;  %v6664_v28 = vld [vmem:[#allocation10 + $0x260] ss:$8 sps:$4 sm:$0xff]  }
 0x2ac   :  { %4538 = vmatprep.subr.bf16.mxu1 %v6587_v3  ;;  %4082 = vmatpush1.bf16.msra.mxu0 %v6582_v4  ;;  %v6672_v3 = vld [vmem:[#allocation10 + $0x274] ss:$8 sps:$4 sm:$0xff]   ;;  %v6667_v4 = vld [vmem:[#allocation10 + $0xd90] ss:$8 sps:$4 sm:$0xff]  }
 0x2ad   :  { %4083 = vmatprep.subr.bf16.mxu0 %v6590_v5  ;;  %v6675_v5 = vld [vmem:[#allocation10 + $0xda4] ss:$8 sps:$4 sm:$0xff]  }
 0x2af   :  { %4539 = vmatpush1.bf16.msra.mxu1 %v6585_v6  ;;  %v6670_v6 = vld [vmem:[#allocation10 + $0x270] ss:$8 sps:$4 sm:$0xff]  }
 0x2b0   :  { %4540 = vmatprep.subr.bf16.mxu1 %v6593_v7  ;;  %4084 = vmatpush1.bf16.msra.mxu0 %v6588_v8  ;;  %v6678_v7 = vld [vmem:[#allocation10 + $0x284] ss:$8 sps:$4 sm:$0xff]   ;;  %v6673_v8 = vld [vmem:[#allocation10 + $0xda0] ss:$8 sps:$4 sm:$0xff]  }
 0x2b1   :  { %4085 = vmatprep.subr.bf16.mxu0 %v6596_v9  ;;  %v6681_v9 = vld [vmem:[#allocation10 + $0xdb4] ss:$8 sps:$4 sm:$0xff]  }
 0x2b3   :  { %4541 = vmatpush1.bf16.msra.mxu1 %v6591_v11  ;;  %v6676_v11 = vld [vmem:[#allocation10 + $0x280] ss:$8 sps:$4 sm:$0xff]  }
 0x2b4   :  { %4542 = vmatprep.subr.bf16.mxu1 %v6599_v60  ;;  %4086 = vmatpush1.bf16.msra.mxu0 %v6594_v12  ;;  %v6684_v60 = vld [vmem:[#allocation10 + $0x294] ss:$8 sps:$4 sm:$0xff]   ;;  %v6679_v12 = vld [vmem:[#allocation10 + $0xdb0] ss:$8 sps:$4 sm:$0xff]  }
 0x2b5   :  { %4087 = vmatprep.subr.bf16.mxu0 %v6602_v13  ;;  %v6687_v13 = vld [vmem:[#allocation10 + $0xdc4] ss:$8 sps:$4 sm:$0xff]  }
 0x2b7   :  { %4543 = vmatpush1.bf16.msra.mxu1 %v6597_v14  ;;  %v6682_v14 = vld [vmem:[#allocation10 + $0x290] ss:$8 sps:$4 sm:$0xff]  }
 0x2b8   :  { %4544 = vmatprep.subr.bf16.mxu1 %v6605_v15  ;;  %4088 = vmatpush1.bf16.msra.mxu0 %v6600_v16  ;;  %v6690_v15 = vld [vmem:[#allocation10 + $0x2a4] ss:$8 sps:$4 sm:$0xff]   ;;  %v6685_v16 = vld [vmem:[#allocation10 + $0xdc0] ss:$8 sps:$4 sm:$0xff]  }
 0x2b9   :  { %4089 = vmatprep.subr.bf16.mxu0 %v6608_v17  ;;  %v6693_v17 = vld [vmem:[#allocation10 + $0xdd4] ss:$8 sps:$4 sm:$0xff]  }
 0x2bb   :  { %4545 = vmatpush1.bf16.msra.mxu1 %v6603_v20  ;;  %v6688_v20 = vld [vmem:[#allocation10 + $0x2a0] ss:$8 sps:$4 sm:$0xff]  }
 0x2bc   :  { %4555 = vmatprep.subr.bf16.mxu1 %v6613_v21  ;;  %4090 = vmatpush1.bf16.msra.mxu0 %v6606_v22  ;;  %v6696_v21 = vld [vmem:[#allocation10 + $0x2b4] ss:$8 sps:$4 sm:$0xff]   ;;  %v6691_v22 = vld [vmem:[#allocation10 + $0xdd0] ss:$8 sps:$4 sm:$0xff]  }
 0x2bd   :  { %4091 = vmatprep.subr.bf16.mxu0 %v6616_v25  ;;  %v6694_v25 = vld [vmem:[#allocation10 + $0x2b0] ss:$8 sps:$4 sm:$0xff]  }
 0x2be   :  { %4547 = vmatmul.mubr.bf16.vlgmr.msra.gmra.mrb[0].mxu1 %v5311_v24  ;;  %v6699_v24 = vld [vmem:[#allocation10 + $0xde4] ss:$8 sps:$4 sm:$0xff]  }
 0x2bf   :  { %4556 = vmatpush1.bf16.msra.mxu1 %v6611_v26  ;;  %4587 = vmatprep.mubr.bf16.mxu1 %v5314_v18  ;;  %v6702_v26 = vld [vmem:[#allocation10 + $0x2c4] ss:$8 sps:$4 sm:$0xff]   ;;  %v6697_v18 = vld [vmem:[#allocation10 + $0xde0] ss:$8 sps:$4 sm:$0xff]  }
 0x2c0   :  { %4557 = vmatprep.subr.bf16.mxu1 %v6619_v27  ;;  %4092 = vmatpush1.bf16.msra.mxu0 %v6614_v19  ;;  %v6705_v27 = vld [vmem:[#allocation10 + $0xdf4] ss:$8 sps:$4 sm:$0xff]   ;;  %v6700_v19 = vld [vmem:[#allocation10 + $0x2c0] ss:$8 sps:$4 sm:$0xff]  }
 0x2c1   :  { %4093 = vmatprep.subr.bf16.mxu0 %v6622_v29  ;;  %v6708_v29 = vld [vmem:[#allocation10 + $0x2d4] ss:$8 sps:$4 sm:$0xff]  }
 0x2c3   :  { %4558 = vmatpush1.bf16.msra.mxu1 %v6617_v30  ;;  %v6703_v30 = vld [vmem:[#allocation10 + $0xdf0] ss:$8 sps:$4 sm:$0xff]  }
 0x2c4   :  { %4559 = vmatprep.subr.bf16.mxu1 %v6625_v31  ;;  %4094 = vmatpush1.bf16.msra.mxu0 %v6620_v57  ;;  %v6706_v31 = vld [vmem:[#allocation10 + $0x2d0] ss:$8 sps:$4 sm:$0xff]   ;;  %v5313_v57 = vcombine.low %v7271_v50, %v7271_v50 }
 0x2c5   :  { %4104 = vmatprep.subr.bf16.mxu0 %v6630_v32  ;;  %v6713_v32 = vld [vmem:[#allocation10 + $0x2e4] ss:$8 sps:$4 sm:$0xff]  }
 0x2c7   :  { %4560 = vmatpush1.bf16.msra.mxu1 %v6623_v33  ;;  %4096 = vmatmul.mubr.bf16.vlgmr.msra.gmra.mrb[8].mxu0 %v5289_v34  ;;  %v6711_v33 = vld [vmem:[#allocation10 + $0x2e0] ss:$8 sps:$4 sm:$0xff]   ;;  %v6716_v34 = vld [vmem:[#allocation10 + $0x2f4] ss:$8 sps:$4 sm:$0xff]  }
 0x2c8   :  { %4561 = vmatprep.subr.bf16.mxu1 %v6633_v35  ;;  %4105 = vmatpush1.bf16.msra.mxu0 %v6628_v36  ;;  %v6714_v35 = vld [vmem:[#allocation10 + $0x2f0] ss:$8 sps:$4 sm:$0xff]   ;;  %v6721_v36 = vld [vmem:[#allocation10 + $0x304] ss:$8 sps:$4 sm:$0xff]  }
 0x2c9   :  { %4136 = vmatprep.mubr.bf16.mxu0 %v5292_v37  ;;  %4106 = vmatprep.subr.bf16.mxu0 %v6636_v38  ;;  %v7285_v37 = vld [vmem:[#allocation5 + $0x18] sm:$0xff]  ;;  %v5291_v38 = vcombine.low %v7277_v10, %v7277_v10 }
 0x2ca   :  { %v5294_v50 = vcombine.high %v7285_v37, %v7285_v37  ;;  %v6733_v10 = vld [vmem:[#allocation10 + $0x344] ss:$8 sps:$4 sm:$0xff]  }
 0x2cb   :  { %4562 = vmatpush1.bf16.msra.mxu1 %v6631_v39  ;;  %v6719_v39 = vld [vmem:[#allocation10 + $0x300] ss:$8 sps:$4 sm:$0xff]  }
 0x2cc   :  { %4563 = vmatprep.subr.bf16.mxu1 %v6639_v40  ;;  %4107 = vmatpush1.bf16.msra.mxu0 %v6634_v42  ;;  %v6724_v40 = vld [vmem:[#allocation10 + $0x314] ss:$8 sps:$4 sm:$0xff]   ;;  %v6722_v42 = vld [vmem:[#allocation10 + $0x310] ss:$8 sps:$4 sm:$0xff]  }
 0x2cd   :  { %4108 = vmatprep.subr.bf16.mxu0 %v6642_v43  ;;  %v6727_v43 = vld [vmem:[#allocation10 + $0x324] ss:$8 sps:$4 sm:$0xff]  }
 0x2cf   :  { %4564 = vmatpush1.bf16.msra.mxu1 %v6637_v23  ;;  %v6725_v23 = vld [vmem:[#allocation10 + $0x320] ss:$8 sps:$4 sm:$0xff]  }
 0x2d0   :  { %4565 = vmatprep.subr.bf16.mxu1 %v6645_v45  ;;  %4109 = vmatpush1.bf16.msra.mxu0 %v6640_v46  ;;  %v6730_v45 = vld [vmem:[#allocation10 + $0x334] ss:$8 sps:$4 sm:$0xff]   ;;  %v6728_v46 = vld [vmem:[#allocation10 + $0x330] ss:$8 sps:$4 sm:$0xff]  }
 0x2d1   :  { %4110 = vmatprep.subr.bf16.mxu0 %v6648_v47  ;;  %v6731_v47 = vld [vmem:[#allocation10 + $0x340] ss:$8 sps:$4 sm:$0xff]  }
 0x2d3   :  { %4566 = vmatpush1.bf16.msra.mxu1 %v6643_v48  ;;  %v122_v48 = vld [vmem:[#allocation13 + $0x1] ss:$8 sm:$0x3] }
 0x2d4   :  { %4567 = vmatprep.subr.bf16.mxu1 %v6651_v49  ;;  %4111 = vmatpush1.bf16.msra.mxu0 %v6646_v52  ;;  %v6736_v49 = vld [vmem:[#allocation10 + $0x354] ss:$8 sps:$4 sm:$0xff]   ;;  %v950_v52 = vrot.slane %v122_v48, %v7227_v41 }
 0x2d5   :  { %4112 = vmatprep.subr.bf16.mxu0 %v6654_v55  ;;  %v6734_v55 = vld [vmem:[#allocation10 + $0x350] ss:$8 sps:$4 sm:$0xff]  }
 0x2d7   :  { %4568 = vmatpush1.bf16.msra.mxu1 %v6649_v56  ;;  %v954_v56 = vrot.slane %v122_v48, %v7229_v44 }
 0x2d8   :  { %4569 = vmatprep.subr.bf16.mxu1 %v6657_v58  ;;  %4113 = vmatpush1.bf16.msra.mxu0 %v6652_v59  ;;  %v6739_v58 = vld [vmem:[#allocation10 + $0x364] ss:$8 sps:$4 sm:$0xff]  }
 0x2d9   :  { %4114 = vmatprep.subr.bf16.mxu0 %v6660_v61 }
 0x2db   :  { %4570 = vmatpush1.bf16.msra.mxu1 %v6655_v53 }
 0x2dc   :  { %4571 = vmatprep.subr.bf16.mxu1 %v6663_v62  ;;  %4115 = vmatpush1.bf16.msra.mxu0 %v6658_v63 }
 0x2dd   :  { %4116 = vmatprep.subr.bf16.mxu0 %v6666_v0  ;;  %v6737_v0 = vld [vmem:[#allocation10 + $0x360] ss:$8 sps:$4 sm:$0xff]  }
 0x2df   :  { %4572 = vmatpush1.bf16.msra.mxu1 %v6661_v1 }
 0x2e0   :  { %4573 = vmatprep.subr.bf16.mxu1 %v6669_v2  ;;  %4117 = vmatpush1.bf16.msra.mxu0 %v6664_v28  ;;  %v6742_v2 = vld [vmem:[#allocation10 + $0x374] ss:$8 sps:$4 sm:$0xff]  }
 0x2e1   :  { %4118 = vmatprep.subr.bf16.mxu0 %v6672_v3 }
 0x2e3   :  { %4574 = vmatpush1.bf16.msra.mxu1 %v6667_v4  ;;  %v6740_v4 = vld [vmem:[#allocation10 + $0x370] ss:$8 sps:$4 sm:$0xff]  }
 0x2e4   :  { %4575 = vmatprep.subr.bf16.mxu1 %v6675_v5  ;;  %4119 = vmatpush1.bf16.msra.mxu0 %v6670_v6  ;;  %v6745_v6 = vld [vmem:[#allocation10 + $0x384] ss:$8 sps:$4 sm:$0xff]  }
 0x2e5   :  { %4120 = vmatprep.subr.bf16.mxu0 %v6678_v7  ;;  %v6743_v7 = vld [vmem:[#allocation10 + $0x380] ss:$8 sps:$4 sm:$0xff]  }
 0x2e7   :  { %4576 = vmatpush1.bf16.msra.mxu1 %v6673_v8  ;;  %v6748_v8 = vld [vmem:[#allocation10 + $0x394] ss:$8 sps:$4 sm:$0xff]  }
 0x2e8   :  { %4577 = vmatprep.subr.bf16.mxu1 %v6681_v9  ;;  %4121 = vmatpush1.bf16.msra.mxu0 %v6676_v11  ;;  %v6746_v9 = vld [vmem:[#allocation10 + $0x390] ss:$8 sps:$4 sm:$0xff]   ;;  %v6749_v11 = vld [vmem:[#allocation10 + $0x3a0] ss:$8 sps:$4 sm:$0xff]  }
 0x2e9   :  { %4122 = vmatprep.subr.bf16.mxu0 %v6684_v60  ;;  %v6752_v60 = vld [vmem:[#allocation10 + $0x3b0] ss:$8 sps:$4 sm:$0xff]  }
 0x2eb   :  { %4578 = vmatpush1.bf16.msra.mxu1 %v6679_v12  ;;  %v6757_v12 = vld [vmem:[#allocation10 + $0x3c4] ss:$8 sps:$4 sm:$0xff]  }
 0x2ec   :  { %4579 = vmatprep.subr.bf16.mxu1 %v6687_v13  ;;  %4123 = vmatpush1.bf16.msra.mxu0 %v6682_v14  ;;  %v6755_v13 = vld [vmem:[#allocation10 + $0x3c0] ss:$8 sps:$4 sm:$0xff]   ;;  %v6760_v14 = vld [vmem:[#allocation10 + $0x3d4] ss:$8 sps:$4 sm:$0xff]  }
 0x2ed   :  { %4124 = vmatprep.subr.bf16.mxu0 %v6690_v15  ;;  %v6758_v15 = vld [vmem:[#allocation10 + $0x3d0] ss:$8 sps:$4 sm:$0xff]  }
 0x2ef   :  { %4580 = vmatpush1.bf16.msra.mxu1 %v6685_v16  ;;  %v6763_v16 = vld [vmem:[#allocation10 + $0x3e4] ss:$8 sps:$4 sm:$0xff]  }
 0x2f0   :  { %4581 = vmatprep.subr.bf16.mxu1 %v6693_v17  ;;  %4125 = vmatpush1.bf16.msra.mxu0 %v6688_v20  ;;  %v6761_v17 = vld [vmem:[#allocation10 + $0x3e0] ss:$8 sps:$4 sm:$0xff]   ;;  %v6766_v20 = vld [vmem:[#allocation10 + $0x3f4] ss:$8 sps:$4 sm:$0xff]  }
 0x2f1   :  { %4126 = vmatprep.subr.bf16.mxu0 %v6696_v21  ;;  %v6764_v21 = vld [vmem:[#allocation10 + $0x3f0] ss:$8 sps:$4 sm:$0xff]  }
 0x2f3   :  { %4582 = vmatpush1.bf16.msra.mxu1 %v6691_v22  ;;  %v5293_v22 = vcombine.low %v7285_v37, %v7285_v37  ;;  %v6790_v37 = vld [vmem:[#allocation11 + $0x70] ss:$8 sps:$4 sm:$0xff]  }
 0x2f4   :  { %4583 = vmatprep.subr.bf16.mxu1 %v6699_v24  ;;  %4127 = vmatpush1.bf16.msra.mxu0 %v6694_v25  ;;  %v6769_v24 = vld [vmem:[#allocation11] ss:$8 sps:$4 sm:$0xff]   ;;  %v6771_v25 = vld [vmem:[#allocation11 + $0x4] ss:$8 sps:$4 sm:$0xff]  }
 0x2f5   :  { %4128 = vmatprep.subr.bf16.mxu0 %v6702_v26  ;;  %v6774_v26 = vld [vmem:[#allocation11 + $0x14] ss:$8 sps:$4 sm:$0xff]  }
 0x2f7   :  { %4584 = vmatpush1.bf16.msra.mxu1 %v6697_v18  ;;  %v6772_v18 = vld [vmem:[#allocation11 + $0x10] ss:$8 sps:$4 sm:$0xff]  }
 0x2f8   :  { %4585 = vmatprep.subr.bf16.mxu1 %v6705_v27  ;;  %4129 = vmatpush1.bf16.msra.mxu0 %v6700_v19  ;;  %v6777_v27 = vld [vmem:[#allocation11 + $0x24] ss:$8 sps:$4 sm:$0xff]   ;;  %v6775_v19 = vld [vmem:[#allocation11 + $0x20] ss:$8 sps:$4 sm:$0xff]  }
 0x2f9   :  { %4130 = vmatprep.subr.bf16.mxu0 %v6708_v29  ;;  %v6780_v29 = vld [vmem:[#allocation11 + $0x34] ss:$8 sps:$4 sm:$0xff]  }
 0x2fb   :  { %4586 = vmatpush1.bf16.msra.mxu1 %v6703_v30  ;;  %v6778_v30 = vld [vmem:[#allocation11 + $0x30] ss:$8 sps:$4 sm:$0xff]  }
 0x2fc   :  { %4131 = vmatpush1.bf16.msra.mxu0 %v6706_v31  ;;  %v6783_v31 = vld [vmem:[#allocation11 + $0x44] ss:$8 sps:$4 sm:$0xff]  }
 0x2fd   :  { %4132 = vmatprep.subr.bf16.mxu0 %v6713_v32  ;;  %v6786_v32 = vld [vmem:[#allocation11 + $0x54] ss:$8 sps:$4 sm:$0xff]  }
 0x2fe   :  { %4588 = vmatmul.mubr.bf16.vlgmr.msra.gmra.mrb[0].mxu1 %v5313_v57  ;;  %v6781_v57 = vld [vmem:[#allocation11 + $0x40] ss:$8 sps:$4 sm:$0xff]  }
 0x300   :  { %4133 = vmatpush1.bf16.msra.mxu0 %v6711_v33  ;;  %v6784_v33 = vld [vmem:[#allocation11 + $0x50] ss:$8 sps:$4 sm:$0xff]  }
 0x301   :  { %4134 = vmatprep.subr.bf16.mxu0 %v6716_v34  ;;  %v6789_v34 = vld [vmem:[#allocation11 + $0x64] ss:$8 sps:$4 sm:$0xff]  }
 0x304   :  { %4135 = vmatpush1.bf16.msra.mxu0 %v6714_v35  ;;  %v6787_v35 = vld [vmem:[#allocation11 + $0x60] ss:$8 sps:$4 sm:$0xff]  }
 0x305   :  { %4145 = vmatprep.subr.bf16.mxu0 %v6721_v36  ;;  %v6792_v36 = vld [vmem:[#allocation11 + $0x74] ss:$8 sps:$4 sm:$0xff]  }
 0x307   :  { %4137 = vmatmul.mubr.bf16.vlgmr.msra.gmra.mrb[8].mxu0 %v5291_v38  ;;  %v6795_v38 = vld [vmem:[#allocation11 + $0x84] ss:$8 sps:$4 sm:$0xff]  }
 0x308   :  { %4146 = vmatpush1.bf16.msra.mxu0 %v6719_v39  ;;  %4177 = vmatprep.mubr.bf16.mxu0 %v5294_v50 }
 0x309   :  { %4147 = vmatprep.subr.bf16.mxu0 %v6724_v40  ;;  %v6793_v40 = vld [vmem:[#allocation11 + $0x80] ss:$8 sps:$4 sm:$0xff]  }
 0x30c   :  { %4148 = vmatpush1.bf16.msra.mxu0 %v6722_v42  ;;  %v6798_v42 = vld [vmem:[#allocation11 + $0x94] ss:$8 sps:$4 sm:$0xff]  }
 0x30d   :  { %4149 = vmatprep.subr.bf16.mxu0 %v6727_v43 }
 0x310   :  { %4150 = vmatpush1.bf16.msra.mxu0 %v6725_v23 }
 0x311   :  { %4151 = vmatprep.subr.bf16.mxu0 %v6730_v45 }
 0x314   :  { %4152 = vmatpush1.bf16.msra.mxu0 %v6728_v46 }
 0x315   :  { %4153 = vmatprep.subr.bf16.mxu0 %v6733_v10  ;;  %v6796_v10 = vld [vmem:[#allocation11 + $0x90] ss:$8 sps:$4 sm:$0xff]  }
 0x318   :  { %4154 = vmatpush1.bf16.msra.mxu0 %v6731_v47  ;;  %v6801_v47 = vld [vmem:[#allocation11 + $0xa4] ss:$8 sps:$4 sm:$0xff]  }
 0x319   :  { %4155 = vmatprep.subr.bf16.mxu0 %v6736_v49  ;;  %v6799_v49 = vld [vmem:[#allocation11 + $0xa0] ss:$8 sps:$4 sm:$0xff]  }
 0x31a   :  { %v1151_v59 = vpop.f32.mrb[4].mxu0 }
 0x31b   :  { %v1152_v61 = vadd.f32 %v1151_v59, %v950_v52  ;;  %v1153_v53 = vpop.f32.mrb[5].mxu0  ;;  %v6804_v52 = vld [vmem:[#allocation11 + $0xb4] ss:$8 sps:$4 sm:$0xff]  }
 0x31c   :  { %v1154_v62 = vadd.f32 %v1153_v53, %v954_v56  ;;  %4156 = vmatpush1.bf16.msra.mxu0 %v6734_v55  ;;  %v1155_v63 = vpop.f32.mrb[6].mxu0  ;;  %v6802_v55 = vld [vmem:[#allocation11 + $0xb0] ss:$8 sps:$4 sm:$0xff]   ;;  %v6807_v56 = vld [vmem:[#allocation11 + $0xc4] ss:$8 sps:$4 sm:$0xff]  }
 0x31d   :  { %v1156_v1 = vpop.f32.mrb[7].mxu0  ;;  %4157 = vmatprep.subr.bf16.mxu0 %v6739_v58  ;;  %v7294_v28 = vadd.f32 %v7233_v51, %v1152_v61  ;;  %v6751_v51 = vld [vmem:[#allocation10 + $0x3a4] ss:$8 sps:$4 sm:$0xff]   ;;  %v6805_v58 = vld [vmem:[#allocation11 + $0xc0] ss:$8 sps:$4 sm:$0xff]  }
 0x31e   :  { %v7297_v3 = vadd.f32 %v7235_v54, %v1154_v62  ;;  %v6754_v54 = vld [vmem:[#allocation10 + $0x3b4] ss:$8 sps:$4 sm:$0xff]   ;;  %v6808_v61 = vld [vmem:[#allocation11 + $0xd0] ss:$8 sps:$4 sm:$0xff]   ;;  %v6813_v53 = vld [vmem:[#allocation11 + $0xe4] ss:$8 sps:$4 sm:$0xff]  }
 0x31f   :  { %v6810_v59 = vld [vmem:[#allocation11 + $0xd4] ss:$8 sps:$4 sm:$0xff]   ;;  %v6811_v62 = vld [vmem:[#allocation11 + $0xe0] ss:$8 sps:$4 sm:$0xff]  }
 0x320   :  { %4158 = vmatpush1.bf16.msra.mxu0 %v6737_v0  ;;  %v1160_v5 = vadd.f32 %v7297_v3, %v7294_v28  ;;  %v6816_v63 = vld [vmem:[#allocation11 + $0xf4] ss:$8 sps:$4 sm:$0xff]   ;;  %v6814_v0 = vld [vmem:[#allocation11 + $0xf0] ss:$8 sps:$4 sm:$0xff]  }
 0x321   :  { %4159 = vmatprep.subr.bf16.mxu0 %v6742_v2 }
 0x322   :  { %1161 = vadd.xlane.f32.xlu0 %v1160_v5 }
 0x324   :  { %4160 = vmatpush1.bf16.msra.mxu0 %v6740_v4  ;;  %v1218_v4 = vld [vmem:[#allocation13 + $0x4] ss:$8 sm:$0x3] }
 0x325   :  { %4161 = vmatprep.subr.bf16.mxu0 %v6745_v6  ;;  %v1677_v5 = vrot.slane %v1218_v4, %v7227_v41  ;;  %v1681_v6 = vrot.slane %v1218_v4, %v7229_v44 }
 0x328   :  { %4162 = vmatpush1.bf16.msra.mxu0 %v6743_v7 }
 0x329   :  { %4163 = vmatprep.subr.bf16.mxu0 %v6748_v8 }
 0x32c   :  { %4164 = vmatpush1.bf16.msra.mxu0 %v6746_v9 }
 0x32d   :  { %4165 = vmatprep.subr.bf16.mxu0 %v6751_v51 }
 0x330   :  { %4166 = vmatpush1.bf16.msra.mxu0 %v6749_v11 }
 0x331   :  { %4167 = vmatprep.subr.bf16.mxu0 %v6754_v54 }
 0x334   :  { %4168 = vmatpush1.bf16.msra.mxu0 %v6752_v60 }
 0x335   :  { %4169 = vmatprep.subr.bf16.mxu0 %v6757_v12 }
 0x338   :  { %4170 = vmatpush1.bf16.msra.mxu0 %v6755_v13 }
 0x339   :  { %4171 = vmatprep.subr.bf16.mxu0 %v6760_v14 }
 0x33c   :  { %4172 = vmatpush1.bf16.msra.mxu0 %v6758_v15 }
 0x33d   :  { %4173 = vmatprep.subr.bf16.mxu0 %v6763_v16 }
 0x340   :  { %4174 = vmatpush1.bf16.msra.mxu0 %v6761_v17 }
 0x341   :  { %4175 = vmatprep.subr.bf16.mxu0 %v6766_v20 }
 0x344   :  { %4176 = vmatpush1.bf16.msra.mxu0 %v6764_v21 }
 0x345   :  { %4855 = vmatprep.subr.bf16.mxu0 %v6771_v25 }
 0x347   :  { %4178 = vmatmul.mubr.bf16.vlgmr.msra.gmra.mrb[8].mxu0 %v5293_v22 }
 0x348   :  { %4856 = vmatpush1.bf16.msra.mxu0 %v6769_v24 }
 0x349   :  { %4857 = vmatprep.subr.bf16.mxu0 %v6774_v26 }
 0x34c   :  { %4858 = vmatpush1.bf16.msra.mxu0 %v6772_v18 }
 0x34d   :  { %4859 = vmatprep.subr.bf16.mxu0 %v6777_v27 }
 0x350   :  { %4860 = vmatpush1.bf16.msra.mxu0 %v6775_v19 }
 0x351   :  { %4861 = vmatprep.subr.bf16.mxu0 %v6780_v29 }
 0x354   :  { %4862 = vmatpush1.bf16.msra.mxu0 %v6778_v30 }
 0x355   :  { %4863 = vmatprep.subr.bf16.mxu0 %v6783_v31 }
 0x358   :  { %4864 = vmatpush1.bf16.msra.mxu0 %v6781_v57 }
 0x359   :  { %4865 = vmatprep.subr.bf16.mxu0 %v6786_v32 }
 0x35c   :  { %4866 = vmatpush1.bf16.msra.mxu0 %v6784_v33 }
 0x35d   :  { %4867 = vmatprep.subr.bf16.mxu0 %v6789_v34 }
 0x360   :  { %4868 = vmatpush1.bf16.msra.mxu0 %v6787_v35 }
 0x361   :  { %4869 = vmatprep.subr.bf16.mxu0 %v6792_v36 }
 0x364   :  { %4870 = vmatpush1.bf16.msra.mxu0 %v6790_v37 }
 0x365   :  { %4871 = vmatprep.subr.bf16.mxu0 %v6795_v38 }
 0x368   :  { %4872 = vmatpush1.bf16.msra.mxu0 %v6793_v40 }
 0x369   :  { %4873 = vmatprep.subr.bf16.mxu0 %v6798_v42 }
 0x36c   :  { %4874 = vmatpush1.bf16.msra.mxu0 %v6796_v10 }
 0x36d   :  { %4875 = vmatprep.subr.bf16.mxu0 %v6801_v47 }
 0x370   :  { %4876 = vmatpush1.bf16.msra.mxu0 %v6799_v49 }
 0x371   :  { %4877 = vmatprep.subr.bf16.mxu0 %v6804_v52 }
 0x374   :  { %4878 = vmatpush1.bf16.msra.mxu0 %v6802_v55 }
 0x375   :  { %4879 = vmatprep.subr.bf16.mxu0 %v6807_v56 }
 0x378   :  { %4880 = vmatpush1.bf16.msra.mxu0 %v6805_v58 }
 0x379   :  { %4881 = vmatprep.subr.bf16.mxu0 %v6810_v59 }
 0x37c   :  { %4882 = vmatpush1.bf16.msra.mxu0 %v6808_v61 }
 0x37d   :  { %4883 = vmatprep.subr.bf16.mxu0 %v6813_v53 }
 0x380   :  { %4884 = vmatpush1.bf16.msra.mxu0 %v6811_v62 }
 0x381   :  { %4885 = vmatprep.subr.bf16.mxu0 %v6816_v63 }
 0x384   :  { %4886 = vmatpush1.bf16.msra.mxu0 %v6814_v0 }
 0x3af   :  { %v1162_v39 = vpop.xlane.xlu0 %1161 }
 0x3b0   :  { %v1164_v50 = vmul.f32 0.00390625, %v1162_v39 }
 0x3b2   :  { %v7304_v43 = vsub.f32 %v7294_v28, %v1164_v50  ;;  %v7307_v23 = vsub.f32 %v7297_v3, %v1164_v50 }
 0x3b4   :  { %v1167_v45 = vmul.f32 %v7304_v43, %v7304_v43  ;;  %v1168_v46 = vmul.f32 %v7307_v23, %v7307_v23 }
 0x3b6   :  { %v1169_v48 = vadd.f32 %v1168_v46, %v1167_v45 }
 0x3b8   :  { %1170 = vadd.xlane.f32.xlu1 %v1169_v48 }
 0x3d1   :  { %v4589_v1 = vpop.f32.mrb[0].mxu1 }
 0x3d2   :  { %v4591_v2 = vpop.f32.mrb[1].mxu1 }
 0x3d3   :  { %v4593_v28 = vpop.f32.mrb[2].mxu1 }
 0x3d4   :  { %v4594_v3 = vpop.f32.mrb[3].mxu1 }
 0x41a   :  { %v4179_v7 = vpop.f32.mrb[8].mxu0 }
 0x41b   :  { %v5797_v8 = vadd.f32 %v4179_v7, %v1677_v5  ;;  %v4181_v9 = vpop.f32.mrb[9].mxu0 }
 0x41c   :  { %v5799_v51 = vadd.f32 %v4181_v9, %v1681_v6  ;;  %v4183_v11 = vpop.f32.mrb[10].mxu0  ;;  %v124_v9 = vld [vmem:[#allocation13 + $0x2] ss:$8 sm:$0x3] }
 0x41d   :  { %v7315_v54 = vadd.f32 %v5797_v8, %v4589_v1  ;;  %v4184_v60 = vpop.f32.mrb[11].mxu0  ;;  %v126_v11 = vld [vmem:[#allocation13 + $0x3] ss:$8 sm:$0x3] }
 0x41e   :  { %v7317_v12 = vadd.f32 %v5799_v51, %v4591_v2  ;;  %v1181_v60 = vrot.slane %v124_v9, %v7227_v41 }
 0x41f   :  { %v4598_v13 = vmul.f32 0.70710677, %v7315_v54  ;;  %v4596_v2 = vmul.f32 0.5, %v7315_v54 }
 0x420   :  { %v4599_v14 = vmul.f32 0.70710677, %v7317_v12  ;;  %v4597_v4 = vmul.f32 0.5, %v7317_v12 }
 0x421   :  { %v4600_v15 = vand.u32 2147483647, %v4598_v13  ;;  %vm4640_vm2 = vcmp.lt.f32.partialorder %v4598_v13, 0.0  ;;  %v1185_v13 = vrot.slane %v124_v9, %v7229_v44 }
 0x422   :  { %v4601_v16 = vand.u32 2147483647, %v4599_v14  ;;  %vm4641_vm3 = vcmp.lt.f32.partialorder %v4599_v14, 0.0 }
 0x423   :  { %v4602_v17 = vmul.f32 0.3275911, %v4600_v15  ;;  %v4628_v24 = vsub.f32 0.0, %v4600_v15 }
 0x424   :  { %v4603_v20 = vmul.f32 0.3275911, %v4601_v16  ;;  %v4629_v25 = vsub.f32 0.0, %v4601_v16 }
 0x425   :  { %v4604_v21 = vadd.f32 1.0, %v4602_v17  ;;  %v4630_v18 = vmul.f32 %v4628_v24, %v4600_v15  ;;  %v1198_v17 = vrot.slane %v126_v11, %v7229_v44 }
 0x426   :  { %v4605_v22 = vadd.f32 1.0, %v4603_v20  ;;  %v4631_v19 = vmul.f32 %v4629_v25, %v4601_v16  ;;  %v1194_v16 = vrot.slane %v126_v11, %v7227_v41 }
 0x427   :  { %6825 = vrcp.f32 %v4604_v21  ;;  %v4632_v57 = vmul.f32 1.442695, %v4630_v18 }
 0x428   :  { %6827 = vrcp.f32 %v4605_v22  ;;  %v4634_v33 = vmul.f32 1.442695, %v4631_v19 }
 0x429   :  { %6829 = vpow2.f32 %v4632_v57 }
 0x42a   :  { %6831 = vpow2.f32 %v4634_v33 }
 0x431   :  { %v6826_v26 = vpop.eup %6825 }
 0x432   :  { %v6828_v27 = vpop.eup %6827  ;;  %v4610_v29 = vmul.f32 1.0614054, %v6826_v26 }
 0x433   :  { %v4611_v30 = vmul.f32 1.0614054, %v6828_v27  ;;  %v6830_v48 = vpop.eup %6829 }
 0x434   :  { %v4612_v31 = vadd.f32 -1.4531521, %v4610_v29  ;;  %v6832_v52 = vpop.eup %6831 }
 0x435   :  { %v4613_v32 = vadd.f32 -1.4531521, %v4611_v30 }
 0x436   :  { %v4614_v34 = vmul.f32 %v6826_v26, %v4612_v31 }
 0x437   :  { %v4615_v35 = vmul.f32 %v6828_v27, %v4613_v32 }
 0x438   :  { %v4616_v36 = vadd.f32 1.4214138, %v4614_v34 }
 0x439   :  { %v4617_v37 = vadd.f32 1.4214138, %v4615_v35 }
 0x43a   :  { %v4618_v38 = vmul.f32 %v6826_v26, %v4616_v36 }
 0x43b   :  { %v4619_v39 = vmul.f32 %v6828_v27, %v4617_v37 }
 0x43c   :  { %v4620_v50 = vadd.f32 -0.28449672, %v4618_v38 }
 0x43d   :  { %v4621_v40 = vadd.f32 -0.28449672, %v4619_v39 }
 0x43e   :  { %v4622_v42 = vmul.f32 %v6826_v26, %v4620_v50 }
 0x43f   :  { %v4623_v45 = vmul.f32 %v6828_v27, %v4621_v40 }
 0x440   :  { %v4624_v46 = vadd.f32 0.2548296, %v4622_v42 }
 0x441   :  { %v4625_v10 = vadd.f32 0.2548296, %v4623_v45 }
 0x442   :  { %v4626_v47 = vmul.f32 %v6826_v26, %v4624_v46 }
 0x443   :  { %v4627_v49 = vmul.f32 %v6828_v27, %v4625_v10  ;;  %v1220_v27 = vld [vmem:[#allocation13 + $0x5] ss:$8 sm:$0x3] }
 0x444   :  { %v4636_v55 = vmul.f32 %v6830_v48, %v4626_v47  ;;  %v4688_v19 = vrot.slane %v1220_v27, %v7227_v41  ;;  %v4692_v29 = vrot.slane %v1220_v27, %v7229_v44  ;;  %v1222_v47 = vld [vmem:[#allocation13 + $0x6] ss:$8 sm:$0x3]  ;;  %v1224_v48 = vld [vmem:[#allocation13 + $0x7] ss:$8 sm:$0x3] }
 0x445   :  { %v1171_v56 = vpop.xlane.xlu1 %1170  ;;  %v4637_v58 = vmul.f32 %v6832_v52, %v4627_v49 }
 0x446   :  { %v1172_v59 = vmul.f32 0.00390625, %v1171_v56  ;;  %v4638_v61 = vsub.f32 1.0, %v4636_v55  ;;  %v4931_v55 = vrot.slane %v1224_v48, %v7227_v41  ;;  %v4935_v56 = vrot.slane %v1224_v48, %v7229_v44 }
 0x447   :  { %v4639_v53 = vsub.f32 1.0, %v4637_v58 }
 0x448   :  { %v1173_v62 = vadd.f32 1e-05, %v1172_v59  ;;  %v4642_v63 = vsub.f32 0.0, %v4638_v61 }
 0x449   :  { %v4643_v0 = vsub.f32 0.0, %v4639_v53 }
 0x44a   :  { %6833 = vrsqrt.f32 %v1173_v62  ;;  %v4644_v1 = vsel %vm4640_vm2, %v4642_v63, %v4638_v61 }
 0x44b   :  { %v4645_v28 = vsel %vm4641_vm3, %v4643_v0, %v4639_v53  ;;  %v4646_v3 = vadd.f32 1.0, %v4644_v1 }
 0x44c   :  { %v4647_v5 = vadd.f32 1.0, %v4645_v28 }
 0x44d   :  { %v4648_v6 = vmul.f32 %v4646_v3, %v4596_v2 }
 0x44e   :  { %v4649_v7 = vmul.f32 %v4647_v5, %v4597_v4 }
 0x44f   :  { %v4650_v51 = vpack.c.bf16 %v4648_v6, %v4648_v6 }
 0x450   :  { %v4651_v8 = vpack.c.bf16 %v4649_v7, %v4649_v7 }
 0x452   :  { %4887 = vmatprep.mubr.bf16.mxu0 %v4651_v8 }
 0x453   :  { %4888 = vmatmul.mubr.bf16.vlgmr.msra.gmra.mrb[12].mxu0 %v4650_v51 }
 0x454   :  { %v6834_v14 = vpop.eup %6833 }
 0x455   :  { %v1176_v15 = vmul.f32 %v6834_v14, %v7307_v23  ;;  %v1175_v20 = vmul.f32 %v6834_v14, %v7304_v43 }
 0x457   :  { %v1189_v21 = vmul.f32 %v1185_v13, %v1176_v15  ;;  %v1188_v22 = vmul.f32 %v1181_v60, %v1175_v20 }
 0x459   :  { %v1202_v24 = vadd.f32 %v1198_v17, %v1189_v21  ;;  %v1201_v25 = vadd.f32 %v1194_v16, %v1188_v22 }
 0x45b   :  { %v4941_v26 = vpack.c.bf16 %v1202_v24, %v1202_v24  ;;  %v4940_v18 = vpack.c.bf16 %v1201_v25, %v1201_v25 }
 0x45d   :  { %4944 = vmatprep.subr.bf16.mxu0 %v4941_v26 }
 0x45e   :  { %4945 = vmatpush1.bf16.xpose.msra.mxu0 %v4940_v18 }
 0x526   :  { %v4889_v23 = vpop.f32.mrb[12].mxu0 }
 0x527   :  { %v4890_v30 = vadd.f32 %v4889_v23, %v4688_v19  ;;  %v4891_v31 = vpop.f32.mrb[13].mxu0 }
 0x528   :  { %v4892_v57 = vadd.f32 %v4891_v31, %v4692_v29  ;;  %v4893_v32 = vpop.f32.mrb[14].mxu0 }
 0x529   :  { %v4896_v43 = vadd.f32 %v7315_v54, %v4890_v30  ;;  %v4894_v33 = vpop.f32.mrb[15].mxu0  ;;  %v4918_v54 = vrot.slane %v1222_v47, %v7227_v41 }
 0x52a   :  { %v4897_v34 = vadd.f32 %v7317_v12, %v4892_v57  ;;  %v4922_v12 = vrot.slane %v1222_v47, %v7229_v44 }
 0x52c   :  { %v4898_v35 = vadd.f32 %v4897_v34, %v4896_v43 }
 0x52e   :  { %4899 = vadd.xlane.f32.xlu0 %v4898_v35 }
 0x5bb   :  { %v4900_v36 = vpop.xlane.xlu0 %4899 }
 0x5bc   :  { %v4901_v37 = vmul.f32 0.00390625, %v4900_v36 }
 0x5be   :  { %v4902_v38 = vsub.f32 %v4896_v43, %v4901_v37  ;;  %v4903_v39 = vsub.f32 %v4897_v34, %v4901_v37 }
 0x5c0   :  { %v4904_v50 = vmul.f32 %v4902_v38, %v4902_v38  ;;  %v4905_v40 = vmul.f32 %v4903_v39, %v4903_v39 }
 0x5c2   :  { %v4906_v42 = vadd.f32 %v4905_v40, %v4904_v50 }
 0x5c4   :  { %4907 = vadd.xlane.f32.xlu1 %v4906_v42 }
 0x651   :  { %v4908_v45 = vpop.xlane.xlu1 %4907 }
 0x652   :  { %v4909_v46 = vmul.f32 0.00390625, %v4908_v45 }
 0x654   :  { %v4910_v10 = vadd.f32 1e-05, %v4909_v46 }
 0x656   :  { %6835 = vrsqrt.f32 %v4910_v10 }
 0x660   :  { %v6836_v49 = vpop.eup %6835 }
 0x661   :  { %v4913_v52 = vmul.f32 %v6836_v49, %v4903_v39  ;;  %v4912_v58 = vmul.f32 %v6836_v49, %v4902_v38 }
 0x663   :  { %v4926_v59 = vmul.f32 %v4922_v12, %v4913_v52  ;;  %v4925_v61 = vmul.f32 %v4918_v54, %v4912_v58 }
 0x665   :  { %v4939_v53 = vadd.f32 %v4935_v56, %v4926_v59  ;;  %v4938_v62 = vadd.f32 %v4931_v55, %v4925_v61 }
 0x667   :  { %v4943_v63 = vpack.c.bf16 %v4939_v53, %v4939_v53  ;;  %v4942_v0 = vpack.c.bf16 %v4938_v62, %v4938_v62 }
 0x669   :  { %4976 = vmatprep.mubr.bf16.mxu0 %v4943_v63  ;;  %4984 = vmatprep.subr.bf16.mxu0 %v4943_v63 }
 0x66a   :  { %4977 = vmatmul.mubr.bf16.vlgmr.msra.gmra.mrb[16].mxu0 %v4942_v0 }
 0x66b   :  { %4985 = vmatpush1.bf16.xpose.msra.mxu0 %v4942_v0  ;;  %5016 = vmatprep.mubr.bf16.mxu0 %v4943_v63 }
 0x66c   :  { %5024 = vmatprep.subr.bf16.mxu0 %v4941_v26 }
 0x672   :  { %5017 = vmatmul.mubr.bf16.vlgmr.msra.gmra.mrb[20].mxu0 %v4942_v0 }
 0x673   :  { %5025 = vmatpush1.bf16.xpose.msra.mxu0 %v4940_v18  ;;  %5056 = vmatprep.mubr.bf16.mxu0 %v4941_v26 }
 0x67e   :  { %5057 = vmatmul.mubr.bf16.vlgmr.msra.gmra.mrb[20].mxu0 %v4940_v18 }
 0x73d   :  { %v4978_v41 = vpop.f32.mrb[16].mxu0 }
 0x73e   :  { %v4980_v44 = vpop.f32.mrb[17].mxu0  ;;  %v5077_v1 = vsel %vm5065_vm4, %v4978_v41, -inf }
 0x73f   :  { %5078 = vmax.xlane.f32.xlu0 %v5077_v1  ;;  %v5089_v2 = vrot.slane %v5077_v1, 4  ;;  %v4981_v28 = vpop.f32.mrb[18].mxu0 }
 0x740   :  { %v4982_v3 = vpop.f32.mrb[19].mxu0 }
 0x741   :  { %v5090_v4 = vmax.f32 %v5077_v1, %v5089_v2 }
 0x743   :  { %v5091_v5 = vrot.slane %v5090_v4, 2 }
 0x745   :  { %v5092_v6 = vmax.f32 %v5090_v4, %v5091_v5 }
 0x747   :  { %v5093_v7 = vrot.slane %v5092_v6, 1 }
 0x749   :  { %v5094_v8 = vmax.f32 %v5092_v6, %v5093_v7 }
 0x74b   :  { %v5095_v9 = vsub.f32 %v4978_v41, %v5094_v8 }
 0x74d   :  { %v5096_v51 = vmul.f32 1.442695, %v5095_v9 }
 0x74f   :  { %6837 = vpow2.f32 %v5096_v51 }
 0x751   :  { %v5058_v11 = vpop.f32.mrb[20].mxu0 }
 0x752   :  { %v5064_v60 = vmul.f32 0.5, %v5058_v11  ;;  %v5060_v13 = vpop.f32.mrb[21].mxu0 }
 0x753   :  { %v5061_v14 = vpop.f32.mrb[22].mxu0 }
 0x754   :  { %v5062_v15 = vpop.f32.mrb[23].mxu0  ;;  %v5066_v16 = vsel %vm5065_vm4, %v5064_v60, -inf }
 0x755   :  { %5067 = vmax.xlane.f32.xlu1 %v5066_v16 }
 0x759   :  { %v6838_v17 = vpop.eup %6837 }
 0x75a   :  { %v5098_v20 = vsel %vm5065_vm4, %v6838_v17, 0.0 }
 0x75b   :  { %v5099_v21 = vrot.slane %v5098_v20, 4 }
 0x75d   :  { %v5100_v22 = vadd.f32 %v5099_v21, %v5098_v20 }
 0x75f   :  { %v5101_v24 = vrot.slane %v5100_v22, 2 }
 0x761   :  { %v5102_v25 = vadd.f32 %v5101_v24, %v5100_v22 }
 0x763   :  { %v5103_v26 = vrot.slane %v5102_v25, 1 }
 0x765   :  { %v5104_v18 = vadd.f32 %v5103_v26, %v5102_v25 }
 0x767   :  { %6839 = vlog2.f32 %v5104_v18 }
 0x771   :  { %v6840_v27 = vpop.eup %6839 }
 0x772   :  { %v5106_v19 = vmul.f32 0.6931472, %v6840_v27 }
 0x774   :  { %v5107_v29 = vadd.f32 %v5106_v19, %v5094_v8 }
 0x776   :  { %v5120_v23 = vsub.f32 %v4978_v41, %v5107_v29 }
 0x7cc   :  { %v5079_v30 = vpop.xlane.xlu0 %5078 }
 0x7cd   :  { %v5080_v31 = vsub.f32 %v4978_v41, %v5079_v30 }
 0x7cf   :  { %v5081_v57 = vmul.f32 1.442695, %v5080_v31 }
 0x7d1   :  { %6841 = vpow2.f32 %v5081_v57 }
 0x7db   :  { %v6842_v32 = vpop.eup %6841 }
 0x7dc   :  { %v5083_v43 = vsel %vm5065_vm4, %v6842_v32, 0.0 }
 0x7dd   :  { %5084 = vadd.xlane.f32.xlu0 %v5083_v43 }
 0x7e2   :  { %v5068_v33 = vpop.xlane.xlu1 %5067 }
 0x7e3   :  { %v5069_v34 = vsub.f32 %v5064_v60, %v5068_v33 }
 0x7e5   :  { %v5070_v35 = vmul.f32 1.442695, %v5069_v34 }
 0x7e7   :  { %6843 = vpow2.f32 %v5070_v35 }
 0x7f1   :  { %v6844_v36 = vpop.eup %6843 }
 0x7f2   :  { %v5072_v37 = vsel %vm5065_vm4, %v6844_v36, 0.0 }
 0x7f3   :  { %5073 = vadd.xlane.f32.xlu1 %v5072_v37 }
 0x86a   :  { %v5085_v38 = vpop.xlane.xlu0 %5084 }
 0x86b   :  { %6845 = vlog2.f32 %v5085_v38 }
 0x875   :  { %v6846_v50 = vpop.eup %6845 }
 0x876   :  { %v5087_v40 = vmul.f32 0.6931472, %v6846_v50 }
 0x878   :  { %v5088_v42 = vadd.f32 %v5087_v40, %v5079_v30 }
 0x87a   :  { %v5109_v47 = vsub.f32 %v4978_v41, %v5088_v42 }
 0x880   :  { %v5074_v39 = vpop.xlane.xlu1 %5073 }
 0x881   :  { %6847 = vrcp.f32 %v5074_v39 }
 0x88b   :  { %v6848_v45 = vpop.eup %6847 }
 0x88c   :  { %v5076_v46 = vmul.f32 %v6848_v45, %v6844_v36 }
 0x88e   :  { %v5108_v10 = vsub.f32 0.0, %v5076_v46 }
 0x890   :  { %v5121_v48 = vmul.f32 %v5120_v23, %v5108_v10  ;;  %v5110_v54 = vmul.f32 %v5109_v47, %v5108_v10 }
 0x892   :  { %v5122_v12 = vsel %vm5065_vm4, %v5121_v48, 0.0  ;;  %v5111_v49 = vsel %vm5065_vm4, %v5110_v54, 0.0 }
 0x893   :  { %5123 = vadd.xlane.f32.xlu1 %v5122_v12  ;;  %5112 = vadd.xlane.f32.xlu0 %v5111_v49 }
 0x920   :  { %v5124_v52 = vpop.xlane.xlu1 %5123  ;;  %v5113_v55 = vpop.xlane.xlu0 %5112 }
 0x921   :  { %v5125_v56 = vrot.slane %v5124_v52, 4  ;;  %v5114_v58 = vrot.slane %v5113_v55, 4 }
 0x923   :  { %v5126_v59 = vadd.f32 %v5125_v56, %v5124_v52  ;;  %v5115_v61 = vadd.f32 %v5114_v58, %v5113_v55 }
 0x925   :  { %v5127_v53 = vrot.slane %v5126_v59, 2  ;;  %v5116_v62 = vrot.slane %v5115_v61, 2 }
 0x927   :  { %v5128_v63 = vadd.f32 %v5127_v53, %v5126_v59  ;;  %v5117_v0 = vadd.f32 %v5116_v62, %v5115_v61 }
 0x929   :  { %v5129_v44 = vrot.slane %v5128_v63, 1  ;;  %v5118_v41 = vrot.slane %v5117_v0, 1 }
 0x92b   :  { %v5130_v1 = vadd.f32 %v5129_v44, %v5128_v63  ;;  %v5119_v2 = vadd.f32 %v5118_v41, %v5117_v0 }
 0x92d   :  { %v5131_v28 = vadd.f32 %v5130_v1, %v5119_v2 }
 0x92f   :  { %v5132_v3 = vmul.f32 0.0625, %v5131_v28 }
 0x931   :  { %5134 = vst.msk [vmem:[#allocation14] sm:$0x1] %vm5133_vm5, %v5132_v3 }
 0x932   :  { %7014 = shalt.err (!%p7011_p4)
}
 0x933   :  { %s7015_s13 = scalar_lea.hbm %s7363_s7, 16 }
 0x934   :  { %p7016_p5 = scmp.ne.s32.totalorder %s7363_s7, %s7015_s13  ;;  %p7019_p6 = scmp.lt.u32.totalorder %s7015_s13, %s7363_s7 }
 0x936   :  { %p7021_p7 = pnand %p7019_p6, %p7016_p5 }
 0x938   :  { %7024 = shalt.err (!%p7021_p7)
}
 0x939   :  { %5144 = dma.vmem_to_hbm [thread:$0]  %s5142_s25, 16, %s7363_s7, [#allocation4]  }
 0x93a   :  { %7033 = dma.done.wait [#allocation4], 16  }
 0x93b   :  { %7034 = vsyncadd [#allocation4], 4294967280 }
 0x93c   :  { %5148 = vsyncpa [#allocation3], 1 }
 0x93d   :  { %5149 = vsyncpa [#allocation6], 1 }
 0x93e   :  { %5150 = vsyncpa [#allocation9], 1 }
 0x93f   :  { %5151 = vsyncpa [#allocation12], 1 }
 0x940   :  { %5152 = vsyncpa [#allocation4], 1 }

</bundles_post_ra>
